<compile_context>
chip_gen: v7x
topology: tpu7x:2x2x1
jax: 0.10.0
libtpu: 0.0.40
codegen_flags: <defaults>
</compile_context>

<pallas_src>
import functools

import jax
import jax.numpy as jnp
from jax.experimental import pallas as pl
from jax.experimental.pallas import tpu as pltpu


def _round_up(n, m):
    return ((n + m - 1) // m) * m


def _pick_k_tile(D):
    # Prefer 256-wide K chunks (full MXU K dim on v6e/v7x).  Fall back to a
    # single K step (block = full D) for D that has no nice divisor.
    for tk in (256, 512, 128):
        if D % tk == 0:
            return tk
    return D


def _scorer_kernel(x_ref, w1_ref, b1_ref, w2_ref, b2_ref, o_ref, acc_ref):
    # x_ref : (bt, tk) f32  | w1_ref: (tk, H) bf16 | b1_ref: (1, H) f32
    # w2_ref: (1, H)  f32   | b2_ref: (1,) f32 SMEM | o_ref: (bt, 1) f32
    # acc_ref: (bt, H) f32 VMEM scratch, resident across the K grid axis.
    k = pl.program_id(1)

    @pl.when(k == 0)
    def _():
        acc_ref[...] = jnp.zeros_like(acc_ref)

    # f32 -> bf16 cast in VMEM (VPU, hidden under the MXU); accumulate in f32.
    xk = x_ref[...].astype(jnp.bfloat16)
    acc_ref[...] += jnp.dot(xk, w1_ref[...], preferred_element_type=jnp.float32)

    @pl.when(k == pl.num_programs(1) - 1)
    def _():
        h = jnp.maximum(acc_ref[...] + b1_ref[...], 0.0)
        # 512 -> 1 projection: VPU multiply + lane (XLU) reduce, no N=1 matmul.
        logit = jnp.sum(h * w2_ref[...], axis=-1, keepdims=True) + b2_ref[0]
        o_ref[...] = jax.nn.sigmoid(logit).astype(o_ref.dtype)


@functools.lru_cache(maxsize=None)
def _build_scorer(B, D, H, bt, tk):
    nb = pl.cdiv(B, bt)
    nk = D // tk
    return pl.pallas_call(
        _scorer_kernel,
        out_shape=jax.ShapeDtypeStruct((B, 1), jnp.float32),
        grid_spec=pltpu.PrefetchScalarGridSpec(
            num_scalar_prefetch=0,
            grid=(nb, nk),
            in_specs=[
                pl.BlockSpec((bt, tk), lambda i, k: (i, k)),        # x chunk (f32)
                pl.BlockSpec((tk, H), lambda i, k: (k, 0)),         # W1 chunk (bf16)
                pl.BlockSpec((1, H), lambda i, k: (0, 0)),          # b1 row (f32)
                pl.BlockSpec((1, H), lambda i, k: (0, 0)),          # w2 row (f32)
                pl.BlockSpec(memory_space=pltpu.MemorySpace.SMEM),  # b2 scalar
            ],
            out_specs=pl.BlockSpec((bt, 1), lambda i, k: (i, 0)),
            scratch_shapes=[pltpu.VMEM((bt, H), jnp.float32)],
        ),
        compiler_params=pltpu.CompilerParams(
            dimension_semantics=("parallel", "arbitrary")),
    )


@functools.partial(jax.jit, static_argnames=("batch_tile",))
def anomaly_scorer(x, w1, b1, w2, b2, *, batch_tile=512):
    """x: (B, D) float32. Returns (B,) float32 (matches .squeeze(-1))."""
    B, D = x.shape
    H = w1.shape[1]  # 512

    # Batch tile: 512 default (sweep 512/1024 for large-B throughput; keep a
    # multiple of 256 on v6e/v7x).  Small B gets a single 128-aligned tile.
    bt = batch_tile if B >= batch_tile else min(batch_tile, _round_up(B, 128))
    tk = _pick_k_tile(D)

    # One-time bf16 cast of W1; x is NOT cast here (kernel casts in VMEM).
    w1b = w1.astype(jnp.bfloat16)
    b1f = b1.astype(jnp.float32).reshape(1, H)
    w2f = w2.astype(jnp.float32).reshape(1, H)
    b2f = b2.astype(jnp.float32).reshape(1)

    out = _build_scorer(B, D, H, bt, tk)(
        x.astype(jnp.float32), w1b, b1f, w2f, b2f)
    return out[:, 0]


if __name__ == "__main__":
    # D/H are fixed by the module (input_dim=2304, hidden=512); a ragged B
    # exercises the partial-edge-block (no-pad) path and 2 batch grid steps.
    B, D, H = 600, 2304, 512

    key = jax.random.PRNGKey(0)
    kx, kp = jax.random.split(key)
    x = jax.random.normal(kx, (B, D), jnp.float32)

    # Deterministic synthetic parameters (shapes match the nn.Module; the
    # Linear(D,512) weight is stored transposed as (D, H) for x @ W1).
    k1, k2, k3, k4 = jax.random.split(kp, 4)
    scale1 = 1.0 / jnp.sqrt(D)
    w1 = jax.random.uniform(k1, (D, H), jnp.float32, -scale1, scale1)
    b1 = jax.random.uniform(k2, (H,), jnp.float32, -scale1, scale1)
    scale2 = 1.0 / jnp.sqrt(H)
    w2 = jax.random.uniform(k3, (H,), jnp.float32, -scale2, scale2)
    b2 = jax.random.uniform(k4, (1,), jnp.float32, -scale2, scale2)

    scores = anomaly_scorer(x, w1, b1, w2, b2)
    scores = jax.block_until_ready(scores)
    assert scores.shape == (B,)

    # Reference at kernel precision (bf16 matmul operands, f32 accumulation).
    xb = x.astype(jnp.bfloat16).astype(jnp.float32)
    w1b = w1.astype(jnp.bfloat16).astype(jnp.float32)
    h = jnp.maximum(xb @ w1b + b1[None, :], 0.0)
    ref = jax.nn.sigmoid(jnp.sum(h * w2[None, :], axis=-1) + b2[0])
    assert jnp.allclose(scores, ref, atol=5e-3, rtol=5e-3), \
        float(jnp.max(jnp.abs(scores - ref)))

    # Sanity vs. the full-f32 module math (looser tolerance for the bf16 path).
    h32 = jnp.maximum(x @ w1 + b1[None, :], 0.0)
    ref32 = jax.nn.sigmoid(jnp.sum(h32 * w2[None, :], axis=-1) + b2[0])
    assert jnp.allclose(scores, ref32, atol=2e-2, rtol=2e-2), \
        float(jnp.max(jnp.abs(scores - ref32)))

    print("KERNEL_OK")
</pallas_src>

<mosaic_0001>
module attributes {stable_mosaic.version = 11 : i64} {
  func.func @_scorer_kernel(%arg0: i32, %arg1: i32, %arg2: memref<512x256xf32, #tpu.memory_space<vmem>>, %arg3: memref<256x512xbf16, #tpu.memory_space<vmem>>, %arg4: memref<1x512xf32, #tpu.memory_space<vmem>>, %arg5: memref<1x512xf32, #tpu.memory_space<vmem>>, %arg6: memref<1xf32, #tpu.memory_space<smem>>, %arg7: memref<512x1xf32, #tpu.memory_space<vmem>>, %arg8: memref<512x512xf32, #tpu.memory_space<vmem>>) attributes {dimension_semantics = [#tpu.dimension_semantics<parallel>, #tpu.dimension_semantics<arbitrary>], iteration_bounds = array<i64: 2, 9>, scalar_prefetch = 0 : i64, scratch_operands = 1 : i64, tpu.core_type = #tpu.core_type<tc>, window_params = [{transform_indices = @transform_0, window_bounds = array<i64: 512, 256>}, {transform_indices = @transform_1, window_bounds = array<i64: 256, 512>}, {pipeline_mode = #tpu.pipeline_mode<synchronous>, transform_indices = @transform_2, window_bounds = array<i64: 1, 512>}, {pipeline_mode = #tpu.pipeline_mode<synchronous>, transform_indices = @transform_3, window_bounds = array<i64: 1, 512>}, {transform_indices = @transform_4, window_bounds = array<i64: 1>}, {transform_indices = @transform_5, window_bounds = array<i64: 512, 1>}]} {
    %c0_i32 = arith.constant 0 : i32
    %0 = arith.cmpi eq, %arg1, %c0_i32 : i32
    %1 = arith.extui %0 : i1 to i32
    %c0_i32_0 = arith.constant 0 : i32
    %2 = arith.cmpi ne, %1, %c0_i32_0 : i32
    scf.if %2 {
      %cst_9 = arith.constant 0.000000e+00 : f32
      %13 = vector.broadcast %cst_9 : f32 to vector<512x512xf32>
      %c0_10 = arith.constant 0 : index
      %c0_11 = arith.constant 0 : index
      %14 = vector.load %arg8[%c0_10, %c0_11] : memref<512x512xf32, #tpu.memory_space<vmem>>, vector<512x512xf32>
      tpu.vector_store %arg8[%c0_10, %c0_11], %13 {strides = array<i32>} : memref<512x512xf32, #tpu.memory_space<vmem>>, vector<512x512xf32>,
    } else {
    }
    %c0 = arith.constant 0 : index
    %c0_1 = arith.constant 0 : index
    %3 = vector.load %arg2[%c0, %c0_1] : memref<512x256xf32, #tpu.memory_space<vmem>>, vector<512x256xf32>
    %4 = arith.truncf %3 : vector<512x256xf32> to vector<512x256xbf16>
    %c0_2 = arith.constant 0 : index
    %c0_3 = arith.constant 0 : index
    %5 = vector.load %arg8[%c0_2, %c0_3] : memref<512x512xf32, #tpu.memory_space<vmem>>, vector<512x512xf32>
    %c0_4 = arith.constant 0 : index
    %c0_5 = arith.constant 0 : index
    %6 = vector.load %arg3[%c0_4, %c0_5] : memref<256x512xbf16, #tpu.memory_space<vmem>>, vector<256x512xbf16>
    %cst = arith.constant dense<0.000000e+00> : vector<512x512xf32>
    %7 = tpu.matmul %4, %6, %cst {dimension_numbers = #tpu.dot_dimension_numbers<[1], [0], [0], [1], [0, 0, 1, 1], [], []>} : vector<512x256xbf16>, vector<256x512xbf16>, vector<512x512xf32> -> vector<512x512xf32>
    %8 = arith.addf %5, %7 : vector<512x512xf32>
    %c0_6 = arith.constant 0 : index
    %c0_7 = arith.constant 0 : index
    %9 = vector.load %arg8[%c0_6, %c0_7] : memref<512x512xf32, #tpu.memory_space<vmem>>, vector<512x512xf32>
    tpu.vector_store %arg8[%c0_6, %c0_7], %8 {strides = array<i32>} : memref<512x512xf32, #tpu.memory_space<vmem>>, vector<512x512xf32>,
    %c8_i32 = arith.constant 8 : i32
    %10 = arith.cmpi eq, %arg1, %c8_i32 : i32
    %11 = arith.extui %10 : i1 to i32
    %c0_i32_8 = arith.constant 0 : i32
    %12 = arith.cmpi ne, %11, %c0_i32_8 : i32
    scf.if %12 {
      %c0_9 = arith.constant 0 : index
      %c0_10 = arith.constant 0 : index
      %13 = vector.load %arg8[%c0_9, %c0_10] : memref<512x512xf32, #tpu.memory_space<vmem>>, vector<512x512xf32>
      %c0_11 = arith.constant 0 : index
      %c0_12 = arith.constant 0 : index
      %14 = vector.load %arg4[%c0_11, %c0_12] : memref<1x512xf32, #tpu.memory_space<vmem>>, vector<1x512xf32>
      %15 = vector.broadcast %14 : vector<1x512xf32> to vector<512x512xf32>
      %16 = arith.addf %13, %15 : vector<512x512xf32>
      %cst_13 = arith.constant 0.000000e+00 : f32
      %17 = vector.broadcast %cst_13 : f32 to vector<512x512xf32>
      %18 = arith.maximumf %16, %17 : vector<512x512xf32>
      %c0_14 = arith.constant 0 : index
      %c0_15 = arith.constant 0 : index
      %19 = vector.load %arg5[%c0_14, %c0_15] : memref<1x512xf32, #tpu.memory_space<vmem>>, vector<1x512xf32>
      %20 = vector.broadcast %19 : vector<1x512xf32> to vector<512x512xf32>
      %21 = arith.mulf %18, %20 : vector<512x512xf32>
      %cst_16 = arith.constant dense<0.000000e+00> : vector<512xf32>
      %22 = vector.multi_reduction <add>, %21, %cst_16 [1] : vector<512x512xf32> to vector<512xf32>
      %23 = vector.shape_cast %22 : vector<512xf32> to vector<512x1xf32>
      %c0_17 = arith.constant 0 : index
      %24 = memref.load %arg6[%c0_17] : memref<1xf32, #tpu.memory_space<smem>>
      %25 = vector.broadcast %24 : f32 to vector<512x1xf32>
      %26 = arith.addf %23, %25 : vector<512x1xf32>
      %27 = arith.negf %26 : vector<512x1xf32>
      %28 = math.exp %27 : vector<512x1xf32>
      %cst_18 = arith.constant 1.000000e+00 : f32
      %29 = vector.broadcast %cst_18 : f32 to vector<512x1xf32>
      %30 = arith.addf %29, %28 : vector<512x1xf32>
      %31 = arith.divf %29, %30 : vector<512x1xf32>
      %c0_19 = arith.constant 0 : index
      %c0_20 = arith.constant 0 : index
      %32 = vector.load %arg7[%c0_19, %c0_20] : memref<512x1xf32, #tpu.memory_space<vmem>>, vector<512x1xf32>
      tpu.vector_store %arg7[%c0_19, %c0_20], %31 {strides = array<i32>} : memref<512x1xf32, #tpu.memory_space<vmem>>, vector<512x1xf32>,
    } else {
    }
    return
  }
  func.func @transform_0(%arg0: i32, %arg1: i32) -> (i32, i32) {
    %c0_i32 = arith.constant 0 : i32
    return %arg0, %arg1 : i32, i32
  }
  func.func @transform_1(%arg0: i32, %arg1: i32) -> (i32, i32) {
    %c0_i32 = arith.constant 0 : i32
    %c0_i32_0 = arith.constant 0 : i32
    return %arg1, %c0_i32 : i32, i32
  }
  func.func @transform_2(%arg0: i32, %arg1: i32) -> (i32, i32) {
    %c0_i32 = arith.constant 0 : i32
    %c0_i32_0 = arith.constant 0 : i32
    %c0_i32_1 = arith.constant 0 : i32
    return %c0_i32, %c0_i32_0 : i32, i32
  }
  func.func @transform_3(%arg0: i32, %arg1: i32) -> (i32, i32) {
    %c0_i32 = arith.constant 0 : i32
    %c0_i32_0 = arith.constant 0 : i32
    %c0_i32_1 = arith.constant 0 : i32
    return %c0_i32, %c0_i32_0 : i32, i32
  }
  func.func @transform_4(%arg0: i32, %arg1: i32) -> i32 {
    %c0_i32 = arith.constant 0 : i32
    %c0_i32_0 = arith.constant 0 : i32
    return %c0_i32 : i32
  }
  func.func @transform_5(%arg0: i32, %arg1: i32) -> (i32, i32) {
    %c0_i32 = arith.constant 0 : i32
    %c0_i32_0 = arith.constant 0 : i32
    return %arg0, %c0_i32 : i32, i32
  }
}

</mosaic_0001>

<bundles_post_ra>
// kernel: anomaly_scorer.1
= control target key start
LH: loop header
LB: loop body
LE: loop exit
PB: predicated region body
PF: predicated region fallthrough
CT: control target
= control target key end

     0   :  { %s7982_s0 = inlined_call_operand.vmem [shape: f32[600,2304], index: 0, kind: input, shape index: {}]   ;;  %s7983_s1 = inlined_call_operand.vmem [shape: bf16[2304,512], index: 1, kind: input, shape index: {}]   ;;  %s7984_s2 = inlined_call_operand.vmem [shape: f32[1,512], index: 2, kind: input, shape index: {}]   ;;  %s7985_s3 = inlined_call_operand.vmem [shape: f32[1,512], index: 3, kind: input, shape index: {}]   ;;  %s7986_s4 = inlined_call_operand.<no memory space> [shape: f32[1], index: 4, kind: input, shape index: {}]   ;;  %s7987_s5 = inlined_call_operand.vmem [shape: f32[600,1], index: 5, kind: output, shape index: {}]  }
   0x1   :  { %7990 = sst [smem:[#allocation8_spill]] %s7982_s0 }
   0x2   :  { %10 = sst [smem:[#allocation3]] %s7986_s4 }
   0x3   :  { %s6182_s20 = smov 0   ;;  %s6184_s21 = smov 0  }
   0x4   :  { %s6186_s22 = smov 0   ;;  %s6188_s23 = smov 0  }
   0x5   :  { %s6190_s24 = smov 0   ;;  %s6192_s25 = smov 0  }
   0x6   :  { %s6194_s26 = smov 0   ;;  %s6196_s27 = smov 0  }
   0x7   :  { %s6198_s28 = smov 0  }
   0x8 LB: > { %s25_s4 = sadd.s32 1, %s6074_s26  ;;  %s28_s29 = sadd.s32 1, %s6078_s27  ;;  %s6082_s28 = sphi %s6198_s28, %s16_s28   ;;  %s6078_s27 = sphi %s6196_s27, %s8015_s27   ;;  %s6074_s26 = sphi %s6194_s26, %s8014_s26   ;;  %s6070_s25 = sphi %s6192_s25, %s8013_s25   ;;  %s6066_s24 = sphi %s6190_s24, %s8012_s24   ;;  %s6062_s23 = sphi %s6188_s23, %s8011_s23   ;;  %s6058_s22 = sphi %s6186_s22, %s8010_s22   ;;  %s6054_s21 = sphi %s6184_s21, %s8009_s21   ;;  %s6050_s20 = sphi %s6182_s20, %s8008_s20  }
   0x9   : > { %p26_p0 = scmp.ge.s32.totalorder %s25_s4, 9  ;;  %p44_p1 = scmp.ne.s32.totalorder %s6062_s23, %s6058_s22 }
   0xa   : > { %s5215_s30 = sadd.s32 4294967295, %s6082_s28   ;;  %p45_p2 = scmp.eq.s32.totalorder %s6082_s28, 0 }
   0xb   : > { %s8017_s4 = smov (%p26_p0, %s25_s4), 0  ;;  %s8019_s29 = smov (!%p26_p0, %s28_s29), %s6078_s27 }
   0xc   : > { %7991 = sst [smem:[#allocation6_spill]] %s8017_s4  ;;  %p30_p3 = scmp.ge.s32.totalorder %s8019_s29, 2 }
   0xd   : > { %s33_s6 = ssub.s32 %s6074_s26, %s8017_s4  ;;  %p6238_p4 = por %p45_p2, %p44_p1 }
   0xe   : > { %p162_p5 = scmp.ne.s32.totalorder %s6054_s21, %s6050_s20  ;;  %s8021_s29 = smov (%p30_p3, %s8019_s29), 0 }
   0xf   : > { %7993 = sst [smem:[#allocation7_spill]] %s8021_s29  ;;  %s37_s8 = sadd.s32 1, %s6062_s23 }
  0x10   : > { %p163_p6 = scmp.eq.s32.totalorder %s5215_s30, 17  ;;  %s32_s9 = ssub.s32 %s6078_s27, %s8021_s29 }
  0x11   : > { %s152_s10 = sadd.s32 1, %s6054_s21  ;;  %s34_s11 = sor.u32 %s33_s6, %s32_s9 }
  0x12   : > { %p150_p7 = scmp.eq.s32.totalorder %s32_s9, 0  ;;  %p35_p8 = scmp.eq.s32.totalorder %s34_s11, 0 }
  0x13   : > { %p6250_p9 = por %p163_p6, %p162_p5  ;;  %p5218_p10 = scmp.ge.s32.totalorder %s6082_s28, 18 }
  0x14   : > { %s6255_s13 = scalar_select %p150_p7, %s6054_s21, %s152_s10  }
  0x15   : > { %s6258_s14 = scalar_select %p35_p8, %s6062_s23, %s37_s8  }
  0x16   : > { %194 = sbr.rel (%p5218_p10) target bundleno = 107 (0x6b), region = 28 }
  0x1d   : > { %197 = sbr.rel (!%p6238_p4) target bundleno = 107 (0x6b), region = 32  ;;  %s199_s15 = sand.u32 (%p6238_p4), 1, %s6062_s23  }
  0x1e   : > { %s5220_s16 = sshll.u32 (%p6238_p4), %s6078_s27, 6  ;;  %s5219_s17 = sshll.u32 (%p6238_p4), %s199_s15, 10 }
  0x1f   : > { %s5221_s18 = sshll.u32 (%p6238_p4), %s6074_s26, 1  ;;  %s204_s19 = ssub.s32 (%p6238_p4), 75, %s5220_s16 }
  0x20   : > { %p205_p11 = scmp.lt.s32.totalorder (%p6238_p4), %s204_s19, 64  ;;  %s5394_s30 = smul.u32 (%p6238_p4), 1152, %s6078_s27 }
  0x21   : > { %s7995_s0 = sld [smem:[#allocation8_spill]] (%p6238_p4)  ;;  %s6275_s29 = scalar_lea.vmem (%p6238_p4), [#allocation4], %s5219_s17  }
  0x22   : > { %s211_s6 = sadd.s32 (%p6238_p4), %s5394_s30, %s5221_s18 }
  0x23   : > { %s5226_s9 = sshll.u32 (%p6238_p4), %s211_s6, 3 }
  0x24   : > { %s8023_s19 = smov (!%p205_p11, %s204_s19), 64 }
  0x25   : > { %s5388_s8 = sshll.u32 %s8023_s19, 8 }
  0x26   : > { %p5227_p12 = scmp.eq.s32.totalorder %s5388_s8, 0 }
  0x27   : > { %s6273_s11 = scalar_lea.vmem %s7995_s0, %s5226_s9   ;;  %s6278_s15 = sshrl.u32 (!%p5227_p12), %s8023_s19, 5 }
  0x28   : > { %216 = sbr.rel (%p5227_p12) target bundleno = 107 (0x6b), region = 36  ;;  %p5228_p13 = scmp.le.s32.totalorder (!%p5227_p12), %s6278_s15, 0 }
  0x2f   : > { %5126 = sbr.rel (%p5228_p13) target bundleno = 87 (0x57), region = 172  ;;  %s7996_s16 = smov (!%p5228_p13), %s6275_s29 }
  0x30   : > { %s7997_s18 = smov (!%p5228_p13), %s6273_s11  ;;  %s6287_s30 = smov (!%p5228_p13), 0  }
  0x31   : > { %s6289_s6 = smov (!%p5228_p13), 0  }
  0x36 LB: >> { %v229_v0 = vld [vmem:[%s6090_s18] sm:$0xff]  ;;  %v231_v1 = vld [vmem:[%s6090_s18 + $0x90] sm:$0xff]  ;;  %s357_s17 = sadd.s32 1, %s6094_s30  ;;  %v293_v32 = vld [vmem:[%s6090_s18 + $0x8] sm:$0xff]  ;;  %s223_s6 = sadd.s32 1, %s6098_s6   ;;  %s6098_s6 = sphi %s6289_s6, %s223_s6   ;;  %s6094_s30 = sphi %s6287_s30, %s8000_s30   ;;  %s6090_s18 = sphi %s7997_s18, %s7999_s18   ;;  %s6086_s16 = sphi %s7996_s16, %s7998_s16  }
  0x37   : >> { %v233_v2 = vld [vmem:[%s6090_s18 + $0x120] sm:$0xff]  ;;  %230 = vst [vmem:[%s6086_s16] sm:$0xff] %v229_v0  ;;  %232 = vst [vmem:[%s6086_s16 + $0x10] sm:$0xff] %v231_v1  ;;  %v235_v3 = vld [vmem:[%s6090_s18 + $0x1b0] sm:$0xff]  ;;  %p358_p0 = scmp.ge.s32.totalorder %s357_s17, %s6278_s15  ;;  %p222_p1 = scmp.ge.s32.totalorder %s223_s6, %s6278_s15 }
  0x38   : >> { %234 = vst [vmem:[%s6086_s16 + $0x20] sm:$0xff] %v233_v2  ;;  %v237_v4 = vld [vmem:[%s6090_s18 + $0x240] sm:$0xff]  ;;  %v239_v5 = vld [vmem:[%s6090_s18 + $0x2d0] sm:$0xff]  ;;  %236 = vst [vmem:[%s6086_s16 + $0x30] sm:$0xff] %v235_v3 }
  0x39   : >> { %238 = vst [vmem:[%s6086_s16 + $0x40] sm:$0xff] %v237_v4  ;;  %240 = vst [vmem:[%s6086_s16 + $0x50] sm:$0xff] %v239_v5  ;;  %v241_v6 = vld [vmem:[%s6090_s18 + $0x360] sm:$0xff]  ;;  %v243_v7 = vld [vmem:[%s6090_s18 + $0x3f0] sm:$0xff]  ;;  %s8025_s17 = smov (%p358_p0, %s357_s17), 0 }
  0x3a   : >> { %v245_v8 = vld [vmem:[%s6090_s18 + $0x480] sm:$0xff]  ;;  %242 = vst [vmem:[%s6086_s16 + $0x60] sm:$0xff] %v241_v6  ;;  %244 = vst [vmem:[%s6086_s16 + $0x70] sm:$0xff] %v243_v7  ;;  %v247_v9 = vld [vmem:[%s6090_s18 + $0x510] sm:$0xff]  ;;  %s360_s8 = smul.u32 4608, %s8025_s17  ;;  %s5229_s9 = sshll.u32 %s8025_s17, 9 }
  0x3b   : >> { %246 = vst [vmem:[%s6086_s16 + $0x80] sm:$0xff] %v245_v8  ;;  %v249_v10 = vld [vmem:[%s6090_s18 + $0x5a0] sm:$0xff]  ;;  %v251_v11 = vld [vmem:[%s6090_s18 + $0x630] sm:$0xff]  ;;  %248 = vst [vmem:[%s6086_s16 + $0x90] sm:$0xff] %v247_v9  ;;  %s6346_s10 = scalar_lea.vmem %s6275_s29, %s5229_s9 [#allocation4]   ;;  %s8000_s30 = smov %s8025_s17 }
  0x3c   : >> { %250 = vst [vmem:[%s6086_s16 + $0xa0] sm:$0xff] %v249_v10  ;;  %252 = vst [vmem:[%s6086_s16 + $0xb0] sm:$0xff] %v251_v11  ;;  %v253_v12 = vld [vmem:[%s6090_s18 + $0x6c0] sm:$0xff]  ;;  %v255_v13 = vld [vmem:[%s6090_s18 + $0x750] sm:$0xff]  ;;  %s6355_s7 = scalar_lea.vmem %s6273_s11, %s360_s8  }
  0x3d   : >> { %v257_v14 = vld [vmem:[%s6090_s18 + $0x7e0] sm:$0xff]  ;;  %254 = vst [vmem:[%s6086_s16 + $0xc0] sm:$0xff] %v253_v12  ;;  %256 = vst [vmem:[%s6086_s16 + $0xd0] sm:$0xff] %v255_v13  ;;  %v259_v15 = vld [vmem:[%s6090_s18 + $0x870] sm:$0xff] }
  0x3e   : >> { %258 = vst [vmem:[%s6086_s16 + $0xe0] sm:$0xff] %v257_v14  ;;  %v261_v16 = vld [vmem:[%s6090_s18 + $0x900] sm:$0xff]  ;;  %v263_v17 = vld [vmem:[%s6090_s18 + $0x990] sm:$0xff]  ;;  %260 = vst [vmem:[%s6086_s16 + $0xf0] sm:$0xff] %v259_v15 }
  0x3f   : >> { %262 = vst [vmem:[%s6086_s16 + $0x100] sm:$0xff] %v261_v16  ;;  %264 = vst [vmem:[%s6086_s16 + $0x110] sm:$0xff] %v263_v17  ;;  %v265_v18 = vld [vmem:[%s6090_s18 + $0xa20] sm:$0xff]  ;;  %v267_v19 = vld [vmem:[%s6090_s18 + $0xab0] sm:$0xff] }
  0x40   : >> { %v269_v20 = vld [vmem:[%s6090_s18 + $0xb40] sm:$0xff]  ;;  %266 = vst [vmem:[%s6086_s16 + $0x120] sm:$0xff] %v265_v18  ;;  %268 = vst [vmem:[%s6086_s16 + $0x130] sm:$0xff] %v267_v19  ;;  %v271_v21 = vld [vmem:[%s6090_s18 + $0xbd0] sm:$0xff] }
  0x41   : >> { %270 = vst [vmem:[%s6086_s16 + $0x140] sm:$0xff] %v269_v20  ;;  %v273_v22 = vld [vmem:[%s6090_s18 + $0xc60] sm:$0xff]  ;;  %v275_v23 = vld [vmem:[%s6090_s18 + $0xcf0] sm:$0xff]  ;;  %272 = vst [vmem:[%s6086_s16 + $0x150] sm:$0xff] %v271_v21 }
  0x42   : >> { %274 = vst [vmem:[%s6086_s16 + $0x160] sm:$0xff] %v273_v22  ;;  %276 = vst [vmem:[%s6086_s16 + $0x170] sm:$0xff] %v275_v23  ;;  %v277_v24 = vld [vmem:[%s6090_s18 + $0xd80] sm:$0xff]  ;;  %v279_v25 = vld [vmem:[%s6090_s18 + $0xe10] sm:$0xff] }
  0x43   : >> { %v281_v26 = vld [vmem:[%s6090_s18 + $0xea0] sm:$0xff]  ;;  %278 = vst [vmem:[%s6086_s16 + $0x180] sm:$0xff] %v277_v24  ;;  %280 = vst [vmem:[%s6086_s16 + $0x190] sm:$0xff] %v279_v25  ;;  %v283_v27 = vld [vmem:[%s6090_s18 + $0xf30] sm:$0xff] }
  0x44   : >> { %282 = vst [vmem:[%s6086_s16 + $0x1a0] sm:$0xff] %v281_v26  ;;  %v285_v28 = vld [vmem:[%s6090_s18 + $0xfc0] sm:$0xff]  ;;  %v287_v29 = vld [vmem:[%s6090_s18 + $0x1050] sm:$0xff]  ;;  %284 = vst [vmem:[%s6086_s16 + $0x1b0] sm:$0xff] %v283_v27 }
  0x45   : >> { %286 = vst [vmem:[%s6086_s16 + $0x1c0] sm:$0xff] %v285_v28  ;;  %288 = vst [vmem:[%s6086_s16 + $0x1d0] sm:$0xff] %v287_v29  ;;  %v289_v30 = vld [vmem:[%s6090_s18 + $0x10e0] sm:$0xff]  ;;  %v291_v31 = vld [vmem:[%s6090_s18 + $0x1170] sm:$0xff] }
  0x46   : >> { %290 = vst [vmem:[%s6086_s16 + $0x1e0] sm:$0xff] %v289_v30  ;;  %292 = vst [vmem:[%s6086_s16 + $0x1f0] sm:$0xff] %v291_v31  ;;  %v295_v33 = vld [vmem:[%s6090_s18 + $0x98] sm:$0xff]  ;;  %v297_v34 = vld [vmem:[%s6090_s18 + $0x128] sm:$0xff] }
  0x47   : >> { %294 = vst [vmem:[%s6086_s16 + $0x8] sm:$0xff] %v293_v32  ;;  %v299_v35 = vld [vmem:[%s6090_s18 + $0x1b8] sm:$0xff]  ;;  %296 = vst [vmem:[%s6086_s16 + $0x18] sm:$0xff] %v295_v33  ;;  %v301_v36 = vld [vmem:[%s6090_s18 + $0x248] sm:$0xff] }
  0x48   : >> { %298 = vst [vmem:[%s6086_s16 + $0x28] sm:$0xff] %v297_v34  ;;  %300 = vst [vmem:[%s6086_s16 + $0x38] sm:$0xff] %v299_v35  ;;  %v303_v37 = vld [vmem:[%s6090_s18 + $0x2d8] sm:$0xff]  ;;  %v305_v38 = vld [vmem:[%s6090_s18 + $0x368] sm:$0xff] }
  0x49   : >> { %302 = vst [vmem:[%s6086_s16 + $0x48] sm:$0xff] %v301_v36  ;;  %304 = vst [vmem:[%s6086_s16 + $0x58] sm:$0xff] %v303_v37  ;;  %v307_v39 = vld [vmem:[%s6090_s18 + $0x3f8] sm:$0xff]  ;;  %v309_v40 = vld [vmem:[%s6090_s18 + $0x488] sm:$0xff] }
  0x4a   : >> { %306 = vst [vmem:[%s6086_s16 + $0x68] sm:$0xff] %v305_v38  ;;  %v311_v41 = vld [vmem:[%s6090_s18 + $0x518] sm:$0xff]  ;;  %308 = vst [vmem:[%s6086_s16 + $0x78] sm:$0xff] %v307_v39  ;;  %v313_v42 = vld [vmem:[%s6090_s18 + $0x5a8] sm:$0xff] }
  0x4b   : >> { %310 = vst [vmem:[%s6086_s16 + $0x88] sm:$0xff] %v309_v40  ;;  %312 = vst [vmem:[%s6086_s16 + $0x98] sm:$0xff] %v311_v41  ;;  %v315_v43 = vld [vmem:[%s6090_s18 + $0x638] sm:$0xff]  ;;  %v317_v44 = vld [vmem:[%s6090_s18 + $0x6c8] sm:$0xff] }
  0x4c   : >> { %314 = vst [vmem:[%s6086_s16 + $0xa8] sm:$0xff] %v313_v42  ;;  %316 = vst [vmem:[%s6086_s16 + $0xb8] sm:$0xff] %v315_v43  ;;  %v319_v45 = vld [vmem:[%s6090_s18 + $0x758] sm:$0xff]  ;;  %v321_v46 = vld [vmem:[%s6090_s18 + $0x7e8] sm:$0xff] }
  0x4d   : >> { %318 = vst [vmem:[%s6086_s16 + $0xc8] sm:$0xff] %v317_v44  ;;  %v323_v47 = vld [vmem:[%s6090_s18 + $0x878] sm:$0xff]  ;;  %320 = vst [vmem:[%s6086_s16 + $0xd8] sm:$0xff] %v319_v45  ;;  %v325_v48 = vld [vmem:[%s6090_s18 + $0x908] sm:$0xff] }
  0x4e   : >> { %322 = vst [vmem:[%s6086_s16 + $0xe8] sm:$0xff] %v321_v46  ;;  %324 = vst [vmem:[%s6086_s16 + $0xf8] sm:$0xff] %v323_v47  ;;  %v327_v49 = vld [vmem:[%s6090_s18 + $0x998] sm:$0xff]  ;;  %v329_v50 = vld [vmem:[%s6090_s18 + $0xa28] sm:$0xff] }
  0x4f   : >> { %326 = vst [vmem:[%s6086_s16 + $0x108] sm:$0xff] %v325_v48  ;;  %328 = vst [vmem:[%s6086_s16 + $0x118] sm:$0xff] %v327_v49  ;;  %v331_v51 = vld [vmem:[%s6090_s18 + $0xab8] sm:$0xff]  ;;  %v333_v52 = vld [vmem:[%s6090_s18 + $0xb48] sm:$0xff] }
  0x50   : >> { %330 = vst [vmem:[%s6086_s16 + $0x128] sm:$0xff] %v329_v50  ;;  %v335_v53 = vld [vmem:[%s6090_s18 + $0xbd8] sm:$0xff]  ;;  %332 = vst [vmem:[%s6086_s16 + $0x138] sm:$0xff] %v331_v51  ;;  %v337_v54 = vld [vmem:[%s6090_s18 + $0xc68] sm:$0xff]  ;;  %225 = sbr.rel (!%p222_p1) target bundleno = 54 (0x36), region = 178 }
  0x51   : >> { %334 = vst [vmem:[%s6086_s16 + $0x148] sm:$0xff] %v333_v52  ;;  %336 = vst [vmem:[%s6086_s16 + $0x158] sm:$0xff] %v335_v53  ;;  %v339_v55 = vld [vmem:[%s6090_s18 + $0xcf8] sm:$0xff]  ;;  %v341_v56 = vld [vmem:[%s6090_s18 + $0xd88] sm:$0xff] }
  0x52   : >> { %338 = vst [vmem:[%s6086_s16 + $0x168] sm:$0xff] %v337_v54  ;;  %340 = vst [vmem:[%s6086_s16 + $0x178] sm:$0xff] %v339_v55  ;;  %v343_v57 = vld [vmem:[%s6090_s18 + $0xe18] sm:$0xff]  ;;  %v345_v58 = vld [vmem:[%s6090_s18 + $0xea8] sm:$0xff] }
  0x53   : >> { %342 = vst [vmem:[%s6086_s16 + $0x188] sm:$0xff] %v341_v56  ;;  %v347_v59 = vld [vmem:[%s6090_s18 + $0xf38] sm:$0xff]  ;;  %344 = vst [vmem:[%s6086_s16 + $0x198] sm:$0xff] %v343_v57  ;;  %v349_v60 = vld [vmem:[%s6090_s18 + $0xfc8] sm:$0xff] }
  0x54   : >> { %346 = vst [vmem:[%s6086_s16 + $0x1a8] sm:$0xff] %v345_v58  ;;  %348 = vst [vmem:[%s6086_s16 + $0x1b8] sm:$0xff] %v347_v59  ;;  %v351_v61 = vld [vmem:[%s6090_s18 + $0x1058] sm:$0xff]  ;;  %v353_v62 = vld [vmem:[%s6090_s18 + $0x10e8] sm:$0xff] }
  0x55   : >> { %350 = vst [vmem:[%s6086_s16 + $0x1c8] sm:$0xff] %v349_v60  ;;  %352 = vst [vmem:[%s6086_s16 + $0x1d8] sm:$0xff] %v351_v61  ;;  %v355_v63 = vld [vmem:[%s6090_s18 + $0x1178] sm:$0xff]  ;;  %s7999_s18 = smov %s6355_s7 }
  0x56   : >> { %354 = vst [vmem:[%s6086_s16 + $0x1e8] sm:$0xff] %v353_v62  ;;  %356 = vst [vmem:[%s6086_s16 + $0x1f8] sm:$0xff] %v355_v63  ;;  %s7998_s16 = smov %s6346_s10 }
  0x57 PF: > { %s6454_s8 = sand.u32 31, %s8023_s19   ;;  %s5231_s9 = smul.u32 4608, %s6278_s15 }
  0x58   : > { %s5389_s0 = sshll.u32 %s6278_s15, 9  ;;  %p5233_p2 = scmp.le.s32.totalorder %s6454_s8, 0 }
  0x59   : > { %s6459_s4 = scalar_lea.vmem %s6273_s11, %s5231_s9   ;;  %s6462_s10 = scalar_lea.vmem %s6275_s29, %s5389_s0 [#allocation4]  }
  0x5a   : > { %5140 = sbr.rel (%p5233_p2) target bundleno = 107 (0x6b), region = 183  ;;  %s6100_s6 = smov (!%p5233_p2), %s6462_s10  }
  0x5b   : > { %s6104_s16 = smov (!%p5233_p2), %s6459_s4   ;;  %s6108_s18 = smov (!%p5233_p2), 0  }
  0x5c   : > { %s6112_s30 = smov (!%p5233_p2), 0  }
  0x61 LB: >> { %v380_v0 = vld [vmem:[%s6106_s16] sm:$0xff]  ;;  %v382_v1 = vld [vmem:[%s6106_s16 + $0x8] sm:$0xff]  ;;  %s384_s0 = sadd.s32 1, %s6110_s18  ;;  %s374_s30 = sadd.s32 1, %s6114_s30   ;;  %s6114_s30 = sphi %s6112_s30, %s374_s30   ;;  %s6110_s18 = sphi %s6108_s18, %s6109_s18   ;;  %s6106_s16 = sphi %s6104_s16, %s389_s16   ;;  %s6102_s6 = sphi %s6100_s6, %s390_s6  }
  0x62   : >> { %381 = vst [vmem:[%s6102_s6] sm:$0xff] %v380_v0  ;;  %383 = vst [vmem:[%s6102_s6 + $0x8] sm:$0xff] %v382_v1  ;;  %p385_p3 = scmp.ge.s32.totalorder %s384_s0, %s6454_s8  ;;  %p373_p4 = scmp.ge.s32.totalorder %s374_s30, %s6454_s8 }
  0x64   : >> { %s8027_s0 = smov (%p385_p3, %s384_s0), 0  ;;  %376 = sbr.rel (!%p373_p4) target bundleno = 97 (0x61), region = 189 }
  0x65   : >> { %s387_s29 = smul.u32 144, %s8027_s0  ;;  %s5234_s19 = sshll.u32 %s8027_s0, 4 }
  0x66   : >> { %s390_s6 = scalar_lea.vmem %s6462_s10, %s5234_s19 [#allocation4]   ;;  %s6109_s18 = smov %s8027_s0  }
  0x67   : >> { %s389_s16 = scalar_lea.vmem %s6459_s4, %s387_s29  }
  0x6b PF: > { %p5235_p5 = scmp.ge.s32.totalorder %s6082_s28, 1  ;;  %p405_p6 = scmp.lt.s32.totalorder %s6082_s28, 19 }
  0x6d   : > { %p406_p7 = pnand %p5235_p5, %p405_p6 }
  0x6e   : > { %s412_s11 = sand.u32 (!%p406_p7), 1, %s6058_s22   ;;  %s441_s15 = sand.u32 (!%p406_p7), 1, %s6050_s20  }
  0x6f   : > { %409 = sbr.rel (%p406_p7) target bundleno = 1269 (0x4f5), region = 66  ;;  %s5236_s17 = sshll.u32 (!%p406_p7), %s412_s11, 10 }
  0x70   : > { %s5237_s7 = sshll.u32 (!%p406_p7), %s441_s15, 9  ;;  %s5238_s9 = sshll.u32 (!%p406_p7), %s6066_s24, 5 }
  0x71   : > { %p452_p8 = scmp.lt.s32.totalorder (!%p406_p7), %s5238_s9, 287  ;;  %s6481_s16 = scalar_lea.vmem (!%p406_p7), [#allocation4], %s5236_s17 }
  0x72   : > { %s6483_s18 = scalar_lea.vmem (!%p406_p7), [#allocation5], %s5237_s7   ;;  %p5241_p10 = scmp.ne.s32.totalorder (!%p406_p7), %s6066_s24, 0 }
  0x76   : > { %s8029_s9 = smov (!%p452_p8, %s5238_s9), 287  ;;  %466 = sbr.rel (%p5241_p10) target bundleno = 248 (0xf8), region = 74 }
  0x77   : > { %s5390_s4 = sshll.u32 %s8029_s9, 4  ;;  %v6148_v2 = vmov (!%p5241_p10), 0.0  }
  0x78   : > { %s6479_s6 = scalar_lea.vmem %s7983_s1, %s5390_s4  ;;  %467 = vst [vmem:[#allocation2] sm:$0xff] (!%p5241_p10), %v6148_v2  ;;  %468 = vst [vmem:[#allocation2 + $0x8] sm:$0xff] (!%p5241_p10), %v6148_v2 }
  0x79   : > { %469 = vst [vmem:[#allocation2 + $0x10] sm:$0xff] (!%p5241_p10), %v6148_v2  ;;  %470 = vst [vmem:[#allocation2 + $0x18] sm:$0xff] (!%p5241_p10), %v6148_v2 }
  0x7a   : > { %471 = vst [vmem:[#allocation2 + $0x20] sm:$0xff] (!%p5241_p10), %v6148_v2  ;;  %472 = vst [vmem:[#allocation2 + $0x28] sm:$0xff] (!%p5241_p10), %v6148_v2 }
  0x7b   : > { %473 = vst [vmem:[#allocation2 + $0x30] sm:$0xff] (!%p5241_p10), %v6148_v2  ;;  %474 = vst [vmem:[#allocation2 + $0x38] sm:$0xff] (!%p5241_p10), %v6148_v2 }
  0x7c   : > { %475 = vst [vmem:[#allocation2 + $0x40] sm:$0xff] (!%p5241_p10), %v6148_v2  ;;  %476 = vst [vmem:[#allocation2 + $0x48] sm:$0xff] (!%p5241_p10), %v6148_v2 }
  0x7d   : > { %477 = vst [vmem:[#allocation2 + $0x50] sm:$0xff] %v6148_v2  ;;  %478 = vst [vmem:[#allocation2 + $0x58] sm:$0xff] %v6148_v2 }
  0x7e   : > { %479 = vst [vmem:[#allocation2 + $0x60] sm:$0xff] %v6148_v2  ;;  %480 = vst [vmem:[#allocation2 + $0x68] sm:$0xff] %v6148_v2 }
  0x7f   : > { %481 = vst [vmem:[#allocation2 + $0x70] sm:$0xff] %v6148_v2  ;;  %482 = vst [vmem:[#allocation2 + $0x78] sm:$0xff] %v6148_v2 }
  0x80   : > { %483 = vst [vmem:[#allocation2 + $0x80] sm:$0xff] %v6148_v2  ;;  %484 = vst [vmem:[#allocation2 + $0x88] sm:$0xff] %v6148_v2 }
  0x81   : > { %485 = vst [vmem:[#allocation2 + $0x90] sm:$0xff] %v6148_v2  ;;  %486 = vst [vmem:[#allocation2 + $0x98] sm:$0xff] %v6148_v2 }
  0x82   : > { %487 = vst [vmem:[#allocation2 + $0xa0] sm:$0xff] %v6148_v2  ;;  %488 = vst [vmem:[#allocation2 + $0xa8] sm:$0xff] %v6148_v2 }
  0x83   : > { %489 = vst [vmem:[#allocation2 + $0xb0] sm:$0xff] %v6148_v2  ;;  %490 = vst [vmem:[#allocation2 + $0xb8] sm:$0xff] %v6148_v2 }
  0x84   : > { %491 = vst [vmem:[#allocation2 + $0xc0] sm:$0xff] %v6148_v2  ;;  %492 = vst [vmem:[#allocation2 + $0xc8] sm:$0xff] %v6148_v2 }
  0x85   : > { %493 = vst [vmem:[#allocation2 + $0xd0] sm:$0xff] %v6148_v2  ;;  %494 = vst [vmem:[#allocation2 + $0xd8] sm:$0xff] %v6148_v2 }
  0x86   : > { %495 = vst [vmem:[#allocation2 + $0xe0] sm:$0xff] %v6148_v2  ;;  %496 = vst [vmem:[#allocation2 + $0xe8] sm:$0xff] %v6148_v2 }
  0x87   : > { %497 = vst [vmem:[#allocation2 + $0xf0] sm:$0xff] %v6148_v2  ;;  %498 = vst [vmem:[#allocation2 + $0xf8] sm:$0xff] %v6148_v2 }
  0x88   : > { %499 = vst [vmem:[#allocation2 + $0x100] sm:$0xff] %v6148_v2  ;;  %500 = vst [vmem:[#allocation2 + $0x108] sm:$0xff] %v6148_v2 }
  0x89   : > { %501 = vst [vmem:[#allocation2 + $0x110] sm:$0xff] %v6148_v2  ;;  %502 = vst [vmem:[#allocation2 + $0x118] sm:$0xff] %v6148_v2 }
  0x8a   : > { %503 = vst [vmem:[#allocation2 + $0x120] sm:$0xff] %v6148_v2  ;;  %504 = vst [vmem:[#allocation2 + $0x128] sm:$0xff] %v6148_v2 }
  0x8b   : > { %505 = vst [vmem:[#allocation2 + $0x130] sm:$0xff] %v6148_v2  ;;  %506 = vst [vmem:[#allocation2 + $0x138] sm:$0xff] %v6148_v2 }
  0x8c   : > { %507 = vst [vmem:[#allocation2 + $0x140] sm:$0xff] %v6148_v2  ;;  %508 = vst [vmem:[#allocation2 + $0x148] sm:$0xff] %v6148_v2 }
  0x8d   : > { %509 = vst [vmem:[#allocation2 + $0x150] sm:$0xff] %v6148_v2  ;;  %510 = vst [vmem:[#allocation2 + $0x158] sm:$0xff] %v6148_v2 }
  0x8e   : > { %511 = vst [vmem:[#allocation2 + $0x160] sm:$0xff] %v6148_v2  ;;  %512 = vst [vmem:[#allocation2 + $0x168] sm:$0xff] %v6148_v2 }
  0x8f   : > { %513 = vst [vmem:[#allocation2 + $0x170] sm:$0xff] %v6148_v2  ;;  %514 = vst [vmem:[#allocation2 + $0x178] sm:$0xff] %v6148_v2 }
  0x90   : > { %515 = vst [vmem:[#allocation2 + $0x180] sm:$0xff] %v6148_v2  ;;  %516 = vst [vmem:[#allocation2 + $0x188] sm:$0xff] %v6148_v2 }
  0x91   : > { %517 = vst [vmem:[#allocation2 + $0x190] sm:$0xff] %v6148_v2  ;;  %518 = vst [vmem:[#allocation2 + $0x198] sm:$0xff] %v6148_v2 }
  0x92   : > { %519 = vst [vmem:[#allocation2 + $0x1a0] sm:$0xff] %v6148_v2  ;;  %520 = vst [vmem:[#allocation2 + $0x1a8] sm:$0xff] %v6148_v2 }
  0x93   : > { %521 = vst [vmem:[#allocation2 + $0x1b0] sm:$0xff] %v6148_v2  ;;  %522 = vst [vmem:[#allocation2 + $0x1b8] sm:$0xff] %v6148_v2 }
  0x94   : > { %523 = vst [vmem:[#allocation2 + $0x1c0] sm:$0xff] %v6148_v2  ;;  %524 = vst [vmem:[#allocation2 + $0x1c8] sm:$0xff] %v6148_v2 }
  0x95   : > { %525 = vst [vmem:[#allocation2 + $0x1d0] sm:$0xff] %v6148_v2  ;;  %526 = vst [vmem:[#allocation2 + $0x1d8] sm:$0xff] %v6148_v2 }
  0x96   : > { %527 = vst [vmem:[#allocation2 + $0x1e0] sm:$0xff] %v6148_v2  ;;  %528 = vst [vmem:[#allocation2 + $0x1e8] sm:$0xff] %v6148_v2 }
  0x97   : > { %529 = vst [vmem:[#allocation2 + $0x1f0] sm:$0xff] %v6148_v2  ;;  %530 = vst [vmem:[#allocation2 + $0x1f8] sm:$0xff] %v6148_v2 }
  0x98   : > { %531 = vst [vmem:[#allocation2 + $0x200] sm:$0xff] %v6148_v2  ;;  %532 = vst [vmem:[#allocation2 + $0x208] sm:$0xff] %v6148_v2 }
  0x99   : > { %533 = vst [vmem:[#allocation2 + $0x210] sm:$0xff] %v6148_v2  ;;  %534 = vst [vmem:[#allocation2 + $0x218] sm:$0xff] %v6148_v2 }
  0x9a   : > { %535 = vst [vmem:[#allocation2 + $0x220] sm:$0xff] %v6148_v2  ;;  %536 = vst [vmem:[#allocation2 + $0x228] sm:$0xff] %v6148_v2 }
  0x9b   : > { %537 = vst [vmem:[#allocation2 + $0x230] sm:$0xff] %v6148_v2  ;;  %538 = vst [vmem:[#allocation2 + $0x238] sm:$0xff] %v6148_v2 }
  0x9c   : > { %539 = vst [vmem:[#allocation2 + $0x240] sm:$0xff] %v6148_v2  ;;  %540 = vst [vmem:[#allocation2 + $0x248] sm:$0xff] %v6148_v2 }
  0x9d   : > { %541 = vst [vmem:[#allocation2 + $0x250] sm:$0xff] %v6148_v2  ;;  %542 = vst [vmem:[#allocation2 + $0x258] sm:$0xff] %v6148_v2 }
  0x9e   : > { %543 = vst [vmem:[#allocation2 + $0x260] sm:$0xff] %v6148_v2  ;;  %544 = vst [vmem:[#allocation2 + $0x268] sm:$0xff] %v6148_v2 }
  0x9f   : > { %545 = vst [vmem:[#allocation2 + $0x270] sm:$0xff] %v6148_v2  ;;  %546 = vst [vmem:[#allocation2 + $0x278] sm:$0xff] %v6148_v2 }
  0xa0   : > { %547 = vst [vmem:[#allocation2 + $0x280] sm:$0xff] %v6148_v2  ;;  %548 = vst [vmem:[#allocation2 + $0x288] sm:$0xff] %v6148_v2 }
  0xa1   : > { %549 = vst [vmem:[#allocation2 + $0x290] sm:$0xff] %v6148_v2  ;;  %550 = vst [vmem:[#allocation2 + $0x298] sm:$0xff] %v6148_v2 }
  0xa2   : > { %551 = vst [vmem:[#allocation2 + $0x2a0] sm:$0xff] %v6148_v2  ;;  %552 = vst [vmem:[#allocation2 + $0x2a8] sm:$0xff] %v6148_v2 }
  0xa3   : > { %553 = vst [vmem:[#allocation2 + $0x2b0] sm:$0xff] %v6148_v2  ;;  %554 = vst [vmem:[#allocation2 + $0x2b8] sm:$0xff] %v6148_v2 }
  0xa4   : > { %555 = vst [vmem:[#allocation2 + $0x2c0] sm:$0xff] %v6148_v2  ;;  %556 = vst [vmem:[#allocation2 + $0x2c8] sm:$0xff] %v6148_v2 }
  0xa5   : > { %557 = vst [vmem:[#allocation2 + $0x2d0] sm:$0xff] %v6148_v2  ;;  %558 = vst [vmem:[#allocation2 + $0x2d8] sm:$0xff] %v6148_v2 }
  0xa6   : > { %559 = vst [vmem:[#allocation2 + $0x2e0] sm:$0xff] %v6148_v2  ;;  %560 = vst [vmem:[#allocation2 + $0x2e8] sm:$0xff] %v6148_v2 }
  0xa7   : > { %561 = vst [vmem:[#allocation2 + $0x2f0] sm:$0xff] %v6148_v2  ;;  %562 = vst [vmem:[#allocation2 + $0x2f8] sm:$0xff] %v6148_v2 }
  0xa8   : > { %563 = vst [vmem:[#allocation2 + $0x300] sm:$0xff] %v6148_v2  ;;  %564 = vst [vmem:[#allocation2 + $0x308] sm:$0xff] %v6148_v2 }
  0xa9   : > { %565 = vst [vmem:[#allocation2 + $0x310] sm:$0xff] %v6148_v2  ;;  %566 = vst [vmem:[#allocation2 + $0x318] sm:$0xff] %v6148_v2 }
  0xaa   : > { %567 = vst [vmem:[#allocation2 + $0x320] sm:$0xff] %v6148_v2  ;;  %568 = vst [vmem:[#allocation2 + $0x328] sm:$0xff] %v6148_v2 }
  0xab   : > { %569 = vst [vmem:[#allocation2 + $0x330] sm:$0xff] %v6148_v2  ;;  %570 = vst [vmem:[#allocation2 + $0x338] sm:$0xff] %v6148_v2 }
  0xac   : > { %571 = vst [vmem:[#allocation2 + $0x340] sm:$0xff] %v6148_v2  ;;  %572 = vst [vmem:[#allocation2 + $0x348] sm:$0xff] %v6148_v2 }
  0xad   : > { %573 = vst [vmem:[#allocation2 + $0x350] sm:$0xff] %v6148_v2  ;;  %574 = vst [vmem:[#allocation2 + $0x358] sm:$0xff] %v6148_v2 }
  0xae   : > { %575 = vst [vmem:[#allocation2 + $0x360] sm:$0xff] %v6148_v2  ;;  %576 = vst [vmem:[#allocation2 + $0x368] sm:$0xff] %v6148_v2 }
  0xaf   : > { %577 = vst [vmem:[#allocation2 + $0x370] sm:$0xff] %v6148_v2  ;;  %578 = vst [vmem:[#allocation2 + $0x378] sm:$0xff] %v6148_v2 }
  0xb0   : > { %579 = vst [vmem:[#allocation2 + $0x380] sm:$0xff] %v6148_v2  ;;  %580 = vst [vmem:[#allocation2 + $0x388] sm:$0xff] %v6148_v2 }
  0xb1   : > { %581 = vst [vmem:[#allocation2 + $0x390] sm:$0xff] %v6148_v2  ;;  %582 = vst [vmem:[#allocation2 + $0x398] sm:$0xff] %v6148_v2 }
  0xb2   : > { %583 = vst [vmem:[#allocation2 + $0x3a0] sm:$0xff] %v6148_v2  ;;  %584 = vst [vmem:[#allocation2 + $0x3a8] sm:$0xff] %v6148_v2 }
  0xb3   : > { %585 = vst [vmem:[#allocation2 + $0x3b0] sm:$0xff] %v6148_v2  ;;  %586 = vst [vmem:[#allocation2 + $0x3b8] sm:$0xff] %v6148_v2 }
  0xb4   : > { %587 = vst [vmem:[#allocation2 + $0x3c0] sm:$0xff] %v6148_v2  ;;  %588 = vst [vmem:[#allocation2 + $0x3c8] sm:$0xff] %v6148_v2 }
  0xb5   : > { %589 = vst [vmem:[#allocation2 + $0x3d0] sm:$0xff] %v6148_v2  ;;  %590 = vst [vmem:[#allocation2 + $0x3d8] sm:$0xff] %v6148_v2 }
  0xb6   : > { %591 = vst [vmem:[#allocation2 + $0x3e0] sm:$0xff] %v6148_v2  ;;  %592 = vst [vmem:[#allocation2 + $0x3e8] sm:$0xff] %v6148_v2 }
  0xb7   : > { %593 = vst [vmem:[#allocation2 + $0x3f0] sm:$0xff] %v6148_v2  ;;  %594 = vst [vmem:[#allocation2 + $0x3f8] sm:$0xff] %v6148_v2 }
  0xb8   : > { %595 = vst [vmem:[#allocation2 + $0x400] sm:$0xff] %v6148_v2  ;;  %596 = vst [vmem:[#allocation2 + $0x408] sm:$0xff] %v6148_v2 }
  0xb9   : > { %597 = vst [vmem:[#allocation2 + $0x410] sm:$0xff] %v6148_v2  ;;  %598 = vst [vmem:[#allocation2 + $0x418] sm:$0xff] %v6148_v2 }
  0xba   : > { %599 = vst [vmem:[#allocation2 + $0x420] sm:$0xff] %v6148_v2  ;;  %600 = vst [vmem:[#allocation2 + $0x428] sm:$0xff] %v6148_v2 }
  0xbb   : > { %601 = vst [vmem:[#allocation2 + $0x430] sm:$0xff] %v6148_v2  ;;  %602 = vst [vmem:[#allocation2 + $0x438] sm:$0xff] %v6148_v2 }
  0xbc   : > { %603 = vst [vmem:[#allocation2 + $0x440] sm:$0xff] %v6148_v2  ;;  %604 = vst [vmem:[#allocation2 + $0x448] sm:$0xff] %v6148_v2 }
  0xbd   : > { %605 = vst [vmem:[#allocation2 + $0x450] sm:$0xff] %v6148_v2  ;;  %606 = vst [vmem:[#allocation2 + $0x458] sm:$0xff] %v6148_v2 }
  0xbe   : > { %607 = vst [vmem:[#allocation2 + $0x460] sm:$0xff] %v6148_v2  ;;  %608 = vst [vmem:[#allocation2 + $0x468] sm:$0xff] %v6148_v2 }
  0xbf   : > { %609 = vst [vmem:[#allocation2 + $0x470] sm:$0xff] %v6148_v2  ;;  %610 = vst [vmem:[#allocation2 + $0x478] sm:$0xff] %v6148_v2 }
  0xc0   : > { %611 = vst [vmem:[#allocation2 + $0x480] sm:$0xff] %v6148_v2  ;;  %612 = vst [vmem:[#allocation2 + $0x488] sm:$0xff] %v6148_v2 }
  0xc1   : > { %613 = vst [vmem:[#allocation2 + $0x490] sm:$0xff] %v6148_v2  ;;  %614 = vst [vmem:[#allocation2 + $0x498] sm:$0xff] %v6148_v2 }
  0xc2   : > { %615 = vst [vmem:[#allocation2 + $0x4a0] sm:$0xff] %v6148_v2  ;;  %616 = vst [vmem:[#allocation2 + $0x4a8] sm:$0xff] %v6148_v2 }
  0xc3   : > { %617 = vst [vmem:[#allocation2 + $0x4b0] sm:$0xff] %v6148_v2  ;;  %618 = vst [vmem:[#allocation2 + $0x4b8] sm:$0xff] %v6148_v2 }
  0xc4   : > { %619 = vst [vmem:[#allocation2 + $0x4c0] sm:$0xff] %v6148_v2  ;;  %620 = vst [vmem:[#allocation2 + $0x4c8] sm:$0xff] %v6148_v2 }
  0xc5   : > { %621 = vst [vmem:[#allocation2 + $0x4d0] sm:$0xff] %v6148_v2  ;;  %622 = vst [vmem:[#allocation2 + $0x4d8] sm:$0xff] %v6148_v2 }
  0xc6   : > { %623 = vst [vmem:[#allocation2 + $0x4e0] sm:$0xff] %v6148_v2  ;;  %624 = vst [vmem:[#allocation2 + $0x4e8] sm:$0xff] %v6148_v2 }
  0xc7   : > { %625 = vst [vmem:[#allocation2 + $0x4f0] sm:$0xff] %v6148_v2  ;;  %626 = vst [vmem:[#allocation2 + $0x4f8] sm:$0xff] %v6148_v2 }
  0xc8   : > { %627 = vst [vmem:[#allocation2 + $0x500] sm:$0xff] %v6148_v2  ;;  %628 = vst [vmem:[#allocation2 + $0x508] sm:$0xff] %v6148_v2 }
  0xc9   : > { %629 = vst [vmem:[#allocation2 + $0x510] sm:$0xff] %v6148_v2  ;;  %630 = vst [vmem:[#allocation2 + $0x518] sm:$0xff] %v6148_v2 }
  0xca   : > { %631 = vst [vmem:[#allocation2 + $0x520] sm:$0xff] %v6148_v2  ;;  %632 = vst [vmem:[#allocation2 + $0x528] sm:$0xff] %v6148_v2 }
  0xcb   : > { %633 = vst [vmem:[#allocation2 + $0x530] sm:$0xff] %v6148_v2  ;;  %634 = vst [vmem:[#allocation2 + $0x538] sm:$0xff] %v6148_v2 }
  0xcc   : > { %635 = vst [vmem:[#allocation2 + $0x540] sm:$0xff] %v6148_v2  ;;  %636 = vst [vmem:[#allocation2 + $0x548] sm:$0xff] %v6148_v2 }
  0xcd   : > { %637 = vst [vmem:[#allocation2 + $0x550] sm:$0xff] %v6148_v2  ;;  %638 = vst [vmem:[#allocation2 + $0x558] sm:$0xff] %v6148_v2 }
  0xce   : > { %639 = vst [vmem:[#allocation2 + $0x560] sm:$0xff] %v6148_v2  ;;  %640 = vst [vmem:[#allocation2 + $0x568] sm:$0xff] %v6148_v2 }
  0xcf   : > { %641 = vst [vmem:[#allocation2 + $0x570] sm:$0xff] %v6148_v2  ;;  %642 = vst [vmem:[#allocation2 + $0x578] sm:$0xff] %v6148_v2 }
  0xd0   : > { %643 = vst [vmem:[#allocation2 + $0x580] sm:$0xff] %v6148_v2  ;;  %644 = vst [vmem:[#allocation2 + $0x588] sm:$0xff] %v6148_v2 }
  0xd1   : > { %645 = vst [vmem:[#allocation2 + $0x590] sm:$0xff] %v6148_v2  ;;  %646 = vst [vmem:[#allocation2 + $0x598] sm:$0xff] %v6148_v2 }
  0xd2   : > { %647 = vst [vmem:[#allocation2 + $0x5a0] sm:$0xff] %v6148_v2  ;;  %648 = vst [vmem:[#allocation2 + $0x5a8] sm:$0xff] %v6148_v2 }
  0xd3   : > { %649 = vst [vmem:[#allocation2 + $0x5b0] sm:$0xff] %v6148_v2  ;;  %650 = vst [vmem:[#allocation2 + $0x5b8] sm:$0xff] %v6148_v2 }
  0xd4   : > { %651 = vst [vmem:[#allocation2 + $0x5c0] sm:$0xff] %v6148_v2  ;;  %652 = vst [vmem:[#allocation2 + $0x5c8] sm:$0xff] %v6148_v2 }
  0xd5   : > { %653 = vst [vmem:[#allocation2 + $0x5d0] sm:$0xff] %v6148_v2  ;;  %654 = vst [vmem:[#allocation2 + $0x5d8] sm:$0xff] %v6148_v2 }
  0xd6   : > { %655 = vst [vmem:[#allocation2 + $0x5e0] sm:$0xff] %v6148_v2  ;;  %656 = vst [vmem:[#allocation2 + $0x5e8] sm:$0xff] %v6148_v2 }
  0xd7   : > { %657 = vst [vmem:[#allocation2 + $0x5f0] sm:$0xff] %v6148_v2  ;;  %658 = vst [vmem:[#allocation2 + $0x5f8] sm:$0xff] %v6148_v2 }
  0xd8   : > { %659 = vst [vmem:[#allocation2 + $0x600] sm:$0xff] %v6148_v2  ;;  %660 = vst [vmem:[#allocation2 + $0x608] sm:$0xff] %v6148_v2 }
  0xd9   : > { %661 = vst [vmem:[#allocation2 + $0x610] sm:$0xff] %v6148_v2  ;;  %662 = vst [vmem:[#allocation2 + $0x618] sm:$0xff] %v6148_v2 }
  0xda   : > { %663 = vst [vmem:[#allocation2 + $0x620] sm:$0xff] %v6148_v2  ;;  %664 = vst [vmem:[#allocation2 + $0x628] sm:$0xff] %v6148_v2 }
  0xdb   : > { %665 = vst [vmem:[#allocation2 + $0x630] sm:$0xff] %v6148_v2  ;;  %666 = vst [vmem:[#allocation2 + $0x638] sm:$0xff] %v6148_v2 }
  0xdc   : > { %667 = vst [vmem:[#allocation2 + $0x640] sm:$0xff] %v6148_v2  ;;  %668 = vst [vmem:[#allocation2 + $0x648] sm:$0xff] %v6148_v2 }
  0xdd   : > { %669 = vst [vmem:[#allocation2 + $0x650] sm:$0xff] %v6148_v2  ;;  %670 = vst [vmem:[#allocation2 + $0x658] sm:$0xff] %v6148_v2 }
  0xde   : > { %671 = vst [vmem:[#allocation2 + $0x660] sm:$0xff] %v6148_v2  ;;  %672 = vst [vmem:[#allocation2 + $0x668] sm:$0xff] %v6148_v2 }
  0xdf   : > { %673 = vst [vmem:[#allocation2 + $0x670] sm:$0xff] %v6148_v2  ;;  %674 = vst [vmem:[#allocation2 + $0x678] sm:$0xff] %v6148_v2 }
  0xe0   : > { %675 = vst [vmem:[#allocation2 + $0x680] sm:$0xff] %v6148_v2  ;;  %676 = vst [vmem:[#allocation2 + $0x688] sm:$0xff] %v6148_v2 }
  0xe1   : > { %677 = vst [vmem:[#allocation2 + $0x690] sm:$0xff] %v6148_v2  ;;  %678 = vst [vmem:[#allocation2 + $0x698] sm:$0xff] %v6148_v2 }
  0xe2   : > { %679 = vst [vmem:[#allocation2 + $0x6a0] sm:$0xff] %v6148_v2  ;;  %680 = vst [vmem:[#allocation2 + $0x6a8] sm:$0xff] %v6148_v2 }
  0xe3   : > { %681 = vst [vmem:[#allocation2 + $0x6b0] sm:$0xff] %v6148_v2  ;;  %682 = vst [vmem:[#allocation2 + $0x6b8] sm:$0xff] %v6148_v2 }
  0xe4   : > { %683 = vst [vmem:[#allocation2 + $0x6c0] sm:$0xff] %v6148_v2  ;;  %684 = vst [vmem:[#allocation2 + $0x6c8] sm:$0xff] %v6148_v2 }
  0xe5   : > { %685 = vst [vmem:[#allocation2 + $0x6d0] sm:$0xff] %v6148_v2  ;;  %686 = vst [vmem:[#allocation2 + $0x6d8] sm:$0xff] %v6148_v2 }
  0xe6   : > { %687 = vst [vmem:[#allocation2 + $0x6e0] sm:$0xff] %v6148_v2  ;;  %688 = vst [vmem:[#allocation2 + $0x6e8] sm:$0xff] %v6148_v2 }
  0xe7   : > { %689 = vst [vmem:[#allocation2 + $0x6f0] sm:$0xff] %v6148_v2  ;;  %690 = vst [vmem:[#allocation2 + $0x6f8] sm:$0xff] %v6148_v2 }
  0xe8   : > { %691 = vst [vmem:[#allocation2 + $0x700] sm:$0xff] %v6148_v2  ;;  %692 = vst [vmem:[#allocation2 + $0x708] sm:$0xff] %v6148_v2 }
  0xe9   : > { %693 = vst [vmem:[#allocation2 + $0x710] sm:$0xff] %v6148_v2  ;;  %694 = vst [vmem:[#allocation2 + $0x718] sm:$0xff] %v6148_v2 }
  0xea   : > { %695 = vst [vmem:[#allocation2 + $0x720] sm:$0xff] %v6148_v2  ;;  %696 = vst [vmem:[#allocation2 + $0x728] sm:$0xff] %v6148_v2 }
  0xeb   : > { %697 = vst [vmem:[#allocation2 + $0x730] sm:$0xff] %v6148_v2  ;;  %698 = vst [vmem:[#allocation2 + $0x738] sm:$0xff] %v6148_v2 }
  0xec   : > { %699 = vst [vmem:[#allocation2 + $0x740] sm:$0xff] %v6148_v2  ;;  %700 = vst [vmem:[#allocation2 + $0x748] sm:$0xff] %v6148_v2 }
  0xed   : > { %701 = vst [vmem:[#allocation2 + $0x750] sm:$0xff] %v6148_v2  ;;  %702 = vst [vmem:[#allocation2 + $0x758] sm:$0xff] %v6148_v2 }
  0xee   : > { %703 = vst [vmem:[#allocation2 + $0x760] sm:$0xff] %v6148_v2  ;;  %704 = vst [vmem:[#allocation2 + $0x768] sm:$0xff] %v6148_v2 }
  0xef   : > { %705 = vst [vmem:[#allocation2 + $0x770] sm:$0xff] %v6148_v2  ;;  %706 = vst [vmem:[#allocation2 + $0x778] sm:$0xff] %v6148_v2 }
  0xf0   : > { %707 = vst [vmem:[#allocation2 + $0x780] sm:$0xff] %v6148_v2  ;;  %708 = vst [vmem:[#allocation2 + $0x788] sm:$0xff] %v6148_v2 }
  0xf1   : > { %709 = vst [vmem:[#allocation2 + $0x790] sm:$0xff] %v6148_v2  ;;  %710 = vst [vmem:[#allocation2 + $0x798] sm:$0xff] %v6148_v2 }
  0xf2   : > { %711 = vst [vmem:[#allocation2 + $0x7a0] sm:$0xff] %v6148_v2  ;;  %712 = vst [vmem:[#allocation2 + $0x7a8] sm:$0xff] %v6148_v2 }
  0xf3   : > { %713 = vst [vmem:[#allocation2 + $0x7b0] sm:$0xff] %v6148_v2  ;;  %714 = vst [vmem:[#allocation2 + $0x7b8] sm:$0xff] %v6148_v2 }
  0xf4   : > { %715 = vst [vmem:[#allocation2 + $0x7c0] sm:$0xff] %v6148_v2  ;;  %716 = vst [vmem:[#allocation2 + $0x7c8] sm:$0xff] %v6148_v2 }
  0xf5   : > { %717 = vst [vmem:[#allocation2 + $0x7d0] sm:$0xff] %v6148_v2  ;;  %718 = vst [vmem:[#allocation2 + $0x7d8] sm:$0xff] %v6148_v2 }
  0xf6   : > { %719 = vst [vmem:[#allocation2 + $0x7e0] sm:$0xff] %v6148_v2  ;;  %720 = vst [vmem:[#allocation2 + $0x7e8] sm:$0xff] %v6148_v2 }
  0xf7   : > { %721 = vst [vmem:[#allocation2 + $0x7f0] sm:$0xff] %v6148_v2  ;;  %722 = vst [vmem:[#allocation2 + $0x7f8] sm:$0xff] %v6148_v2 }
  0xf8 PF: > { %v5596_v3 = vld [vmem:[%s6479_s6 + $0x4] ss:$16 sps:$4 sm:$0xff]   ;;  %v5598_v4 = vld [vmem:[%s6479_s6 + $0xc] ss:$16 sps:$4 sm:$0xff]   ;;  %v5600_v5 = vld [vmem:[%s6479_s6] ss:$16 sps:$4 sm:$0xff]  }
  0xf9   : > { %1555 = vmatprep.subr.bf16.mxu0 %v5596_v3  ;;  %v5601_v6 = vld [vmem:[%s6479_s6 + $0x8] ss:$16 sps:$4 sm:$0xff]   ;;  %1908 = vmatprep.subr.bf16.mxu1 %v5598_v4  ;;  %v5602_v7 = vld [vmem:[%s6479_s6 + $0x24] ss:$16 sps:$4 sm:$0xff]   ;;  %v5604_v8 = vld [vmem:[%s6479_s6 + $0x2c] ss:$16 sps:$4 sm:$0xff]  }
  0xfa   : > { %1556 = vmatpush1.bf16.msra.mxu0 %v5600_v5  ;;  %1909 = vmatpush1.bf16.msra.mxu1 %v5601_v6  ;;  %v5606_v9 = vld [vmem:[%s6479_s6 + $0x20] ss:$16 sps:$4 sm:$0xff]   ;;  %v5607_v10 = vld [vmem:[%s6479_s6 + $0x28] ss:$16 sps:$4 sm:$0xff]   ;;  %v5608_v11 = vld [vmem:[%s6479_s6 + $0x44] ss:$16 sps:$4 sm:$0xff]  }
  0xfb   : > { %1557 = vmatprep.subr.bf16.mxu0 %v5602_v7  ;;  %1910 = vmatprep.subr.bf16.mxu1 %v5604_v8  ;;  %v5610_v12 = vld [vmem:[%s6479_s6 + $0x4c] ss:$16 sps:$4 sm:$0xff]   ;;  %v5612_v13 = vld [vmem:[%s6479_s6 + $0x40] ss:$16 sps:$4 sm:$0xff]   ;;  %v5613_v14 = vld [vmem:[%s6479_s6 + $0x48] ss:$16 sps:$4 sm:$0xff]  }
  0xfc   : > { %v5614_v15 = vld [vmem:[%s6479_s6 + $0x64] ss:$16 sps:$4 sm:$0xff]   ;;  %v5616_v16 = vld [vmem:[%s6479_s6 + $0x6c] ss:$16 sps:$4 sm:$0xff]   ;;  %v5618_v17 = vld [vmem:[%s6479_s6 + $0x60] ss:$16 sps:$4 sm:$0xff]  }
  0xfd   : > { %v5619_v18 = vld [vmem:[%s6479_s6 + $0x68] ss:$16 sps:$4 sm:$0xff]   ;;  %v5620_v19 = vld [vmem:[%s6479_s6 + $0x84] ss:$16 sps:$4 sm:$0xff]   ;;  %v5622_v20 = vld [vmem:[%s6479_s6 + $0x8c] ss:$16 sps:$4 sm:$0xff]  }
  0xfe   : > { %1558 = vmatpush1.bf16.msra.mxu0 %v5606_v9  ;;  %1911 = vmatpush1.bf16.msra.mxu1 %v5607_v10  ;;  %v5624_v21 = vld [vmem:[%s6479_s6 + $0x80] ss:$16 sps:$4 sm:$0xff]   ;;  %v5625_v22 = vld [vmem:[%s6479_s6 + $0x88] ss:$16 sps:$4 sm:$0xff]   ;;  %v5626_v23 = vld [vmem:[%s6479_s6 + $0xa4] ss:$16 sps:$4 sm:$0xff]  }
  0xff   : > { %1559 = vmatprep.subr.bf16.mxu0 %v5608_v11  ;;  %1912 = vmatprep.subr.bf16.mxu1 %v5610_v12  ;;  %v5628_v24 = vld [vmem:[%s6479_s6 + $0xac] ss:$16 sps:$4 sm:$0xff]   ;;  %v5630_v25 = vld [vmem:[%s6479_s6 + $0xa0] ss:$16 sps:$4 sm:$0xff]   ;;  %v5631_v26 = vld [vmem:[%s6479_s6 + $0xa8] ss:$16 sps:$4 sm:$0xff]  }
 0x100   : > { %v5632_v27 = vld [vmem:[%s6479_s6 + $0xc4] ss:$16 sps:$4 sm:$0xff]   ;;  %v5634_v28 = vld [vmem:[%s6479_s6 + $0xcc] ss:$16 sps:$4 sm:$0xff]   ;;  %v5636_v29 = vld [vmem:[%s6479_s6 + $0xc0] ss:$16 sps:$4 sm:$0xff]  }
 0x101   : > { %v5637_v30 = vld [vmem:[%s6479_s6 + $0xc8] ss:$16 sps:$4 sm:$0xff]   ;;  %v5638_v31 = vld [vmem:[%s6479_s6 + $0xe4] ss:$16 sps:$4 sm:$0xff]   ;;  %v5640_v32 = vld [vmem:[%s6479_s6 + $0xec] ss:$16 sps:$4 sm:$0xff]  }
 0x102   : > { %1560 = vmatpush1.bf16.msra.mxu0 %v5612_v13  ;;  %1913 = vmatpush1.bf16.msra.mxu1 %v5613_v14  ;;  %v5642_v33 = vld [vmem:[%s6479_s6 + $0xe0] ss:$16 sps:$4 sm:$0xff]   ;;  %v5643_v34 = vld [vmem:[%s6479_s6 + $0xe8] ss:$16 sps:$4 sm:$0xff]   ;;  %v5644_v35 = vld [vmem:[%s6479_s6 + $0x104] ss:$16 sps:$4 sm:$0xff]  }
 0x103   : > { %1561 = vmatprep.subr.bf16.mxu0 %v5614_v15  ;;  %1914 = vmatprep.subr.bf16.mxu1 %v5616_v16  ;;  %v5646_v36 = vld [vmem:[%s6479_s6 + $0x10c] ss:$16 sps:$4 sm:$0xff]   ;;  %v5648_v37 = vld [vmem:[%s6479_s6 + $0x100] ss:$16 sps:$4 sm:$0xff]   ;;  %v5649_v38 = vld [vmem:[%s6479_s6 + $0x108] ss:$16 sps:$4 sm:$0xff]  }
 0x104   : > { %v5650_v39 = vld [vmem:[%s6479_s6 + $0x124] ss:$16 sps:$4 sm:$0xff]   ;;  %v5652_v40 = vld [vmem:[%s6479_s6 + $0x12c] ss:$16 sps:$4 sm:$0xff]   ;;  %v5654_v41 = vld [vmem:[%s6479_s6 + $0x120] ss:$16 sps:$4 sm:$0xff]  }
 0x105   : > { %v5655_v42 = vld [vmem:[%s6479_s6 + $0x128] ss:$16 sps:$4 sm:$0xff]   ;;  %v5656_v43 = vld [vmem:[%s6479_s6 + $0x144] ss:$16 sps:$4 sm:$0xff]   ;;  %v5658_v44 = vld [vmem:[%s6479_s6 + $0x14c] ss:$16 sps:$4 sm:$0xff]  }
 0x106   : > { %1562 = vmatpush1.bf16.msra.mxu0 %v5618_v17  ;;  %1915 = vmatpush1.bf16.msra.mxu1 %v5619_v18  ;;  %v5660_v45 = vld [vmem:[%s6479_s6 + $0x140] ss:$16 sps:$4 sm:$0xff]   ;;  %v5661_v46 = vld [vmem:[%s6479_s6 + $0x148] ss:$16 sps:$4 sm:$0xff]   ;;  %v5662_v47 = vld [vmem:[%s6479_s6 + $0x164] ss:$16 sps:$4 sm:$0xff]  }
 0x107   : > { %1563 = vmatprep.subr.bf16.mxu0 %v5620_v19  ;;  %1916 = vmatprep.subr.bf16.mxu1 %v5622_v20  ;;  %v5664_v48 = vld [vmem:[%s6479_s6 + $0x16c] ss:$16 sps:$4 sm:$0xff]   ;;  %v5666_v51 = vld [vmem:[%s6479_s6 + $0x160] ss:$16 sps:$4 sm:$0xff]   ;;  %v5667_v52 = vld [vmem:[%s6479_s6 + $0x168] ss:$16 sps:$4 sm:$0xff]  }
 0x108   : > { %v724_v49 = vld [vmem:[%s6481_s16 + $0x8] sm:$0xff]  ;;  %v726_v50 = vld [vmem:[%s6481_s16 + $0x18] sm:$0xff]  ;;  %v5668_v54 = vld [vmem:[%s6479_s6 + $0x184] ss:$16 sps:$4 sm:$0xff]   ;;  %p5306_p11 = scmp.ne.s32.totalorder %s6066_s24, 8 }
 0x109   : > { %v852_v53 = vpack.c.bf16 %v726_v50, %v724_v49  ;;  %v5670_v55 = vld [vmem:[%s6479_s6 + $0x18c] ss:$16 sps:$4 sm:$0xff]   ;;  %v5672_v56 = vld [vmem:[%s6479_s6 + $0x180] ss:$16 sps:$4 sm:$0xff]   ;;  %v5673_v57 = vld [vmem:[%s6479_s6 + $0x188] ss:$16 sps:$4 sm:$0xff]  }
 0x10a   : > { %1564 = vmatpush1.bf16.msra.mxu0 %v5624_v21  ;;  %1917 = vmatpush1.bf16.msra.mxu1 %v5625_v22  ;;  %v5674_v58 = vld [vmem:[%s6479_s6 + $0x1a4] ss:$16 sps:$4 sm:$0xff]   ;;  %v5676_v59 = vld [vmem:[%s6479_s6 + $0x1ac] ss:$16 sps:$4 sm:$0xff]   ;;  %v5678_v60 = vld [vmem:[%s6479_s6 + $0x1a0] ss:$16 sps:$4 sm:$0xff]  }
 0x10b   : > { %1565 = vmatprep.subr.bf16.mxu0 %v5626_v23  ;;  %1918 = vmatprep.subr.bf16.mxu1 %v5628_v24  ;;  %v5679_v61 = vld [vmem:[%s6479_s6 + $0x1a8] ss:$16 sps:$4 sm:$0xff]   ;;  %v5680_v62 = vld [vmem:[%s6479_s6 + $0x1c4] ss:$16 sps:$4 sm:$0xff]   ;;  %v5682_v63 = vld [vmem:[%s6479_s6 + $0x1cc] ss:$16 sps:$4 sm:$0xff]  }
 0x10c   : > { %1587 = vmatprep.mubr.bf16.mxu0 %v852_v53  ;;  %1940 = vmatprep.mubr.bf16.mxu1 %v852_v53  ;;  %v5684_v0 = vld [vmem:[%s6479_s6 + $0x1c0] ss:$16 sps:$4 sm:$0xff]   ;;  %v5685_v1 = vld [vmem:[%s6479_s6 + $0x1c8] ss:$16 sps:$4 sm:$0xff]   ;;  %v5686_v2 = vld [vmem:[%s6479_s6 + $0x1e4] ss:$16 sps:$4 sm:$0xff]  }
 0x10d   : > { %v5688_v3 = vld [vmem:[%s6479_s6 + $0x1ec] ss:$16 sps:$4 sm:$0xff]   ;;  %v5690_v4 = vld [vmem:[%s6479_s6 + $0x1e0] ss:$16 sps:$4 sm:$0xff]   ;;  %v5691_v5 = vld [vmem:[%s6479_s6 + $0x1e8] ss:$16 sps:$4 sm:$0xff]  }
 0x10e   : > { %1566 = vmatpush1.bf16.msra.mxu0 %v5630_v25  ;;  %1919 = vmatpush1.bf16.msra.mxu1 %v5631_v26  ;;  %v723_v6 = vld [vmem:[%s6481_s16] sm:$0xff]  ;;  %v725_v7 = vld [vmem:[%s6481_s16 + $0x10] sm:$0xff]  ;;  %v728_v8 = vld [vmem:[%s6481_s16 + $0x28] sm:$0xff]  ;;  %s7479_s24 = sld [smem:[#allocation3]] (!%p5306_p11)  ;;  %vm4615_vm0 = vcmask (!%p5306_p11), 7168  }
 0x10f   : > { %1567 = vmatprep.subr.bf16.mxu0 %v5632_v27  ;;  %1920 = vmatprep.subr.bf16.mxu1 %v5634_v28  ;;  %v730_v9 = vld [vmem:[%s6481_s16 + $0x38] sm:$0xff]  ;;  %v851_v10 = vpack.c.bf16 %v725_v7, %v723_v6  ;;  %v727_v12 = vld [vmem:[%s6481_s16 + $0x20] sm:$0xff]  ;;  %v729_v13 = vld [vmem:[%s6481_s16 + $0x30] sm:$0xff] }
 0x110   : > { %v854_v11 = vpack.c.bf16 %v730_v9, %v728_v8  ;;  %v732_v14 = vld [vmem:[%s6481_s16 + $0x48] sm:$0xff]  ;;  %v734_v15 = vld [vmem:[%s6481_s16 + $0x58] sm:$0xff]  ;;  %v853_v16 = vpack.c.bf16 %v729_v13, %v727_v12  ;;  %v731_v18 = vld [vmem:[%s6481_s16 + $0x40] sm:$0xff] }
 0x111   : > { %v856_v17 = vpack.c.bf16 %v734_v15, %v732_v14  ;;  %v733_v19 = vld [vmem:[%s6481_s16 + $0x50] sm:$0xff]  ;;  %v736_v20 = vld [vmem:[%s6481_s16 + $0x68] sm:$0xff]  ;;  %v738_v21 = vld [vmem:[%s6481_s16 + $0x78] sm:$0xff] }
 0x112   : > { %1568 = vmatpush1.bf16.msra.mxu0 %v5636_v29  ;;  %1921 = vmatpush1.bf16.msra.mxu1 %v5637_v30  ;;  %v855_v22 = vpack.c.bf16 %v733_v19, %v731_v18  ;;  %v858_v23 = vpack.c.bf16 %v738_v21, %v736_v20  ;;  %v735_v24 = vld [vmem:[%s6481_s16 + $0x60] sm:$0xff]  ;;  %v737_v25 = vld [vmem:[%s6481_s16 + $0x70] sm:$0xff]  ;;  %v740_v26 = vld [vmem:[%s6481_s16 + $0x88] sm:$0xff] }
 0x113   : > { %1569 = vmatprep.subr.bf16.mxu0 %v5638_v31  ;;  %1922 = vmatprep.subr.bf16.mxu1 %v5640_v32  ;;  %v742_v27 = vld [vmem:[%s6481_s16 + $0x98] sm:$0xff]  ;;  %v857_v28 = vpack.c.bf16 %v737_v25, %v735_v24  ;;  %v739_v30 = vld [vmem:[%s6481_s16 + $0x80] sm:$0xff]  ;;  %v741_v31 = vld [vmem:[%s6481_s16 + $0x90] sm:$0xff] }
 0x114   : > { %v860_v29 = vpack.c.bf16 %v742_v27, %v740_v26  ;;  %v744_v32 = vld [vmem:[%s6481_s16 + $0xa8] sm:$0xff]  ;;  %v753_v49 = vld [vmem:[%s6481_s16 + $0xf0] sm:$0xff]  ;;  %v767_v8 = vld [vmem:[%s6481_s16 + $0x160] sm:$0xff] }
 0x115   : > { %v756_v50 = vld [vmem:[%s6481_s16 + $0x108] sm:$0xff]  ;;  %v769_v9 = vld [vmem:[%s6481_s16 + $0x170] sm:$0xff]  ;;  %v771_v14 = vld [vmem:[%s6481_s16 + $0x180] sm:$0xff] }
 0x116   : > { %1570 = vmatpush1.bf16.msra.mxu0 %v5642_v33  ;;  %1923 = vmatpush1.bf16.msra.mxu1 %v5643_v34  ;;  %v746_v33 = vld [vmem:[%s6481_s16 + $0xb8] sm:$0xff]  ;;  %v859_v34 = vpack.c.bf16 %v741_v31, %v739_v30  ;;  %v873_v12 = vpack.c.bf16 %v769_v9, %v767_v8  ;;  %v773_v15 = vld [vmem:[%s6481_s16 + $0x190] sm:$0xff]  ;;  %v775_v20 = vld [vmem:[%s6481_s16 + $0x1a0] sm:$0xff] }
 0x117   : > { %1571 = vmatprep.subr.bf16.mxu0 %v5644_v35  ;;  %1924 = vmatprep.subr.bf16.mxu1 %v5646_v36  ;;  %v862_v35 = vpack.c.bf16 %v746_v33, %v744_v32  ;;  %v743_v36 = vld [vmem:[%s6481_s16 + $0xa0] sm:$0xff]  ;;  %v875_v18 = vpack.c.bf16 %v773_v15, %v771_v14  ;;  %v777_v21 = vld [vmem:[%s6481_s16 + $0x1b0] sm:$0xff] }
 0x118   : > { %v877_v24 = vpack.c.bf16 %v777_v21, %v775_v20  ;;  %v779_v26 = vld [vmem:[%s6481_s16 + $0x1c0] sm:$0xff]  ;;  %v781_v27 = vld [vmem:[%s6481_s16 + $0x1d0] sm:$0xff] }
 0x119   : > { %v879_v30 = vpack.c.bf16 %v781_v27, %v779_v26  ;;  %v783_v32 = vld [vmem:[%s6481_s16 + $0x1e0] sm:$0xff]  ;;  %v785_v33 = vld [vmem:[%s6481_s16 + $0x1f0] sm:$0xff] }
 0x11a   : > { %1572 = vmatpush1.bf16.msra.mxu0 %v5648_v37  ;;  %1925 = vmatpush1.bf16.msra.mxu1 %v5649_v38  ;;  %v745_v37 = vld [vmem:[%s6481_s16 + $0xb0] sm:$0xff]  ;;  %v748_v38 = vld [vmem:[%s6481_s16 + $0xc8] sm:$0xff] }
 0x11b   : > { %1573 = vmatprep.subr.bf16.mxu0 %v5650_v39  ;;  %1926 = vmatprep.subr.bf16.mxu1 %v5652_v40  ;;  %v750_v39 = vld [vmem:[%s6481_s16 + $0xd8] sm:$0xff]  ;;  %v861_v40 = vpack.c.bf16 %v745_v37, %v743_v36  ;;  %v881_v36 = vpack.c.bf16 %v785_v33, %v783_v32 }
 0x11e   : > { %1574 = vmatpush1.bf16.msra.mxu0 %v5654_v41  ;;  %1927 = vmatpush1.bf16.msra.mxu1 %v5655_v42  ;;  %v864_v41 = vpack.c.bf16 %v750_v39, %v748_v38  ;;  %v747_v42 = vld [vmem:[%s6481_s16 + $0xc0] sm:$0xff]  ;;  %v789_v39 = vld [vmem:[%s6481_s16 + $0x210] sm:$0xff] }
 0x11f   : > { %1575 = vmatprep.subr.bf16.mxu0 %v5656_v43  ;;  %1928 = vmatprep.subr.bf16.mxu1 %v5658_v44  ;;  %v749_v43 = vld [vmem:[%s6481_s16 + $0xd0] sm:$0xff]  ;;  %v752_v44 = vld [vmem:[%s6481_s16 + $0xe8] sm:$0xff]  ;;  %v787_v38 = vld [vmem:[%s6481_s16 + $0x200] sm:$0xff] }
 0x122   : > { %1576 = vmatpush1.bf16.msra.mxu0 %v5660_v45  ;;  %1929 = vmatpush1.bf16.msra.mxu1 %v5661_v46  ;;  %v754_v45 = vld [vmem:[%s6481_s16 + $0xf8] sm:$0xff]  ;;  %v863_v46 = vpack.c.bf16 %v749_v43, %v747_v42  ;;  %v883_v42 = vpack.c.bf16 %v789_v39, %v787_v38 }
 0x123   : > { %1577 = vmatprep.subr.bf16.mxu0 %v5662_v47  ;;  %1930 = vmatprep.subr.bf16.mxu1 %v5664_v48  ;;  %v866_v47 = vpack.c.bf16 %v754_v45, %v752_v44  ;;  %v751_v48 = vld [vmem:[%s6481_s16 + $0xe0] sm:$0xff]  ;;  %v793_v45 = vld [vmem:[%s6481_s16 + $0x230] sm:$0xff] }
 0x124   : > { %v791_v44 = vld [vmem:[%s6481_s16 + $0x220] sm:$0xff] }
 0x126   : > { %1578 = vmatpush1.bf16.msra.mxu0 %v5666_v51  ;;  %1931 = vmatpush1.bf16.msra.mxu1 %v5667_v52  ;;  %v758_v51 = vld [vmem:[%s6481_s16 + $0x118] sm:$0xff]  ;;  %v865_v52 = vpack.c.bf16 %v753_v49, %v751_v48  ;;  %v885_v48 = vpack.c.bf16 %v793_v45, %v791_v44  ;;  %v833_v44 = vld [vmem:[%s6481_s16 + $0x370] sm:$0xff] }
 0x127   : > { %1579 = vmatprep.subr.bf16.mxu0 %v5668_v54  ;;  %1932 = vmatprep.subr.bf16.mxu1 %v5670_v55  ;;  %v868_v53 = vpack.c.bf16 %v758_v51, %v756_v50  ;;  %v755_v54 = vld [vmem:[%s6481_s16 + $0x100] sm:$0xff]  ;;  %v757_v55 = vld [vmem:[%s6481_s16 + $0x110] sm:$0xff]  ;;  %v918_v45 = vld [vmem:[#allocation2 + $0x18] sm:$0xff] }
 0x128   : > { %v795_v50 = vld [vmem:[%s6481_s16 + $0x240] sm:$0xff]  ;;  %v797_v51 = vld [vmem:[%s6481_s16 + $0x250] sm:$0xff] }
 0x12a   : > { %1580 = vmatpush1.bf16.msra.mxu0 %v5672_v56  ;;  %1933 = vmatpush1.bf16.msra.mxu1 %v5673_v57  ;;  %v760_v56 = vld [vmem:[%s6481_s16 + $0x128] sm:$0xff]  ;;  %v762_v57 = vld [vmem:[%s6481_s16 + $0x138] sm:$0xff] }
 0x12b   : > { %1581 = vmatprep.subr.bf16.mxu0 %v5674_v58  ;;  %1934 = vmatprep.subr.bf16.mxu1 %v5676_v59  ;;  %v867_v58 = vpack.c.bf16 %v757_v55, %v755_v54  ;;  %v870_v59 = vpack.c.bf16 %v762_v57, %v760_v56  ;;  %v887_v54 = vpack.c.bf16 %v797_v51, %v795_v50  ;;  %v799_v56 = vld [vmem:[%s6481_s16 + $0x260] sm:$0xff]  ;;  %v801_v57 = vld [vmem:[%s6481_s16 + $0x270] sm:$0xff] }
 0x12c   : > { %v919_v50 = vld [vmem:[#allocation2 + $0x20] sm:$0xff]  ;;  %v921_v51 = vld [vmem:[#allocation2 + $0x30] sm:$0xff] }
 0x12e   : > { %1582 = vmatpush1.bf16.msra.mxu0 %v5678_v60  ;;  %1935 = vmatpush1.bf16.msra.mxu1 %v5679_v61  ;;  %v759_v60 = vld [vmem:[%s6481_s16 + $0x120] sm:$0xff]  ;;  %v761_v61 = vld [vmem:[%s6481_s16 + $0x130] sm:$0xff] }
 0x12f   : > { %1583 = vmatprep.subr.bf16.mxu0 %v5680_v62  ;;  %1936 = vmatprep.subr.bf16.mxu1 %v5682_v63  ;;  %v764_v62 = vld [vmem:[%s6481_s16 + $0x148] sm:$0xff]  ;;  %v766_v63 = vld [vmem:[%s6481_s16 + $0x158] sm:$0xff] }
 0x132   : > { %1584 = vmatpush1.bf16.msra.mxu0 %v5684_v0  ;;  %1937 = vmatpush1.bf16.msra.mxu1 %v5685_v1  ;;  %v869_v0 = vpack.c.bf16 %v761_v61, %v759_v60  ;;  %v872_v1 = vpack.c.bf16 %v766_v63, %v764_v62  ;;  %v889_v60 = vpack.c.bf16 %v801_v57, %v799_v56  ;;  %v803_v62 = vld [vmem:[%s6481_s16 + $0x280] sm:$0xff]  ;;  %v805_v63 = vld [vmem:[%s6481_s16 + $0x290] sm:$0xff]  ;;  %v920_v56 = vld [vmem:[#allocation2 + $0x28] sm:$0xff] }
 0x133   : > { %1585 = vmatprep.subr.bf16.mxu0 %v5686_v2  ;;  %1938 = vmatprep.subr.bf16.mxu1 %v5688_v3  ;;  %v763_v2 = vld [vmem:[%s6481_s16 + $0x140] sm:$0xff]  ;;  %v765_v3 = vld [vmem:[%s6481_s16 + $0x150] sm:$0xff]  ;;  %v922_v57 = vld [vmem:[#allocation2 + $0x38] sm:$0xff] }
 0x134   : > { %v871_v6 = vpack.c.bf16 %v765_v3, %v763_v2  ;;  %v891_v2 = vpack.c.bf16 %v805_v63, %v803_v62 }
 0x136   : > { %1586 = vmatpush1.bf16.msra.mxu0 %v5690_v4  ;;  %1939 = vmatpush1.bf16.msra.mxu1 %v5691_v5  ;;  %v768_v4 = vld [vmem:[%s6481_s16 + $0x168] sm:$0xff]  ;;  %v770_v5 = vld [vmem:[%s6481_s16 + $0x178] sm:$0xff] }
 0x137   : > { %v874_v7 = vpack.c.bf16 %v770_v5, %v768_v4  ;;  %v807_v4 = vld [vmem:[%s6481_s16 + $0x2a0] sm:$0xff]  ;;  %v809_v5 = vld [vmem:[%s6481_s16 + $0x2b0] sm:$0xff] }
 0x138   : > { %v893_v8 = vpack.c.bf16 %v809_v5, %v807_v4 }
 0x139   : > { %1588 = vmatmul.mubr.bf16.vlgmr.msra.gmra.mrb[0].mxu0 %v851_v10  ;;  %1941 = vmatmul.mubr.bf16.vlgmr.msra.gmra.mrb[0].mxu1 %v851_v10  ;;  %v772_v10 = vld [vmem:[%s6481_s16 + $0x188] sm:$0xff] }
 0x13a   : > { %1597 = vmatprep.mubr.bf16.mxu0 %v854_v11  ;;  %1950 = vmatprep.mubr.bf16.mxu1 %v854_v11  ;;  %v774_v11 = vld [vmem:[%s6481_s16 + $0x198] sm:$0xff] }
 0x13b   : > { %v876_v13 = vpack.c.bf16 %v774_v11, %v772_v10  ;;  %v811_v10 = vld [vmem:[%s6481_s16 + $0x2c0] sm:$0xff]  ;;  %v813_v11 = vld [vmem:[%s6481_s16 + $0x2d0] sm:$0xff] }
 0x13c   : > { %v895_v14 = vpack.c.bf16 %v813_v11, %v811_v10  ;;  %v837_v10 = vld [vmem:[%s6481_s16 + $0x390] sm:$0xff]  ;;  %v926_v11 = vld [vmem:[#allocation2 + $0x58] sm:$0xff] }
 0x141   : > { %1598 = vmatmul.mubr.bf16.gmra.mrb[4].mxu0 %v853_v16  ;;  %1951 = vmatmul.mubr.bf16.gmra.mrb[4].mxu1 %v853_v16  ;;  %v776_v16 = vld [vmem:[%s6481_s16 + $0x1a8] sm:$0xff] }
 0x142   : > { %1607 = vmatprep.mubr.bf16.mxu0 %v856_v17  ;;  %1960 = vmatprep.mubr.bf16.mxu1 %v856_v17  ;;  %v778_v17 = vld [vmem:[%s6481_s16 + $0x1b8] sm:$0xff] }
 0x143   : > { %v878_v19 = vpack.c.bf16 %v778_v17, %v776_v16  ;;  %v815_v16 = vld [vmem:[%s6481_s16 + $0x2e0] sm:$0xff]  ;;  %v817_v17 = vld [vmem:[%s6481_s16 + $0x2f0] sm:$0xff] }
 0x144   : > { %v897_v20 = vpack.c.bf16 %v817_v17, %v815_v16  ;;  %v927_v16 = vld [vmem:[#allocation2 + $0x60] sm:$0xff]  ;;  %v929_v17 = vld [vmem:[#allocation2 + $0x70] sm:$0xff] }
 0x149   : > { %1608 = vmatmul.mubr.bf16.gmra.mrb[8].mxu0 %v855_v22  ;;  %1961 = vmatmul.mubr.bf16.gmra.mrb[8].mxu1 %v855_v22  ;;  %v780_v22 = vld [vmem:[%s6481_s16 + $0x1c8] sm:$0xff] }
 0x14a   : > { %1617 = vmatprep.mubr.bf16.mxu0 %v858_v23  ;;  %1970 = vmatprep.mubr.bf16.mxu1 %v858_v23  ;;  %v782_v23 = vld [vmem:[%s6481_s16 + $0x1d8] sm:$0xff] }
 0x14b   : > { %v880_v25 = vpack.c.bf16 %v782_v23, %v780_v22  ;;  %v819_v22 = vld [vmem:[%s6481_s16 + $0x300] sm:$0xff]  ;;  %v821_v23 = vld [vmem:[%s6481_s16 + $0x310] sm:$0xff] }
 0x14c   : > { %v899_v26 = vpack.c.bf16 %v821_v23, %v819_v22  ;;  %v928_v22 = vld [vmem:[#allocation2 + $0x68] sm:$0xff]  ;;  %v930_v23 = vld [vmem:[#allocation2 + $0x78] sm:$0xff] }
 0x151   : > { %1618 = vmatmul.mubr.bf16.gmra.mrb[12].mxu0 %v857_v28  ;;  %1971 = vmatmul.mubr.bf16.gmra.mrb[12].mxu1 %v857_v28  ;;  %v784_v28 = vld [vmem:[%s6481_s16 + $0x1e8] sm:$0xff] }
 0x152   : > { %1627 = vmatprep.mubr.bf16.mxu0 %v860_v29  ;;  %1980 = vmatprep.mubr.bf16.mxu1 %v860_v29  ;;  %v786_v29 = vld [vmem:[%s6481_s16 + $0x1f8] sm:$0xff] }
 0x153   : > { %v882_v31 = vpack.c.bf16 %v786_v29, %v784_v28  ;;  %v823_v28 = vld [vmem:[%s6481_s16 + $0x320] sm:$0xff]  ;;  %v825_v29 = vld [vmem:[%s6481_s16 + $0x330] sm:$0xff] }
 0x154   : > { %v901_v32 = vpack.c.bf16 %v825_v29, %v823_v28 }
 0x159   : > { %1628 = vmatmul.mubr.bf16.gmra.mrb[16].mxu0 %v859_v34  ;;  %1981 = vmatmul.mubr.bf16.gmra.mrb[16].mxu1 %v859_v34  ;;  %v788_v34 = vld [vmem:[%s6481_s16 + $0x208] sm:$0xff] }
 0x15a   : > { %1637 = vmatprep.mubr.bf16.mxu0 %v862_v35  ;;  %1990 = vmatprep.mubr.bf16.mxu1 %v862_v35  ;;  %v790_v35 = vld [vmem:[%s6481_s16 + $0x218] sm:$0xff] }
 0x15b   : > { %v884_v37 = vpack.c.bf16 %v790_v35, %v788_v34  ;;  %v827_v34 = vld [vmem:[%s6481_s16 + $0x340] sm:$0xff]  ;;  %v829_v35 = vld [vmem:[%s6481_s16 + $0x350] sm:$0xff] }
 0x15c   : > { %v903_v38 = vpack.c.bf16 %v829_v35, %v827_v34 }
 0x161   : > { %1638 = vmatmul.mubr.bf16.gmra.mrb[20].mxu0 %v861_v40  ;;  %1991 = vmatmul.mubr.bf16.gmra.mrb[20].mxu1 %v861_v40  ;;  %v792_v40 = vld [vmem:[%s6481_s16 + $0x228] sm:$0xff] }
 0x162   : > { %1647 = vmatprep.mubr.bf16.mxu0 %v864_v41  ;;  %2000 = vmatprep.mubr.bf16.mxu1 %v864_v41  ;;  %v794_v41 = vld [vmem:[%s6481_s16 + $0x238] sm:$0xff] }
 0x163   : > { %v886_v43 = vpack.c.bf16 %v794_v41, %v792_v40  ;;  %v915_v40 = vld [vmem:[#allocation2] sm:$0xff]  ;;  %v917_v41 = vld [vmem:[#allocation2 + $0x10] sm:$0xff] }
 0x169   : > { %1648 = vmatmul.mubr.bf16.gmra.mrb[24].mxu0 %v863_v46  ;;  %2001 = vmatmul.mubr.bf16.gmra.mrb[24].mxu1 %v863_v46  ;;  %v796_v46 = vld [vmem:[%s6481_s16 + $0x248] sm:$0xff] }
 0x16a   : > { %1657 = vmatprep.mubr.bf16.mxu0 %v866_v47  ;;  %2010 = vmatprep.mubr.bf16.mxu1 %v866_v47  ;;  %v798_v47 = vld [vmem:[%s6481_s16 + $0x258] sm:$0xff] }
 0x16b   : > { %v888_v49 = vpack.c.bf16 %v798_v47, %v796_v46  ;;  %v836_v46 = vld [vmem:[%s6481_s16 + $0x388] sm:$0xff]  ;;  %v838_v47 = vld [vmem:[%s6481_s16 + $0x398] sm:$0xff] }
 0x16c   : > { %v908_v63 = vpack.c.bf16 %v838_v47, %v836_v46  ;;  %v935_v46 = vld [vmem:[#allocation2 + $0xa0] sm:$0xff]  ;;  %v937_v47 = vld [vmem:[#allocation2 + $0xb0] sm:$0xff] }
 0x171   : > { %1658 = vmatmul.mubr.bf16.gmra.mrb[28].mxu0 %v865_v52  ;;  %2011 = vmatmul.mubr.bf16.gmra.mrb[28].mxu1 %v865_v52  ;;  %v800_v52 = vld [vmem:[%s6481_s16 + $0x268] sm:$0xff] }
 0x172   : > { %1667 = vmatprep.mubr.bf16.mxu0 %v868_v53  ;;  %2020 = vmatprep.mubr.bf16.mxu1 %v868_v53  ;;  %v802_v53 = vld [vmem:[%s6481_s16 + $0x278] sm:$0xff] }
 0x173   : > { %v890_v55 = vpack.c.bf16 %v802_v53, %v800_v52 }
 0x179   : > { %1668 = vmatmul.mubr.bf16.gmra.mrb[32].mxu0 %v867_v58  ;;  %2021 = vmatmul.mubr.bf16.gmra.mrb[32].mxu1 %v867_v58  ;;  %v804_v58 = vld [vmem:[%s6481_s16 + $0x288] sm:$0xff] }
 0x17a   : > { %1677 = vmatprep.mubr.bf16.mxu0 %v870_v59  ;;  %2030 = vmatprep.mubr.bf16.mxu1 %v870_v59  ;;  %v806_v59 = vld [vmem:[%s6481_s16 + $0x298] sm:$0xff] }
 0x17b   : > { %v892_v61 = vpack.c.bf16 %v806_v59, %v804_v58 }
 0x181   : > { %1678 = vmatmul.mubr.bf16.gmra.mrb[36].mxu0 %v869_v0  ;;  %2031 = vmatmul.mubr.bf16.gmra.mrb[36].mxu1 %v869_v0  ;;  %v808_v0 = vld [vmem:[%s6481_s16 + $0x2a8] sm:$0xff] }
 0x182   : > { %1687 = vmatprep.mubr.bf16.mxu0 %v872_v1  ;;  %2040 = vmatprep.mubr.bf16.mxu1 %v872_v1  ;;  %v810_v1 = vld [vmem:[%s6481_s16 + $0x2b8] sm:$0xff] }
 0x183   : > { %v894_v3 = vpack.c.bf16 %v810_v1, %v808_v0 }
 0x189   : > { %1688 = vmatmul.mubr.bf16.gmra.mrb[40].mxu0 %v871_v6  ;;  %2041 = vmatmul.mubr.bf16.gmra.mrb[40].mxu1 %v871_v6  ;;  %v812_v6 = vld [vmem:[%s6481_s16 + $0x2c8] sm:$0xff] }
 0x18a   : > { %1697 = vmatprep.mubr.bf16.mxu0 %v874_v7  ;;  %2050 = vmatprep.mubr.bf16.mxu1 %v874_v7  ;;  %v814_v7 = vld [vmem:[%s6481_s16 + $0x2d8] sm:$0xff] }
 0x18b   : > { %v896_v9 = vpack.c.bf16 %v814_v7, %v812_v6  ;;  %v923_v6 = vld [vmem:[#allocation2 + $0x40] sm:$0xff]  ;;  %v925_v7 = vld [vmem:[#allocation2 + $0x50] sm:$0xff] }
 0x191   : > { %1698 = vmatmul.mubr.bf16.gmra.mrb[44].mxu0 %v873_v12  ;;  %2051 = vmatmul.mubr.bf16.gmra.mrb[44].mxu1 %v873_v12  ;;  %v816_v12 = vld [vmem:[%s6481_s16 + $0x2e8] sm:$0xff] }
 0x192   : > { %1707 = vmatprep.mubr.bf16.mxu0 %v876_v13  ;;  %2060 = vmatprep.mubr.bf16.mxu1 %v876_v13  ;;  %v818_v13 = vld [vmem:[%s6481_s16 + $0x2f8] sm:$0xff] }
 0x193   : > { %v898_v15 = vpack.c.bf16 %v818_v13, %v816_v12  ;;  %v840_v12 = vld [vmem:[%s6481_s16 + $0x3a8] sm:$0xff]  ;;  %v842_v13 = vld [vmem:[%s6481_s16 + $0x3b8] sm:$0xff] }
 0x194   : > { %v910_v29 = vpack.c.bf16 %v842_v13, %v840_v12  ;;  %v943_v12 = vld [vmem:[#allocation2 + $0xe0] sm:$0xff]  ;;  %v945_v13 = vld [vmem:[#allocation2 + $0xf0] sm:$0xff] }
 0x199   : > { %1708 = vmatmul.mubr.bf16.gmra.mrb[48].mxu0 %v875_v18  ;;  %2061 = vmatmul.mubr.bf16.gmra.mrb[48].mxu1 %v875_v18  ;;  %v820_v18 = vld [vmem:[%s6481_s16 + $0x308] sm:$0xff] }
 0x19a   : > { %1717 = vmatprep.mubr.bf16.mxu0 %v878_v19  ;;  %2070 = vmatprep.mubr.bf16.mxu1 %v878_v19  ;;  %v822_v19 = vld [vmem:[%s6481_s16 + $0x318] sm:$0xff] }
 0x19b   : > { %v900_v21 = vpack.c.bf16 %v822_v19, %v820_v18 }
 0x1a1   : > { %1718 = vmatmul.mubr.bf16.gmra.mrb[52].mxu0 %v877_v24  ;;  %2071 = vmatmul.mubr.bf16.gmra.mrb[52].mxu1 %v877_v24  ;;  %v824_v24 = vld [vmem:[%s6481_s16 + $0x328] sm:$0xff] }
 0x1a2   : > { %1727 = vmatprep.mubr.bf16.mxu0 %v880_v25  ;;  %2080 = vmatprep.mubr.bf16.mxu1 %v880_v25  ;;  %v826_v25 = vld [vmem:[%s6481_s16 + $0x338] sm:$0xff] }
 0x1a3   : > { %v902_v27 = vpack.c.bf16 %v826_v25, %v824_v24 }
 0x1a9   : > { %1728 = vmatmul.mubr.bf16.gmra.mrb[56].mxu0 %v879_v30  ;;  %2081 = vmatmul.mubr.bf16.gmra.mrb[56].mxu1 %v879_v30  ;;  %v828_v30 = vld [vmem:[%s6481_s16 + $0x348] sm:$0xff] }
 0x1aa   : > { %1737 = vmatprep.mubr.bf16.mxu0 %v882_v31  ;;  %2090 = vmatprep.mubr.bf16.mxu1 %v882_v31  ;;  %v830_v31 = vld [vmem:[%s6481_s16 + $0x358] sm:$0xff] }
 0x1ab   : > { %v904_v33 = vpack.c.bf16 %v830_v31, %v828_v30 }
 0x1b1   : > { %1738 = vmatmul.mubr.bf16.gmra.mrb[60].mxu0 %v881_v36  ;;  %2091 = vmatmul.mubr.bf16.gmra.mrb[60].mxu1 %v881_v36  ;;  %v832_v36 = vld [vmem:[%s6481_s16 + $0x368] sm:$0xff] }
 0x1b2   : > { %1747 = vmatprep.mubr.bf16.mxu0 %v884_v37  ;;  %2100 = vmatprep.mubr.bf16.mxu1 %v884_v37  ;;  %v834_v37 = vld [vmem:[%s6481_s16 + $0x378] sm:$0xff] }
 0x1b3   : > { %v906_v39 = vpack.c.bf16 %v834_v37, %v832_v36  ;;  %v931_v36 = vld [vmem:[#allocation2 + $0x80] sm:$0xff]  ;;  %v933_v37 = vld [vmem:[#allocation2 + $0x90] sm:$0xff] }
 0x1b9   : > { %1748 = vmatmul.mubr.bf16.gmra.mrb[64].mxu0 %v883_v42  ;;  %2101 = vmatmul.mubr.bf16.gmra.mrb[64].mxu1 %v883_v42  ;;  %v916_v42 = vld [vmem:[#allocation2 + $0x8] sm:$0xff] }
 0x1ba   : > { %1757 = vmatprep.mubr.bf16.mxu0 %v886_v43  ;;  %2110 = vmatprep.mubr.bf16.mxu1 %v886_v43  ;;  %v831_v43 = vld [vmem:[%s6481_s16 + $0x360] sm:$0xff] }
 0x1bb   : > { %v905_v58 = vpack.c.bf16 %v833_v44, %v831_v43  ;;  %v846_v43 = vld [vmem:[%s6481_s16 + $0x3d8] sm:$0xff] }
 0x1c1   : > { %1758 = vmatmul.mubr.bf16.gmra.mrb[68].mxu0 %v885_v48  ;;  %2111 = vmatmul.mubr.bf16.gmra.mrb[68].mxu1 %v885_v48 }
 0x1c2   : > { %1767 = vmatprep.mubr.bf16.mxu0 %v888_v49  ;;  %2120 = vmatprep.mubr.bf16.mxu1 %v888_v49 }
 0x1c9   : > { %1768 = vmatmul.mubr.bf16.gmra.mrb[72].mxu0 %v887_v54  ;;  %2121 = vmatmul.mubr.bf16.gmra.mrb[72].mxu1 %v887_v54 }
 0x1ca   : > { %1777 = vmatprep.mubr.bf16.mxu0 %v890_v55  ;;  %2130 = vmatprep.mubr.bf16.mxu1 %v890_v55 }
 0x1d1   : > { %1778 = vmatmul.mubr.bf16.gmra.mrb[76].mxu0 %v889_v60  ;;  %2131 = vmatmul.mubr.bf16.gmra.mrb[76].mxu1 %v889_v60 }
 0x1d2   : > { %1787 = vmatprep.mubr.bf16.mxu0 %v892_v61  ;;  %2140 = vmatprep.mubr.bf16.mxu1 %v892_v61 }
 0x1d9   : > { %1788 = vmatmul.mubr.bf16.gmra.mrb[80].mxu0 %v891_v2  ;;  %2141 = vmatmul.mubr.bf16.gmra.mrb[80].mxu1 %v891_v2 }
 0x1da   : > { %1797 = vmatprep.mubr.bf16.mxu0 %v894_v3  ;;  %2150 = vmatprep.mubr.bf16.mxu1 %v894_v3 }
 0x1e1   : > { %1798 = vmatmul.mubr.bf16.gmra.mrb[84].mxu0 %v893_v8  ;;  %2151 = vmatmul.mubr.bf16.gmra.mrb[84].mxu1 %v893_v8  ;;  %v924_v8 = vld [vmem:[#allocation2 + $0x48] sm:$0xff] }
 0x1e2   : > { %1807 = vmatprep.mubr.bf16.mxu0 %v896_v9  ;;  %2160 = vmatprep.mubr.bf16.mxu1 %v896_v9  ;;  %v835_v9 = vld [vmem:[%s6481_s16 + $0x380] sm:$0xff] }
 0x1e3   : > { %v907_v24 = vpack.c.bf16 %v837_v10, %v835_v9  ;;  %v850_v9 = vld [vmem:[%s6481_s16 + $0x3f8] sm:$0xff] }
 0x1e9   : > { %1808 = vmatmul.mubr.bf16.gmra.mrb[88].mxu0 %v895_v14  ;;  %2161 = vmatmul.mubr.bf16.gmra.mrb[88].mxu1 %v895_v14 }
 0x1ea   : > { %1817 = vmatprep.mubr.bf16.mxu0 %v898_v15  ;;  %2170 = vmatprep.mubr.bf16.mxu1 %v898_v15 }
 0x1f1   : > { %1818 = vmatmul.mubr.bf16.gmra.mrb[92].mxu0 %v897_v20  ;;  %2171 = vmatmul.mubr.bf16.gmra.mrb[92].mxu1 %v897_v20 }
 0x1f2   : > { %1827 = vmatprep.mubr.bf16.mxu0 %v900_v21  ;;  %2180 = vmatprep.mubr.bf16.mxu1 %v900_v21 }
 0x1f9   : > { %1828 = vmatmul.mubr.bf16.gmra.mrb[96].mxu0 %v899_v26  ;;  %2181 = vmatmul.mubr.bf16.gmra.mrb[96].mxu1 %v899_v26 }
 0x1fa   : > { %1837 = vmatprep.mubr.bf16.mxu0 %v902_v27  ;;  %2190 = vmatprep.mubr.bf16.mxu1 %v902_v27 }
 0x201   : > { %1838 = vmatmul.mubr.bf16.gmra.mrb[100].mxu0 %v901_v32  ;;  %2191 = vmatmul.mubr.bf16.gmra.mrb[100].mxu1 %v901_v32 }
 0x202   : > { %1847 = vmatprep.mubr.bf16.mxu0 %v904_v33  ;;  %2200 = vmatprep.mubr.bf16.mxu1 %v904_v33 }
 0x209   : > { %1848 = vmatmul.mubr.bf16.gmra.mrb[104].mxu0 %v903_v38  ;;  %2201 = vmatmul.mubr.bf16.gmra.mrb[104].mxu1 %v903_v38  ;;  %v932_v38 = vld [vmem:[#allocation2 + $0x88] sm:$0xff] }
 0x20a   : > { %1857 = vmatprep.mubr.bf16.mxu0 %v906_v39  ;;  %2210 = vmatprep.mubr.bf16.mxu1 %v906_v39  ;;  %v839_v39 = vld [vmem:[%s6481_s16 + $0x3a0] sm:$0xff] }
 0x20c   : > { %v1589_v48 = vpop.f32.mrb[0].mxu0  ;;  %v1942_v49 = vpop.f32.mrb[0].mxu1 }
 0x20d   : > { %v2261_v52 = vadd.f32 %v1589_v48, %v915_v40  ;;  %v2263_v53 = vadd.f32 %v1942_v49, %v917_v41  ;;  %v1591_v54 = vpop.f32.mrb[1].mxu0  ;;  %v1944_v55 = vpop.f32.mrb[1].mxu1  ;;  %v841_v40 = vld [vmem:[%s6481_s16 + $0x3b0] sm:$0xff]  ;;  %v934_v41 = vld [vmem:[#allocation2 + $0x98] sm:$0xff] }
 0x20e   : > { %v2262_v59 = vadd.f32 %v1591_v54, %v916_v42  ;;  %v2264_v60 = vadd.f32 %v1944_v55, %v918_v45  ;;  %v1593_v61 = vpop.f32.mrb[2].mxu0  ;;  %v1946_v62 = vpop.f32.mrb[2].mxu1  ;;  %v844_v42 = vld [vmem:[%s6481_s16 + $0x3c8] sm:$0xff]  ;;  %v909_v54 = vpack.c.bf16 %v841_v40, %v839_v39  ;;  %v951_v40 = vld [vmem:[#allocation2 + $0x120] sm:$0xff] }
 0x20f   : > { %2517 = vst [vmem:[#allocation2] sm:$0xff] %v2261_v52  ;;  %2519 = vst [vmem:[#allocation2 + $0x10] sm:$0xff] %v2263_v53  ;;  %v2265_v0 = vadd.f32 %v1593_v61, %v919_v50  ;;  %v2267_v1 = vadd.f32 %v1946_v62, %v921_v51  ;;  %v1595_v2 = vpop.f32.mrb[3].mxu0  ;;  %v1948_v3 = vpop.f32.mrb[3].mxu1  ;;  %v936_v52 = vld [vmem:[#allocation2 + $0xa8] sm:$0xff]  ;;  %v938_v53 = vld [vmem:[#allocation2 + $0xb8] sm:$0xff] }
 0x210   : > { %2518 = vst [vmem:[#allocation2 + $0x8] sm:$0xff] %v2262_v59  ;;  %2520 = vst [vmem:[#allocation2 + $0x18] sm:$0xff] %v2264_v60  ;;  %v2266_v4 = vadd.f32 %v1595_v2, %v920_v56  ;;  %v2268_v5 = vadd.f32 %v1948_v3, %v922_v57  ;;  %v912_v59 = vpack.c.bf16 %v846_v43, %v844_v42  ;;  %v939_v2 = vld [vmem:[#allocation2 + $0xc0] sm:$0xff]  ;;  %v941_v3 = vld [vmem:[#allocation2 + $0xd0] sm:$0xff] }
 0x211   : > { %2521 = vst [vmem:[#allocation2 + $0x20] sm:$0xff] %v2265_v0  ;;  %2523 = vst [vmem:[#allocation2 + $0x30] sm:$0xff] %v2267_v1  ;;  %1858 = vmatmul.mubr.bf16.gmra.mrb[108].mxu0 %v905_v58  ;;  %2211 = vmatmul.mubr.bf16.gmra.mrb[108].mxu1 %v905_v58 }
 0x212   : > { %2522 = vst [vmem:[#allocation2 + $0x28] sm:$0xff] %v2266_v4  ;;  %2524 = vst [vmem:[#allocation2 + $0x38] sm:$0xff] %v2268_v5  ;;  %1867 = vmatprep.mubr.bf16.mxu0 %v908_v63  ;;  %2220 = vmatprep.mubr.bf16.mxu1 %v908_v63  ;;  %v940_v4 = vld [vmem:[#allocation2 + $0xc8] sm:$0xff]  ;;  %v843_v5 = vld [vmem:[%s6481_s16 + $0x3c0] sm:$0xff] }
 0x214   : > { %v1599_v14 = vpop.f32.mrb[4].mxu0  ;;  %v1952_v15 = vpop.f32.mrb[4].mxu1 }
 0x215   : > { %v2269_v18 = vadd.f32 %v1599_v14, %v923_v6  ;;  %v2271_v19 = vadd.f32 %v1952_v15, %v925_v7  ;;  %v1601_v20 = vpop.f32.mrb[5].mxu0  ;;  %v1954_v21 = vpop.f32.mrb[5].mxu1  ;;  %v845_v6 = vld [vmem:[%s6481_s16 + $0x3d0] sm:$0xff]  ;;  %v942_v7 = vld [vmem:[#allocation2 + $0xd8] sm:$0xff] }
 0x216   : > { %v2270_v25 = vadd.f32 %v1601_v20, %v924_v8  ;;  %v2272_v26 = vadd.f32 %v1954_v21, %v926_v11  ;;  %v1603_v27 = vpop.f32.mrb[6].mxu0  ;;  %v1956_v28 = vpop.f32.mrb[6].mxu1  ;;  %v848_v8 = vld [vmem:[%s6481_s16 + $0x3e8] sm:$0xff]  ;;  %v911_v20 = vpack.c.bf16 %v845_v6, %v843_v5 }
 0x217   : > { %2525 = vst [vmem:[#allocation2 + $0x40] sm:$0xff] %v2269_v18  ;;  %2527 = vst [vmem:[#allocation2 + $0x50] sm:$0xff] %v2271_v19  ;;  %v2273_v30 = vadd.f32 %v1603_v27, %v927_v16  ;;  %v2275_v31 = vadd.f32 %v1956_v28, %v929_v17  ;;  %v1605_v32 = vpop.f32.mrb[7].mxu0  ;;  %v1958_v33 = vpop.f32.mrb[7].mxu1  ;;  %v944_v18 = vld [vmem:[#allocation2 + $0xe8] sm:$0xff]  ;;  %v946_v19 = vld [vmem:[#allocation2 + $0xf8] sm:$0xff] }
 0x218   : > { %2526 = vst [vmem:[#allocation2 + $0x48] sm:$0xff] %v2270_v25  ;;  %2528 = vst [vmem:[#allocation2 + $0x58] sm:$0xff] %v2272_v26  ;;  %v2274_v34 = vadd.f32 %v1605_v32, %v928_v22  ;;  %v2276_v35 = vadd.f32 %v1958_v33, %v930_v23  ;;  %v914_v25 = vpack.c.bf16 %v850_v9, %v848_v8  ;;  %v947_v32 = vld [vmem:[#allocation2 + $0x100] sm:$0xff]  ;;  %v949_v33 = vld [vmem:[#allocation2 + $0x110] sm:$0xff] }
 0x219   : > { %2529 = vst [vmem:[#allocation2 + $0x60] sm:$0xff] %v2273_v30  ;;  %2531 = vst [vmem:[#allocation2 + $0x70] sm:$0xff] %v2275_v31  ;;  %1868 = vmatmul.mubr.bf16.gmra.mrb[112].mxu0 %v907_v24  ;;  %2221 = vmatmul.mubr.bf16.gmra.mrb[112].mxu1 %v907_v24  ;;  %v962_v8 = vld [vmem:[#allocation2 + $0x178] sm:$0xff] }
 0x21a   : > { %2530 = vst [vmem:[#allocation2 + $0x68] sm:$0xff] %v2274_v34  ;;  %2532 = vst [vmem:[#allocation2 + $0x78] sm:$0xff] %v2276_v35  ;;  %1877 = vmatprep.mubr.bf16.mxu0 %v910_v29  ;;  %2230 = vmatprep.mubr.bf16.mxu1 %v910_v29  ;;  %v847_v34 = vld [vmem:[%s6481_s16 + $0x3e0] sm:$0xff]  ;;  %v849_v35 = vld [vmem:[%s6481_s16 + $0x3f0] sm:$0xff] }
 0x21c   : > { %v1609_v44 = vpop.f32.mrb[8].mxu0  ;;  %v1962_v45 = vpop.f32.mrb[8].mxu1 }
 0x21d   : > { %v2277_v48 = vadd.f32 %v1609_v44, %v931_v36  ;;  %v2279_v49 = vadd.f32 %v1962_v45, %v933_v37  ;;  %v1611_v50 = vpop.f32.mrb[9].mxu0  ;;  %v1964_v51 = vpop.f32.mrb[9].mxu1  ;;  %v948_v36 = vld [vmem:[#allocation2 + $0x108] sm:$0xff]  ;;  %v950_v37 = vld [vmem:[#allocation2 + $0x118] sm:$0xff] }
 0x21e   : > { %v2278_v55 = vadd.f32 %v1611_v50, %v932_v38  ;;  %v2280_v56 = vadd.f32 %v1964_v51, %v934_v41  ;;  %v1613_v57 = vpop.f32.mrb[10].mxu0  ;;  %v1966_v58 = vpop.f32.mrb[10].mxu1  ;;  %v953_v41 = vld [vmem:[#allocation2 + $0x130] sm:$0xff] }
 0x21f   : > { %2533 = vst [vmem:[#allocation2 + $0x80] sm:$0xff] %v2277_v48  ;;  %2535 = vst [vmem:[#allocation2 + $0x90] sm:$0xff] %v2279_v49  ;;  %v2281_v60 = vadd.f32 %v1613_v57, %v935_v46  ;;  %v2283_v61 = vadd.f32 %v1966_v58, %v937_v47  ;;  %v1615_v62 = vpop.f32.mrb[11].mxu0  ;;  %v1968_v63 = vpop.f32.mrb[11].mxu1  ;;  %v952_v46 = vld [vmem:[#allocation2 + $0x128] sm:$0xff]  ;;  %v954_v47 = vld [vmem:[#allocation2 + $0x138] sm:$0xff]  ;;  %v913_v48 = vpack.c.bf16 %v849_v35, %v847_v34 }
 0x220   : > { %2534 = vst [vmem:[#allocation2 + $0x88] sm:$0xff] %v2278_v55  ;;  %2536 = vst [vmem:[#allocation2 + $0x98] sm:$0xff] %v2280_v56  ;;  %v2282_v0 = vadd.f32 %v1615_v62, %v936_v52  ;;  %v2284_v1 = vadd.f32 %v1968_v63, %v938_v53  ;;  %v958_v62 = vld [vmem:[#allocation2 + $0x158] sm:$0xff] }
 0x221   : > { %2537 = vst [vmem:[#allocation2 + $0xa0] sm:$0xff] %v2281_v60  ;;  %2539 = vst [vmem:[#allocation2 + $0xb0] sm:$0xff] %v2283_v61  ;;  %1878 = vmatmul.mubr.bf16.gmra.mrb[116].mxu0 %v909_v54  ;;  %2231 = vmatmul.mubr.bf16.gmra.mrb[116].mxu1 %v909_v54  ;;  %v957_v60 = vld [vmem:[#allocation2 + $0x150] sm:$0xff]  ;;  %v956_v61 = vld [vmem:[#allocation2 + $0x148] sm:$0xff] }
 0x222   : > { %2538 = vst [vmem:[#allocation2 + $0xa8] sm:$0xff] %v2282_v0  ;;  %2540 = vst [vmem:[#allocation2 + $0xb8] sm:$0xff] %v2284_v1  ;;  %1887 = vmatprep.mubr.bf16.mxu0 %v912_v59  ;;  %2240 = vmatprep.mubr.bf16.mxu1 %v912_v59  ;;  %v955_v59 = vld [vmem:[#allocation2 + $0x140] sm:$0xff] }
 0x223   : > { %v959_v1 = vld [vmem:[#allocation2 + $0x160] sm:$0xff] }
 0x224   : > { %v1619_v10 = vpop.f32.mrb[12].mxu0  ;;  %v1972_v11 = vpop.f32.mrb[12].mxu1 }
 0x225   : > { %v2285_v14 = vadd.f32 %v1619_v10, %v939_v2  ;;  %v2287_v15 = vadd.f32 %v1972_v11, %v941_v3  ;;  %v1621_v16 = vpop.f32.mrb[13].mxu0  ;;  %v1974_v17 = vpop.f32.mrb[13].mxu1  ;;  %v961_v2 = vld [vmem:[#allocation2 + $0x170] sm:$0xff] }
 0x226   : > { %v2286_v21 = vadd.f32 %v1621_v16, %v940_v4  ;;  %v2288_v22 = vadd.f32 %v1974_v17, %v942_v7  ;;  %v1623_v23 = vpop.f32.mrb[14].mxu0  ;;  %v1976_v24 = vpop.f32.mrb[14].mxu1  ;;  %v960_v7 = vld [vmem:[#allocation2 + $0x168] sm:$0xff] }
 0x227   : > { %2541 = vst [vmem:[#allocation2 + $0xc0] sm:$0xff] %v2285_v14  ;;  %2543 = vst [vmem:[#allocation2 + $0xd0] sm:$0xff] %v2287_v15  ;;  %v2289_v26 = vadd.f32 %v1623_v23, %v943_v12  ;;  %v2291_v27 = vadd.f32 %v1976_v24, %v945_v13  ;;  %v1625_v28 = vpop.f32.mrb[15].mxu0  ;;  %v1978_v29 = vpop.f32.mrb[15].mxu1 }
 0x228   : > { %2542 = vst [vmem:[#allocation2 + $0xc8] sm:$0xff] %v2286_v21  ;;  %2544 = vst [vmem:[#allocation2 + $0xd8] sm:$0xff] %v2288_v22  ;;  %v2290_v30 = vadd.f32 %v1625_v28, %v944_v18  ;;  %v2292_v31 = vadd.f32 %v1978_v29, %v946_v19  ;;  %v963_v19 = vld [vmem:[#allocation2 + $0x180] sm:$0xff]  ;;  %v964_v21 = vld [vmem:[#allocation2 + $0x188] sm:$0xff] }
 0x229   : > { %2545 = vst [vmem:[#allocation2 + $0xe0] sm:$0xff] %v2289_v26  ;;  %2547 = vst [vmem:[#allocation2 + $0xf0] sm:$0xff] %v2291_v27  ;;  %1888 = vmatmul.mubr.bf16.gmra.mrb[120].mxu0 %v911_v20  ;;  %2241 = vmatmul.mubr.bf16.gmra.mrb[120].mxu1 %v911_v20  ;;  %v965_v20 = vld [vmem:[#allocation2 + $0x190] sm:$0xff]  ;;  %v966_v22 = vld [vmem:[#allocation2 + $0x198] sm:$0xff] }
 0x22a   : > { %2546 = vst [vmem:[#allocation2 + $0xe8] sm:$0xff] %v2290_v30  ;;  %2548 = vst [vmem:[#allocation2 + $0xf8] sm:$0xff] %v2292_v31  ;;  %1897 = vmatprep.mubr.bf16.mxu0 %v914_v25  ;;  %2250 = vmatprep.mubr.bf16.mxu1 %v914_v25  ;;  %v967_v25 = vld [vmem:[#allocation2 + $0x1a0] sm:$0xff]  ;;  %v969_v26 = vld [vmem:[#allocation2 + $0x1b0] sm:$0xff] }
 0x22b   : > { %v968_v31 = vld [vmem:[#allocation2 + $0x1a8] sm:$0xff] }
 0x22c   : > { %v1629_v38 = vpop.f32.mrb[16].mxu0  ;;  %v1982_v39 = vpop.f32.mrb[16].mxu1 }
 0x22d   : > { %v2293_v42 = vadd.f32 %v1629_v38, %v947_v32  ;;  %v2295_v43 = vadd.f32 %v1982_v39, %v949_v33  ;;  %v1631_v44 = vpop.f32.mrb[17].mxu0  ;;  %v1984_v45 = vpop.f32.mrb[17].mxu1  ;;  %v970_v32 = vld [vmem:[#allocation2 + $0x1b8] sm:$0xff] }
 0x22e   : > { %v2294_v49 = vadd.f32 %v1631_v44, %v948_v36  ;;  %v2296_v50 = vadd.f32 %v1984_v45, %v950_v37  ;;  %v1633_v51 = vpop.f32.mrb[18].mxu0  ;;  %v1986_v52 = vpop.f32.mrb[18].mxu1  ;;  %v973_v44 = vld [vmem:[#allocation2 + $0x1d0] sm:$0xff]  ;;  %v972_v45 = vld [vmem:[#allocation2 + $0x1c8] sm:$0xff] }
 0x22f   : > { %2549 = vst [vmem:[#allocation2 + $0x100] sm:$0xff] %v2293_v42  ;;  %2551 = vst [vmem:[#allocation2 + $0x110] sm:$0xff] %v2295_v43  ;;  %v2297_v53 = vadd.f32 %v1633_v51, %v951_v40  ;;  %v2299_v54 = vadd.f32 %v1986_v52, %v953_v41  ;;  %v1635_v55 = vpop.f32.mrb[19].mxu0  ;;  %v1988_v56 = vpop.f32.mrb[19].mxu1  ;;  %v971_v43 = vld [vmem:[#allocation2 + $0x1c0] sm:$0xff] }
 0x230   : > { %2550 = vst [vmem:[#allocation2 + $0x108] sm:$0xff] %v2294_v49  ;;  %2552 = vst [vmem:[#allocation2 + $0x118] sm:$0xff] %v2296_v50  ;;  %v2298_v57 = vadd.f32 %v1635_v55, %v952_v46  ;;  %v2300_v58 = vadd.f32 %v1988_v56, %v954_v47  ;;  %v974_v46 = vld [vmem:[#allocation2 + $0x1d8] sm:$0xff]  ;;  %v975_v49 = vld [vmem:[#allocation2 + $0x1e0] sm:$0xff] }
 0x231   : > { %2553 = vst [vmem:[#allocation2 + $0x120] sm:$0xff] %v2297_v53  ;;  %2555 = vst [vmem:[#allocation2 + $0x130] sm:$0xff] %v2299_v54  ;;  %1898 = vmatmul.mubr.bf16.gmra.mrb[124].mxu0 %v913_v48  ;;  %2251 = vmatmul.mubr.bf16.gmra.mrb[124].mxu1 %v913_v48  ;;  %v977_v50 = vld [vmem:[#allocation2 + $0x1f0] sm:$0xff]  ;;  %v976_v55 = vld [vmem:[#allocation2 + $0x1e8] sm:$0xff] }
 0x232   : > { %2554 = vst [vmem:[#allocation2 + $0x128] sm:$0xff] %v2298_v57  ;;  %2556 = vst [vmem:[#allocation2 + $0x138] sm:$0xff] %v2300_v58  ;;  %v978_v56 = vld [vmem:[#allocation2 + $0x1f8] sm:$0xff] }
 0x234   : > { %v1639_v63 = vpop.f32.mrb[20].mxu0  ;;  %v1992_v0 = vpop.f32.mrb[20].mxu1 }
 0x235   : > { %v2301_v3 = vadd.f32 %v1639_v63, %v955_v59  ;;  %v2303_v4 = vadd.f32 %v1992_v0, %v957_v60  ;;  %v1641_v5 = vpop.f32.mrb[21].mxu0  ;;  %v1994_v6 = vpop.f32.mrb[21].mxu1 }
 0x236   : > { %v2302_v9 = vadd.f32 %v1641_v5, %v956_v61  ;;  %v2304_v10 = vadd.f32 %v1994_v6, %v958_v62  ;;  %v1643_v11 = vpop.f32.mrb[22].mxu0  ;;  %v1996_v12 = vpop.f32.mrb[22].mxu1  ;;  %v980_v5 = vld [vmem:[#allocation2 + $0x208] sm:$0xff]  ;;  %v982_v6 = vld [vmem:[#allocation2 + $0x218] sm:$0xff] }
 0x237   : > { %2557 = vst [vmem:[#allocation2 + $0x140] sm:$0xff] %v2301_v3  ;;  %2559 = vst [vmem:[#allocation2 + $0x150] sm:$0xff] %v2303_v4  ;;  %v2305_v13 = vadd.f32 %v1643_v11, %v959_v1  ;;  %v2307_v14 = vadd.f32 %v1996_v12, %v961_v2  ;;  %v1645_v15 = vpop.f32.mrb[23].mxu0  ;;  %v1998_v16 = vpop.f32.mrb[23].mxu1  ;;  %v979_v3 = vld [vmem:[#allocation2 + $0x200] sm:$0xff]  ;;  %v981_v4 = vld [vmem:[#allocation2 + $0x210] sm:$0xff] }
 0x238   : > { %2558 = vst [vmem:[#allocation2 + $0x148] sm:$0xff] %v2302_v9  ;;  %2560 = vst [vmem:[#allocation2 + $0x158] sm:$0xff] %v2304_v10  ;;  %v2306_v17 = vadd.f32 %v1645_v15, %v960_v7  ;;  %v2308_v18 = vadd.f32 %v1998_v16, %v962_v8  ;;  %v983_v9 = vld [vmem:[#allocation2 + $0x220] sm:$0xff]  ;;  %v985_v10 = vld [vmem:[#allocation2 + $0x230] sm:$0xff] }
 0x239   : > { %2561 = vst [vmem:[#allocation2 + $0x160] sm:$0xff] %v2305_v13  ;;  %2563 = vst [vmem:[#allocation2 + $0x170] sm:$0xff] %v2307_v14  ;;  %v984_v15 = vld [vmem:[#allocation2 + $0x228] sm:$0xff]  ;;  %v986_v16 = vld [vmem:[#allocation2 + $0x238] sm:$0xff] }
 0x23a   : > { %2562 = vst [vmem:[#allocation2 + $0x168] sm:$0xff] %v2306_v17  ;;  %2564 = vst [vmem:[#allocation2 + $0x178] sm:$0xff] %v2308_v18 }
 0x23c   : > { %v1649_v23 = vpop.f32.mrb[24].mxu0  ;;  %v2002_v24 = vpop.f32.mrb[24].mxu1 }
 0x23d   : > { %v2309_v27 = vadd.f32 %v1649_v23, %v963_v19  ;;  %v2311_v28 = vadd.f32 %v2002_v24, %v965_v20  ;;  %v1651_v29 = vpop.f32.mrb[25].mxu0  ;;  %v2004_v30 = vpop.f32.mrb[25].mxu1 }
 0x23e   : > { %v2310_v33 = vadd.f32 %v1651_v29, %v964_v21  ;;  %v2312_v34 = vadd.f32 %v2004_v30, %v966_v22  ;;  %v1653_v35 = vpop.f32.mrb[26].mxu0  ;;  %v2006_v36 = vpop.f32.mrb[26].mxu1  ;;  %v988_v29 = vld [vmem:[#allocation2 + $0x248] sm:$0xff]  ;;  %v990_v30 = vld [vmem:[#allocation2 + $0x258] sm:$0xff] }
 0x23f   : > { %2565 = vst [vmem:[#allocation2 + $0x180] sm:$0xff] %v2309_v27  ;;  %2567 = vst [vmem:[#allocation2 + $0x190] sm:$0xff] %v2311_v28  ;;  %v2313_v37 = vadd.f32 %v1653_v35, %v967_v25  ;;  %v2315_v38 = vadd.f32 %v2006_v36, %v969_v26  ;;  %v1655_v39 = vpop.f32.mrb[27].mxu0  ;;  %v2008_v40 = vpop.f32.mrb[27].mxu1  ;;  %v987_v27 = vld [vmem:[#allocation2 + $0x240] sm:$0xff]  ;;  %v989_v28 = vld [vmem:[#allocation2 + $0x250] sm:$0xff] }
 0x240   : > { %2566 = vst [vmem:[#allocation2 + $0x188] sm:$0xff] %v2310_v33  ;;  %2568 = vst [vmem:[#allocation2 + $0x198] sm:$0xff] %v2312_v34  ;;  %v2314_v41 = vadd.f32 %v1655_v39, %v968_v31  ;;  %v2316_v42 = vadd.f32 %v2008_v40, %v970_v32  ;;  %v991_v33 = vld [vmem:[#allocation2 + $0x260] sm:$0xff]  ;;  %v993_v34 = vld [vmem:[#allocation2 + $0x270] sm:$0xff] }
 0x241   : > { %2569 = vst [vmem:[#allocation2 + $0x1a0] sm:$0xff] %v2313_v37  ;;  %2571 = vst [vmem:[#allocation2 + $0x1b0] sm:$0xff] %v2315_v38  ;;  %v992_v39 = vld [vmem:[#allocation2 + $0x268] sm:$0xff]  ;;  %v994_v40 = vld [vmem:[#allocation2 + $0x278] sm:$0xff] }
 0x242   : > { %2570 = vst [vmem:[#allocation2 + $0x1a8] sm:$0xff] %v2314_v41  ;;  %2572 = vst [vmem:[#allocation2 + $0x1b8] sm:$0xff] %v2316_v42 }
 0x244   : > { %v1659_v47 = vpop.f32.mrb[28].mxu0  ;;  %v2012_v48 = vpop.f32.mrb[28].mxu1 }
 0x245   : > { %v2317_v51 = vadd.f32 %v1659_v47, %v971_v43  ;;  %v2319_v52 = vadd.f32 %v2012_v48, %v973_v44  ;;  %v1661_v53 = vpop.f32.mrb[29].mxu0  ;;  %v2014_v54 = vpop.f32.mrb[29].mxu1 }
 0x246   : > { %v2318_v57 = vadd.f32 %v1661_v53, %v972_v45  ;;  %v2320_v58 = vadd.f32 %v2014_v54, %v974_v46  ;;  %v1663_v59 = vpop.f32.mrb[30].mxu0  ;;  %v2016_v60 = vpop.f32.mrb[30].mxu1  ;;  %v996_v53 = vld [vmem:[#allocation2 + $0x288] sm:$0xff]  ;;  %v998_v54 = vld [vmem:[#allocation2 + $0x298] sm:$0xff] }
 0x247   : > { %2573 = vst [vmem:[#allocation2 + $0x1c0] sm:$0xff] %v2317_v51  ;;  %2575 = vst [vmem:[#allocation2 + $0x1d0] sm:$0xff] %v2319_v52  ;;  %v2321_v61 = vadd.f32 %v1663_v59, %v975_v49  ;;  %v2323_v62 = vadd.f32 %v2016_v60, %v977_v50  ;;  %v1665_v63 = vpop.f32.mrb[31].mxu0  ;;  %v2018_v0 = vpop.f32.mrb[31].mxu1  ;;  %v995_v51 = vld [vmem:[#allocation2 + $0x280] sm:$0xff]  ;;  %v997_v52 = vld [vmem:[#allocation2 + $0x290] sm:$0xff] }
 0x248   : > { %2574 = vst [vmem:[#allocation2 + $0x1c8] sm:$0xff] %v2318_v57  ;;  %2576 = vst [vmem:[#allocation2 + $0x1d8] sm:$0xff] %v2320_v58  ;;  %v2322_v1 = vadd.f32 %v1665_v63, %v976_v55  ;;  %v2324_v2 = vadd.f32 %v2018_v0, %v978_v56  ;;  %v999_v57 = vld [vmem:[#allocation2 + $0x2a0] sm:$0xff]  ;;  %v1001_v58 = vld [vmem:[#allocation2 + $0x2b0] sm:$0xff] }
 0x249   : > { %2577 = vst [vmem:[#allocation2 + $0x1e0] sm:$0xff] %v2321_v61  ;;  %2579 = vst [vmem:[#allocation2 + $0x1f0] sm:$0xff] %v2323_v62  ;;  %v1000_v63 = vld [vmem:[#allocation2 + $0x2a8] sm:$0xff]  ;;  %v1002_v0 = vld [vmem:[#allocation2 + $0x2b8] sm:$0xff] }
 0x24a   : > { %2578 = vst [vmem:[#allocation2 + $0x1e8] sm:$0xff] %v2322_v1  ;;  %2580 = vst [vmem:[#allocation2 + $0x1f8] sm:$0xff] %v2324_v2 }
 0x24c   : > { %v1669_v7 = vpop.f32.mrb[32].mxu0  ;;  %v2022_v8 = vpop.f32.mrb[32].mxu1 }
 0x24d   : > { %v2325_v11 = vadd.f32 %v1669_v7, %v979_v3  ;;  %v2327_v12 = vadd.f32 %v2022_v8, %v981_v4  ;;  %v1671_v13 = vpop.f32.mrb[33].mxu0  ;;  %v2024_v14 = vpop.f32.mrb[33].mxu1 }
 0x24e   : > { %v2326_v17 = vadd.f32 %v1671_v13, %v980_v5  ;;  %v2328_v18 = vadd.f32 %v2024_v14, %v982_v6  ;;  %v1673_v19 = vpop.f32.mrb[34].mxu0  ;;  %v2026_v20 = vpop.f32.mrb[34].mxu1  ;;  %v1004_v13 = vld [vmem:[#allocation2 + $0x2c8] sm:$0xff]  ;;  %v1006_v14 = vld [vmem:[#allocation2 + $0x2d8] sm:$0xff] }
 0x24f   : > { %2581 = vst [vmem:[#allocation2 + $0x200] sm:$0xff] %v2325_v11  ;;  %2583 = vst [vmem:[#allocation2 + $0x210] sm:$0xff] %v2327_v12  ;;  %v2329_v21 = vadd.f32 %v1673_v19, %v983_v9  ;;  %v2331_v22 = vadd.f32 %v2026_v20, %v985_v10  ;;  %v1675_v23 = vpop.f32.mrb[35].mxu0  ;;  %v2028_v24 = vpop.f32.mrb[35].mxu1  ;;  %v1003_v11 = vld [vmem:[#allocation2 + $0x2c0] sm:$0xff]  ;;  %v1005_v12 = vld [vmem:[#allocation2 + $0x2d0] sm:$0xff] }
 0x250   : > { %2582 = vst [vmem:[#allocation2 + $0x208] sm:$0xff] %v2326_v17  ;;  %2584 = vst [vmem:[#allocation2 + $0x218] sm:$0xff] %v2328_v18  ;;  %v2330_v25 = vadd.f32 %v1675_v23, %v984_v15  ;;  %v2332_v26 = vadd.f32 %v2028_v24, %v986_v16  ;;  %v1007_v17 = vld [vmem:[#allocation2 + $0x2e0] sm:$0xff]  ;;  %v1009_v18 = vld [vmem:[#allocation2 + $0x2f0] sm:$0xff] }
 0x251   : > { %2585 = vst [vmem:[#allocation2 + $0x220] sm:$0xff] %v2329_v21  ;;  %2587 = vst [vmem:[#allocation2 + $0x230] sm:$0xff] %v2331_v22  ;;  %v1008_v23 = vld [vmem:[#allocation2 + $0x2e8] sm:$0xff]  ;;  %v1010_v24 = vld [vmem:[#allocation2 + $0x2f8] sm:$0xff] }
 0x252   : > { %2586 = vst [vmem:[#allocation2 + $0x228] sm:$0xff] %v2330_v25  ;;  %2588 = vst [vmem:[#allocation2 + $0x238] sm:$0xff] %v2332_v26 }
 0x254   : > { %v1679_v31 = vpop.f32.mrb[36].mxu0  ;;  %v2032_v32 = vpop.f32.mrb[36].mxu1 }
 0x255   : > { %v2333_v35 = vadd.f32 %v1679_v31, %v987_v27  ;;  %v2335_v36 = vadd.f32 %v2032_v32, %v989_v28  ;;  %v1681_v37 = vpop.f32.mrb[37].mxu0  ;;  %v2034_v38 = vpop.f32.mrb[37].mxu1 }
 0x256   : > { %v2334_v41 = vadd.f32 %v1681_v37, %v988_v29  ;;  %v2336_v42 = vadd.f32 %v2034_v38, %v990_v30  ;;  %v1683_v43 = vpop.f32.mrb[38].mxu0  ;;  %v2036_v44 = vpop.f32.mrb[38].mxu1  ;;  %v1012_v37 = vld [vmem:[#allocation2 + $0x308] sm:$0xff]  ;;  %v1014_v38 = vld [vmem:[#allocation2 + $0x318] sm:$0xff] }
 0x257   : > { %2589 = vst [vmem:[#allocation2 + $0x240] sm:$0xff] %v2333_v35  ;;  %2591 = vst [vmem:[#allocation2 + $0x250] sm:$0xff] %v2335_v36  ;;  %v2337_v45 = vadd.f32 %v1683_v43, %v991_v33  ;;  %v2339_v46 = vadd.f32 %v2036_v44, %v993_v34  ;;  %v1685_v47 = vpop.f32.mrb[39].mxu0  ;;  %v2038_v48 = vpop.f32.mrb[39].mxu1  ;;  %v1011_v35 = vld [vmem:[#allocation2 + $0x300] sm:$0xff]  ;;  %v1013_v36 = vld [vmem:[#allocation2 + $0x310] sm:$0xff] }
 0x258   : > { %2590 = vst [vmem:[#allocation2 + $0x248] sm:$0xff] %v2334_v41  ;;  %2592 = vst [vmem:[#allocation2 + $0x258] sm:$0xff] %v2336_v42  ;;  %v2338_v49 = vadd.f32 %v1685_v47, %v992_v39  ;;  %v2340_v50 = vadd.f32 %v2038_v48, %v994_v40  ;;  %v1015_v41 = vld [vmem:[#allocation2 + $0x320] sm:$0xff]  ;;  %v1017_v42 = vld [vmem:[#allocation2 + $0x330] sm:$0xff] }
 0x259   : > { %2593 = vst [vmem:[#allocation2 + $0x260] sm:$0xff] %v2337_v45  ;;  %2595 = vst [vmem:[#allocation2 + $0x270] sm:$0xff] %v2339_v46  ;;  %v1016_v47 = vld [vmem:[#allocation2 + $0x328] sm:$0xff]  ;;  %v1018_v48 = vld [vmem:[#allocation2 + $0x338] sm:$0xff] }
 0x25a   : > { %2594 = vst [vmem:[#allocation2 + $0x268] sm:$0xff] %v2338_v49  ;;  %2596 = vst [vmem:[#allocation2 + $0x278] sm:$0xff] %v2340_v50 }
 0x25c   : > { %v1689_v55 = vpop.f32.mrb[40].mxu0  ;;  %v2042_v56 = vpop.f32.mrb[40].mxu1 }
 0x25d   : > { %v2341_v59 = vadd.f32 %v1689_v55, %v995_v51  ;;  %v2343_v60 = vadd.f32 %v2042_v56, %v997_v52  ;;  %v1691_v61 = vpop.f32.mrb[41].mxu0  ;;  %v2044_v62 = vpop.f32.mrb[41].mxu1 }
 0x25e   : > { %v2342_v1 = vadd.f32 %v1691_v61, %v996_v53  ;;  %v2344_v2 = vadd.f32 %v2044_v62, %v998_v54  ;;  %v1693_v3 = vpop.f32.mrb[42].mxu0  ;;  %v2046_v4 = vpop.f32.mrb[42].mxu1  ;;  %v1020_v61 = vld [vmem:[#allocation2 + $0x348] sm:$0xff]  ;;  %v1022_v62 = vld [vmem:[#allocation2 + $0x358] sm:$0xff] }
 0x25f   : > { %2597 = vst [vmem:[#allocation2 + $0x280] sm:$0xff] %v2341_v59  ;;  %2599 = vst [vmem:[#allocation2 + $0x290] sm:$0xff] %v2343_v60  ;;  %v2345_v5 = vadd.f32 %v1693_v3, %v999_v57  ;;  %v2347_v6 = vadd.f32 %v2046_v4, %v1001_v58  ;;  %v1695_v7 = vpop.f32.mrb[43].mxu0  ;;  %v2048_v8 = vpop.f32.mrb[43].mxu1  ;;  %v1019_v59 = vld [vmem:[#allocation2 + $0x340] sm:$0xff]  ;;  %v1021_v60 = vld [vmem:[#allocation2 + $0x350] sm:$0xff] }
 0x260   : > { %2598 = vst [vmem:[#allocation2 + $0x288] sm:$0xff] %v2342_v1  ;;  %2600 = vst [vmem:[#allocation2 + $0x298] sm:$0xff] %v2344_v2  ;;  %v2346_v9 = vadd.f32 %v1695_v7, %v1000_v63  ;;  %v2348_v10 = vadd.f32 %v2048_v8, %v1002_v0  ;;  %v1023_v1 = vld [vmem:[#allocation2 + $0x360] sm:$0xff]  ;;  %v1025_v2 = vld [vmem:[#allocation2 + $0x370] sm:$0xff] }
 0x261   : > { %2601 = vst [vmem:[#allocation2 + $0x2a0] sm:$0xff] %v2345_v5  ;;  %2603 = vst [vmem:[#allocation2 + $0x2b0] sm:$0xff] %v2347_v6  ;;  %v1024_v7 = vld [vmem:[#allocation2 + $0x368] sm:$0xff]  ;;  %v1026_v8 = vld [vmem:[#allocation2 + $0x378] sm:$0xff] }
 0x262   : > { %2602 = vst [vmem:[#allocation2 + $0x2a8] sm:$0xff] %v2346_v9  ;;  %2604 = vst [vmem:[#allocation2 + $0x2b8] sm:$0xff] %v2348_v10 }
 0x264   : > { %v1699_v15 = vpop.f32.mrb[44].mxu0  ;;  %v2052_v16 = vpop.f32.mrb[44].mxu1 }
 0x265   : > { %v2349_v19 = vadd.f32 %v1699_v15, %v1003_v11  ;;  %v2351_v20 = vadd.f32 %v2052_v16, %v1005_v12  ;;  %v1701_v21 = vpop.f32.mrb[45].mxu0  ;;  %v2054_v22 = vpop.f32.mrb[45].mxu1 }
 0x266   : > { %v2350_v25 = vadd.f32 %v1701_v21, %v1004_v13  ;;  %v2352_v26 = vadd.f32 %v2054_v22, %v1006_v14  ;;  %v1703_v27 = vpop.f32.mrb[46].mxu0  ;;  %v2056_v28 = vpop.f32.mrb[46].mxu1  ;;  %v1028_v21 = vld [vmem:[#allocation2 + $0x388] sm:$0xff]  ;;  %v1030_v22 = vld [vmem:[#allocation2 + $0x398] sm:$0xff] }
 0x267   : > { %2605 = vst [vmem:[#allocation2 + $0x2c0] sm:$0xff] %v2349_v19  ;;  %2607 = vst [vmem:[#allocation2 + $0x2d0] sm:$0xff] %v2351_v20  ;;  %v2353_v29 = vadd.f32 %v1703_v27, %v1007_v17  ;;  %v2355_v30 = vadd.f32 %v2056_v28, %v1009_v18  ;;  %v1705_v31 = vpop.f32.mrb[47].mxu0  ;;  %v2058_v32 = vpop.f32.mrb[47].mxu1  ;;  %v1027_v19 = vld [vmem:[#allocation2 + $0x380] sm:$0xff]  ;;  %v1029_v20 = vld [vmem:[#allocation2 + $0x390] sm:$0xff] }
 0x268   : > { %2606 = vst [vmem:[#allocation2 + $0x2c8] sm:$0xff] %v2350_v25  ;;  %2608 = vst [vmem:[#allocation2 + $0x2d8] sm:$0xff] %v2352_v26  ;;  %v2354_v33 = vadd.f32 %v1705_v31, %v1008_v23  ;;  %v2356_v34 = vadd.f32 %v2058_v32, %v1010_v24  ;;  %v1031_v25 = vld [vmem:[#allocation2 + $0x3a0] sm:$0xff]  ;;  %v1033_v26 = vld [vmem:[#allocation2 + $0x3b0] sm:$0xff] }
 0x269   : > { %2609 = vst [vmem:[#allocation2 + $0x2e0] sm:$0xff] %v2353_v29  ;;  %2611 = vst [vmem:[#allocation2 + $0x2f0] sm:$0xff] %v2355_v30  ;;  %v1032_v31 = vld [vmem:[#allocation2 + $0x3a8] sm:$0xff]  ;;  %v1034_v32 = vld [vmem:[#allocation2 + $0x3b8] sm:$0xff] }
 0x26a   : > { %2610 = vst [vmem:[#allocation2 + $0x2e8] sm:$0xff] %v2354_v33  ;;  %2612 = vst [vmem:[#allocation2 + $0x2f8] sm:$0xff] %v2356_v34 }
 0x26c   : > { %v1709_v39 = vpop.f32.mrb[48].mxu0  ;;  %v2062_v40 = vpop.f32.mrb[48].mxu1 }
 0x26d   : > { %v2357_v43 = vadd.f32 %v1709_v39, %v1011_v35  ;;  %v2359_v44 = vadd.f32 %v2062_v40, %v1013_v36  ;;  %v1711_v45 = vpop.f32.mrb[49].mxu0  ;;  %v2064_v46 = vpop.f32.mrb[49].mxu1 }
 0x26e   : > { %v2358_v49 = vadd.f32 %v1711_v45, %v1012_v37  ;;  %v2360_v50 = vadd.f32 %v2064_v46, %v1014_v38  ;;  %v1713_v51 = vpop.f32.mrb[50].mxu0  ;;  %v2066_v52 = vpop.f32.mrb[50].mxu1  ;;  %v1036_v45 = vld [vmem:[#allocation2 + $0x3c8] sm:$0xff]  ;;  %v1038_v46 = vld [vmem:[#allocation2 + $0x3d8] sm:$0xff] }
 0x26f   : > { %2613 = vst [vmem:[#allocation2 + $0x300] sm:$0xff] %v2357_v43  ;;  %2615 = vst [vmem:[#allocation2 + $0x310] sm:$0xff] %v2359_v44  ;;  %v2361_v53 = vadd.f32 %v1713_v51, %v1015_v41  ;;  %v2363_v54 = vadd.f32 %v2066_v52, %v1017_v42  ;;  %v1715_v55 = vpop.f32.mrb[51].mxu0  ;;  %v2068_v56 = vpop.f32.mrb[51].mxu1  ;;  %v1035_v43 = vld [vmem:[#allocation2 + $0x3c0] sm:$0xff]  ;;  %v1037_v44 = vld [vmem:[#allocation2 + $0x3d0] sm:$0xff] }
 0x270   : > { %2614 = vst [vmem:[#allocation2 + $0x308] sm:$0xff] %v2358_v49  ;;  %2616 = vst [vmem:[#allocation2 + $0x318] sm:$0xff] %v2360_v50  ;;  %v2362_v57 = vadd.f32 %v1715_v55, %v1016_v47  ;;  %v2364_v58 = vadd.f32 %v2068_v56, %v1018_v48  ;;  %v1039_v49 = vld [vmem:[#allocation2 + $0x3e0] sm:$0xff]  ;;  %v1041_v50 = vld [vmem:[#allocation2 + $0x3f0] sm:$0xff] }
 0x271   : > { %2617 = vst [vmem:[#allocation2 + $0x320] sm:$0xff] %v2361_v53  ;;  %2619 = vst [vmem:[#allocation2 + $0x330] sm:$0xff] %v2363_v54  ;;  %v1040_v55 = vld [vmem:[#allocation2 + $0x3e8] sm:$0xff]  ;;  %v1042_v56 = vld [vmem:[#allocation2 + $0x3f8] sm:$0xff] }
 0x272   : > { %2618 = vst [vmem:[#allocation2 + $0x328] sm:$0xff] %v2362_v57  ;;  %2620 = vst [vmem:[#allocation2 + $0x338] sm:$0xff] %v2364_v58 }
 0x274   : > { %v1719_v63 = vpop.f32.mrb[52].mxu0  ;;  %v2072_v0 = vpop.f32.mrb[52].mxu1 }
 0x275   : > { %v2365_v3 = vadd.f32 %v1719_v63, %v1019_v59  ;;  %v2367_v4 = vadd.f32 %v2072_v0, %v1021_v60  ;;  %v1721_v5 = vpop.f32.mrb[53].mxu0  ;;  %v2074_v6 = vpop.f32.mrb[53].mxu1 }
 0x276   : > { %v2366_v9 = vadd.f32 %v1721_v5, %v1020_v61  ;;  %v2368_v10 = vadd.f32 %v2074_v6, %v1022_v62  ;;  %v1723_v11 = vpop.f32.mrb[54].mxu0  ;;  %v2076_v12 = vpop.f32.mrb[54].mxu1  ;;  %v1044_v5 = vld [vmem:[#allocation2 + $0x408] sm:$0xff]  ;;  %v1046_v6 = vld [vmem:[#allocation2 + $0x418] sm:$0xff] }
 0x277   : > { %2621 = vst [vmem:[#allocation2 + $0x340] sm:$0xff] %v2365_v3  ;;  %2623 = vst [vmem:[#allocation2 + $0x350] sm:$0xff] %v2367_v4  ;;  %v2369_v13 = vadd.f32 %v1723_v11, %v1023_v1  ;;  %v2371_v14 = vadd.f32 %v2076_v12, %v1025_v2  ;;  %v1725_v15 = vpop.f32.mrb[55].mxu0  ;;  %v2078_v16 = vpop.f32.mrb[55].mxu1  ;;  %v1043_v3 = vld [vmem:[#allocation2 + $0x400] sm:$0xff]  ;;  %v1045_v4 = vld [vmem:[#allocation2 + $0x410] sm:$0xff] }
 0x278   : > { %2622 = vst [vmem:[#allocation2 + $0x348] sm:$0xff] %v2366_v9  ;;  %2624 = vst [vmem:[#allocation2 + $0x358] sm:$0xff] %v2368_v10  ;;  %v2370_v17 = vadd.f32 %v1725_v15, %v1024_v7  ;;  %v2372_v18 = vadd.f32 %v2078_v16, %v1026_v8  ;;  %v1047_v9 = vld [vmem:[#allocation2 + $0x420] sm:$0xff]  ;;  %v1049_v10 = vld [vmem:[#allocation2 + $0x430] sm:$0xff] }
 0x279   : > { %2625 = vst [vmem:[#allocation2 + $0x360] sm:$0xff] %v2369_v13  ;;  %2627 = vst [vmem:[#allocation2 + $0x370] sm:$0xff] %v2371_v14  ;;  %v1048_v15 = vld [vmem:[#allocation2 + $0x428] sm:$0xff]  ;;  %v1050_v16 = vld [vmem:[#allocation2 + $0x438] sm:$0xff] }
 0x27a   : > { %2626 = vst [vmem:[#allocation2 + $0x368] sm:$0xff] %v2370_v17  ;;  %2628 = vst [vmem:[#allocation2 + $0x378] sm:$0xff] %v2372_v18 }
 0x27c   : > { %v1729_v23 = vpop.f32.mrb[56].mxu0  ;;  %v2082_v24 = vpop.f32.mrb[56].mxu1 }
 0x27d   : > { %v2373_v27 = vadd.f32 %v1729_v23, %v1027_v19  ;;  %v2375_v28 = vadd.f32 %v2082_v24, %v1029_v20  ;;  %v1731_v29 = vpop.f32.mrb[57].mxu0  ;;  %v2084_v30 = vpop.f32.mrb[57].mxu1 }
 0x27e   : > { %v2374_v33 = vadd.f32 %v1731_v29, %v1028_v21  ;;  %v2376_v34 = vadd.f32 %v2084_v30, %v1030_v22  ;;  %v1733_v35 = vpop.f32.mrb[58].mxu0  ;;  %v2086_v36 = vpop.f32.mrb[58].mxu1  ;;  %v1052_v29 = vld [vmem:[#allocation2 + $0x448] sm:$0xff]  ;;  %v1054_v30 = vld [vmem:[#allocation2 + $0x458] sm:$0xff] }
 0x27f   : > { %2629 = vst [vmem:[#allocation2 + $0x380] sm:$0xff] %v2373_v27  ;;  %2631 = vst [vmem:[#allocation2 + $0x390] sm:$0xff] %v2375_v28  ;;  %v2377_v37 = vadd.f32 %v1733_v35, %v1031_v25  ;;  %v2379_v38 = vadd.f32 %v2086_v36, %v1033_v26  ;;  %v1735_v39 = vpop.f32.mrb[59].mxu0  ;;  %v2088_v40 = vpop.f32.mrb[59].mxu1  ;;  %v1051_v27 = vld [vmem:[#allocation2 + $0x440] sm:$0xff]  ;;  %v1053_v28 = vld [vmem:[#allocation2 + $0x450] sm:$0xff] }
 0x280   : > { %2630 = vst [vmem:[#allocation2 + $0x388] sm:$0xff] %v2374_v33  ;;  %2632 = vst [vmem:[#allocation2 + $0x398] sm:$0xff] %v2376_v34  ;;  %v2378_v41 = vadd.f32 %v1735_v39, %v1032_v31  ;;  %v2380_v42 = vadd.f32 %v2088_v40, %v1034_v32  ;;  %v1055_v33 = vld [vmem:[#allocation2 + $0x460] sm:$0xff]  ;;  %v1057_v34 = vld [vmem:[#allocation2 + $0x470] sm:$0xff] }
 0x281   : > { %2633 = vst [vmem:[#allocation2 + $0x3a0] sm:$0xff] %v2377_v37  ;;  %2635 = vst [vmem:[#allocation2 + $0x3b0] sm:$0xff] %v2379_v38  ;;  %v1056_v39 = vld [vmem:[#allocation2 + $0x468] sm:$0xff]  ;;  %v1058_v40 = vld [vmem:[#allocation2 + $0x478] sm:$0xff] }
 0x282   : > { %2634 = vst [vmem:[#allocation2 + $0x3a8] sm:$0xff] %v2378_v41  ;;  %2636 = vst [vmem:[#allocation2 + $0x3b8] sm:$0xff] %v2380_v42 }
 0x284   : > { %v1739_v47 = vpop.f32.mrb[60].mxu0  ;;  %v2092_v48 = vpop.f32.mrb[60].mxu1 }
 0x285   : > { %v2381_v51 = vadd.f32 %v1739_v47, %v1035_v43  ;;  %v2383_v52 = vadd.f32 %v2092_v48, %v1037_v44  ;;  %v1741_v53 = vpop.f32.mrb[61].mxu0  ;;  %v2094_v54 = vpop.f32.mrb[61].mxu1 }
 0x286   : > { %v2382_v57 = vadd.f32 %v1741_v53, %v1036_v45  ;;  %v2384_v58 = vadd.f32 %v2094_v54, %v1038_v46  ;;  %v1743_v59 = vpop.f32.mrb[62].mxu0  ;;  %v2096_v60 = vpop.f32.mrb[62].mxu1  ;;  %v1060_v53 = vld [vmem:[#allocation2 + $0x488] sm:$0xff]  ;;  %v1062_v54 = vld [vmem:[#allocation2 + $0x498] sm:$0xff] }
 0x287   : > { %2637 = vst [vmem:[#allocation2 + $0x3c0] sm:$0xff] %v2381_v51  ;;  %2639 = vst [vmem:[#allocation2 + $0x3d0] sm:$0xff] %v2383_v52  ;;  %v2385_v61 = vadd.f32 %v1743_v59, %v1039_v49  ;;  %v2387_v62 = vadd.f32 %v2096_v60, %v1041_v50  ;;  %v1745_v63 = vpop.f32.mrb[63].mxu0  ;;  %v2098_v0 = vpop.f32.mrb[63].mxu1  ;;  %v1059_v51 = vld [vmem:[#allocation2 + $0x480] sm:$0xff]  ;;  %v1061_v52 = vld [vmem:[#allocation2 + $0x490] sm:$0xff] }
 0x288   : > { %2638 = vst [vmem:[#allocation2 + $0x3c8] sm:$0xff] %v2382_v57  ;;  %2640 = vst [vmem:[#allocation2 + $0x3d8] sm:$0xff] %v2384_v58  ;;  %v2386_v1 = vadd.f32 %v1745_v63, %v1040_v55  ;;  %v2388_v2 = vadd.f32 %v2098_v0, %v1042_v56  ;;  %v1063_v57 = vld [vmem:[#allocation2 + $0x4a0] sm:$0xff]  ;;  %v1065_v58 = vld [vmem:[#allocation2 + $0x4b0] sm:$0xff] }
 0x289   : > { %2641 = vst [vmem:[#allocation2 + $0x3e0] sm:$0xff] %v2385_v61  ;;  %2643 = vst [vmem:[#allocation2 + $0x3f0] sm:$0xff] %v2387_v62  ;;  %v1064_v63 = vld [vmem:[#allocation2 + $0x4a8] sm:$0xff]  ;;  %v1066_v0 = vld [vmem:[#allocation2 + $0x4b8] sm:$0xff] }
 0x28a   : > { %2642 = vst [vmem:[#allocation2 + $0x3e8] sm:$0xff] %v2386_v1  ;;  %2644 = vst [vmem:[#allocation2 + $0x3f8] sm:$0xff] %v2388_v2 }
 0x28c   : > { %v1749_v7 = vpop.f32.mrb[64].mxu0  ;;  %v2102_v8 = vpop.f32.mrb[64].mxu1 }
 0x28d   : > { %v2389_v11 = vadd.f32 %v1749_v7, %v1043_v3  ;;  %v2391_v12 = vadd.f32 %v2102_v8, %v1045_v4  ;;  %v1751_v13 = vpop.f32.mrb[65].mxu0  ;;  %v2104_v14 = vpop.f32.mrb[65].mxu1 }
 0x28e   : > { %v2390_v17 = vadd.f32 %v1751_v13, %v1044_v5  ;;  %v2392_v18 = vadd.f32 %v2104_v14, %v1046_v6  ;;  %v1753_v19 = vpop.f32.mrb[66].mxu0  ;;  %v2106_v20 = vpop.f32.mrb[66].mxu1  ;;  %v1068_v13 = vld [vmem:[#allocation2 + $0x4c8] sm:$0xff]  ;;  %v1070_v14 = vld [vmem:[#allocation2 + $0x4d8] sm:$0xff] }
 0x28f   : > { %2645 = vst [vmem:[#allocation2 + $0x400] sm:$0xff] %v2389_v11  ;;  %2647 = vst [vmem:[#allocation2 + $0x410] sm:$0xff] %v2391_v12  ;;  %v2393_v21 = vadd.f32 %v1753_v19, %v1047_v9  ;;  %v2395_v22 = vadd.f32 %v2106_v20, %v1049_v10  ;;  %v1755_v23 = vpop.f32.mrb[67].mxu0  ;;  %v2108_v24 = vpop.f32.mrb[67].mxu1  ;;  %v1067_v11 = vld [vmem:[#allocation2 + $0x4c0] sm:$0xff]  ;;  %v1069_v12 = vld [vmem:[#allocation2 + $0x4d0] sm:$0xff] }
 0x290   : > { %2646 = vst [vmem:[#allocation2 + $0x408] sm:$0xff] %v2390_v17  ;;  %2648 = vst [vmem:[#allocation2 + $0x418] sm:$0xff] %v2392_v18  ;;  %v2394_v25 = vadd.f32 %v1755_v23, %v1048_v15  ;;  %v2396_v26 = vadd.f32 %v2108_v24, %v1050_v16  ;;  %v1071_v17 = vld [vmem:[#allocation2 + $0x4e0] sm:$0xff]  ;;  %v1073_v18 = vld [vmem:[#allocation2 + $0x4f0] sm:$0xff] }
 0x291   : > { %2649 = vst [vmem:[#allocation2 + $0x420] sm:$0xff] %v2393_v21  ;;  %2651 = vst [vmem:[#allocation2 + $0x430] sm:$0xff] %v2395_v22  ;;  %v1072_v23 = vld [vmem:[#allocation2 + $0x4e8] sm:$0xff]  ;;  %v1074_v24 = vld [vmem:[#allocation2 + $0x4f8] sm:$0xff] }
 0x292   : > { %2650 = vst [vmem:[#allocation2 + $0x428] sm:$0xff] %v2394_v25  ;;  %2652 = vst [vmem:[#allocation2 + $0x438] sm:$0xff] %v2396_v26 }
 0x294   : > { %v1759_v31 = vpop.f32.mrb[68].mxu0  ;;  %v2112_v32 = vpop.f32.mrb[68].mxu1 }
 0x295   : > { %v2397_v35 = vadd.f32 %v1759_v31, %v1051_v27  ;;  %v2399_v36 = vadd.f32 %v2112_v32, %v1053_v28  ;;  %v1761_v37 = vpop.f32.mrb[69].mxu0  ;;  %v2114_v38 = vpop.f32.mrb[69].mxu1 }
 0x296   : > { %v2398_v41 = vadd.f32 %v1761_v37, %v1052_v29  ;;  %v2400_v42 = vadd.f32 %v2114_v38, %v1054_v30  ;;  %v1763_v43 = vpop.f32.mrb[70].mxu0  ;;  %v2116_v44 = vpop.f32.mrb[70].mxu1  ;;  %v1076_v37 = vld [vmem:[#allocation2 + $0x508] sm:$0xff]  ;;  %v1078_v38 = vld [vmem:[#allocation2 + $0x518] sm:$0xff] }
 0x297   : > { %2653 = vst [vmem:[#allocation2 + $0x440] sm:$0xff] %v2397_v35  ;;  %2655 = vst [vmem:[#allocation2 + $0x450] sm:$0xff] %v2399_v36  ;;  %v2401_v45 = vadd.f32 %v1763_v43, %v1055_v33  ;;  %v2403_v46 = vadd.f32 %v2116_v44, %v1057_v34  ;;  %v1765_v47 = vpop.f32.mrb[71].mxu0  ;;  %v2118_v48 = vpop.f32.mrb[71].mxu1  ;;  %v1075_v35 = vld [vmem:[#allocation2 + $0x500] sm:$0xff]  ;;  %v1077_v36 = vld [vmem:[#allocation2 + $0x510] sm:$0xff] }
 0x298   : > { %2654 = vst [vmem:[#allocation2 + $0x448] sm:$0xff] %v2398_v41  ;;  %2656 = vst [vmem:[#allocation2 + $0x458] sm:$0xff] %v2400_v42  ;;  %v2402_v49 = vadd.f32 %v1765_v47, %v1056_v39  ;;  %v2404_v50 = vadd.f32 %v2118_v48, %v1058_v40  ;;  %v1079_v41 = vld [vmem:[#allocation2 + $0x520] sm:$0xff]  ;;  %v1081_v42 = vld [vmem:[#allocation2 + $0x530] sm:$0xff] }
 0x299   : > { %2657 = vst [vmem:[#allocation2 + $0x460] sm:$0xff] %v2401_v45  ;;  %2659 = vst [vmem:[#allocation2 + $0x470] sm:$0xff] %v2403_v46  ;;  %v1080_v47 = vld [vmem:[#allocation2 + $0x528] sm:$0xff]  ;;  %v1082_v48 = vld [vmem:[#allocation2 + $0x538] sm:$0xff] }
 0x29a   : > { %2658 = vst [vmem:[#allocation2 + $0x468] sm:$0xff] %v2402_v49  ;;  %2660 = vst [vmem:[#allocation2 + $0x478] sm:$0xff] %v2404_v50 }
 0x29c   : > { %v1769_v55 = vpop.f32.mrb[72].mxu0  ;;  %v2122_v56 = vpop.f32.mrb[72].mxu1 }
 0x29d   : > { %v2405_v59 = vadd.f32 %v1769_v55, %v1059_v51  ;;  %v2407_v60 = vadd.f32 %v2122_v56, %v1061_v52  ;;  %v1771_v61 = vpop.f32.mrb[73].mxu0  ;;  %v2124_v62 = vpop.f32.mrb[73].mxu1 }
 0x29e   : > { %v2406_v1 = vadd.f32 %v1771_v61, %v1060_v53  ;;  %v2408_v2 = vadd.f32 %v2124_v62, %v1062_v54  ;;  %v1773_v3 = vpop.f32.mrb[74].mxu0  ;;  %v2126_v4 = vpop.f32.mrb[74].mxu1  ;;  %v1084_v61 = vld [vmem:[#allocation2 + $0x548] sm:$0xff]  ;;  %v1086_v62 = vld [vmem:[#allocation2 + $0x558] sm:$0xff] }
 0x29f   : > { %2661 = vst [vmem:[#allocation2 + $0x480] sm:$0xff] %v2405_v59  ;;  %2663 = vst [vmem:[#allocation2 + $0x490] sm:$0xff] %v2407_v60  ;;  %v2409_v5 = vadd.f32 %v1773_v3, %v1063_v57  ;;  %v2411_v6 = vadd.f32 %v2126_v4, %v1065_v58  ;;  %v1775_v7 = vpop.f32.mrb[75].mxu0  ;;  %v2128_v8 = vpop.f32.mrb[75].mxu1  ;;  %v1083_v59 = vld [vmem:[#allocation2 + $0x540] sm:$0xff]  ;;  %v1085_v60 = vld [vmem:[#allocation2 + $0x550] sm:$0xff] }
 0x2a0   : > { %2662 = vst [vmem:[#allocation2 + $0x488] sm:$0xff] %v2406_v1  ;;  %2664 = vst [vmem:[#allocation2 + $0x498] sm:$0xff] %v2408_v2  ;;  %v2410_v9 = vadd.f32 %v1775_v7, %v1064_v63  ;;  %v2412_v10 = vadd.f32 %v2128_v8, %v1066_v0  ;;  %v1087_v1 = vld [vmem:[#allocation2 + $0x560] sm:$0xff]  ;;  %v1089_v2 = vld [vmem:[#allocation2 + $0x570] sm:$0xff] }
 0x2a1   : > { %2665 = vst [vmem:[#allocation2 + $0x4a0] sm:$0xff] %v2409_v5  ;;  %2667 = vst [vmem:[#allocation2 + $0x4b0] sm:$0xff] %v2411_v6  ;;  %v1088_v7 = vld [vmem:[#allocation2 + $0x568] sm:$0xff]  ;;  %v1090_v8 = vld [vmem:[#allocation2 + $0x578] sm:$0xff] }
 0x2a2   : > { %2666 = vst [vmem:[#allocation2 + $0x4a8] sm:$0xff] %v2410_v9  ;;  %2668 = vst [vmem:[#allocation2 + $0x4b8] sm:$0xff] %v2412_v10 }
 0x2a4   : > { %v1779_v15 = vpop.f32.mrb[76].mxu0  ;;  %v2132_v16 = vpop.f32.mrb[76].mxu1 }
 0x2a5   : > { %v2413_v19 = vadd.f32 %v1779_v15, %v1067_v11  ;;  %v2415_v20 = vadd.f32 %v2132_v16, %v1069_v12  ;;  %v1781_v21 = vpop.f32.mrb[77].mxu0  ;;  %v2134_v22 = vpop.f32.mrb[77].mxu1 }
 0x2a6   : > { %v2414_v25 = vadd.f32 %v1781_v21, %v1068_v13  ;;  %v2416_v26 = vadd.f32 %v2134_v22, %v1070_v14  ;;  %v1783_v27 = vpop.f32.mrb[78].mxu0  ;;  %v2136_v28 = vpop.f32.mrb[78].mxu1  ;;  %v1092_v21 = vld [vmem:[#allocation2 + $0x588] sm:$0xff]  ;;  %v1094_v22 = vld [vmem:[#allocation2 + $0x598] sm:$0xff] }
 0x2a7   : > { %2669 = vst [vmem:[#allocation2 + $0x4c0] sm:$0xff] %v2413_v19  ;;  %2671 = vst [vmem:[#allocation2 + $0x4d0] sm:$0xff] %v2415_v20  ;;  %v2417_v29 = vadd.f32 %v1783_v27, %v1071_v17  ;;  %v2419_v30 = vadd.f32 %v2136_v28, %v1073_v18  ;;  %v1785_v31 = vpop.f32.mrb[79].mxu0  ;;  %v2138_v32 = vpop.f32.mrb[79].mxu1  ;;  %v1091_v19 = vld [vmem:[#allocation2 + $0x580] sm:$0xff]  ;;  %v1093_v20 = vld [vmem:[#allocation2 + $0x590] sm:$0xff] }
 0x2a8   : > { %2670 = vst [vmem:[#allocation2 + $0x4c8] sm:$0xff] %v2414_v25  ;;  %2672 = vst [vmem:[#allocation2 + $0x4d8] sm:$0xff] %v2416_v26  ;;  %v2418_v33 = vadd.f32 %v1785_v31, %v1072_v23  ;;  %v2420_v34 = vadd.f32 %v2138_v32, %v1074_v24  ;;  %v1095_v25 = vld [vmem:[#allocation2 + $0x5a0] sm:$0xff]  ;;  %v1097_v26 = vld [vmem:[#allocation2 + $0x5b0] sm:$0xff] }
 0x2a9   : > { %2673 = vst [vmem:[#allocation2 + $0x4e0] sm:$0xff] %v2417_v29  ;;  %2675 = vst [vmem:[#allocation2 + $0x4f0] sm:$0xff] %v2419_v30  ;;  %v1096_v31 = vld [vmem:[#allocation2 + $0x5a8] sm:$0xff]  ;;  %v1098_v32 = vld [vmem:[#allocation2 + $0x5b8] sm:$0xff] }
 0x2aa   : > { %2674 = vst [vmem:[#allocation2 + $0x4e8] sm:$0xff] %v2418_v33  ;;  %2676 = vst [vmem:[#allocation2 + $0x4f8] sm:$0xff] %v2420_v34 }
 0x2ac   : > { %v1789_v39 = vpop.f32.mrb[80].mxu0  ;;  %v2142_v40 = vpop.f32.mrb[80].mxu1 }
 0x2ad   : > { %v2421_v43 = vadd.f32 %v1789_v39, %v1075_v35  ;;  %v2423_v44 = vadd.f32 %v2142_v40, %v1077_v36  ;;  %v1791_v45 = vpop.f32.mrb[81].mxu0  ;;  %v2144_v46 = vpop.f32.mrb[81].mxu1 }
 0x2ae   : > { %v2422_v49 = vadd.f32 %v1791_v45, %v1076_v37  ;;  %v2424_v50 = vadd.f32 %v2144_v46, %v1078_v38  ;;  %v1793_v51 = vpop.f32.mrb[82].mxu0  ;;  %v2146_v52 = vpop.f32.mrb[82].mxu1  ;;  %v1100_v45 = vld [vmem:[#allocation2 + $0x5c8] sm:$0xff]  ;;  %v1102_v46 = vld [vmem:[#allocation2 + $0x5d8] sm:$0xff] }
 0x2af   : > { %2677 = vst [vmem:[#allocation2 + $0x500] sm:$0xff] %v2421_v43  ;;  %2679 = vst [vmem:[#allocation2 + $0x510] sm:$0xff] %v2423_v44  ;;  %v2425_v53 = vadd.f32 %v1793_v51, %v1079_v41  ;;  %v2427_v54 = vadd.f32 %v2146_v52, %v1081_v42  ;;  %v1795_v55 = vpop.f32.mrb[83].mxu0  ;;  %v2148_v56 = vpop.f32.mrb[83].mxu1  ;;  %v1099_v43 = vld [vmem:[#allocation2 + $0x5c0] sm:$0xff]  ;;  %v1101_v44 = vld [vmem:[#allocation2 + $0x5d0] sm:$0xff] }
 0x2b0   : > { %2678 = vst [vmem:[#allocation2 + $0x508] sm:$0xff] %v2422_v49  ;;  %2680 = vst [vmem:[#allocation2 + $0x518] sm:$0xff] %v2424_v50  ;;  %v2426_v57 = vadd.f32 %v1795_v55, %v1080_v47  ;;  %v2428_v58 = vadd.f32 %v2148_v56, %v1082_v48  ;;  %v1103_v49 = vld [vmem:[#allocation2 + $0x5e0] sm:$0xff]  ;;  %v1105_v50 = vld [vmem:[#allocation2 + $0x5f0] sm:$0xff] }
 0x2b1   : > { %2681 = vst [vmem:[#allocation2 + $0x520] sm:$0xff] %v2425_v53  ;;  %2683 = vst [vmem:[#allocation2 + $0x530] sm:$0xff] %v2427_v54  ;;  %v1104_v55 = vld [vmem:[#allocation2 + $0x5e8] sm:$0xff]  ;;  %v1106_v56 = vld [vmem:[#allocation2 + $0x5f8] sm:$0xff] }
 0x2b2   : > { %2682 = vst [vmem:[#allocation2 + $0x528] sm:$0xff] %v2426_v57  ;;  %2684 = vst [vmem:[#allocation2 + $0x538] sm:$0xff] %v2428_v58 }
 0x2b4   : > { %v1799_v63 = vpop.f32.mrb[84].mxu0  ;;  %v2152_v0 = vpop.f32.mrb[84].mxu1 }
 0x2b5   : > { %v2429_v3 = vadd.f32 %v1799_v63, %v1083_v59  ;;  %v2431_v4 = vadd.f32 %v2152_v0, %v1085_v60  ;;  %v1801_v5 = vpop.f32.mrb[85].mxu0  ;;  %v2154_v6 = vpop.f32.mrb[85].mxu1 }
 0x2b6   : > { %v2430_v9 = vadd.f32 %v1801_v5, %v1084_v61  ;;  %v2432_v10 = vadd.f32 %v2154_v6, %v1086_v62  ;;  %v1803_v11 = vpop.f32.mrb[86].mxu0  ;;  %v2156_v12 = vpop.f32.mrb[86].mxu1  ;;  %v1108_v5 = vld [vmem:[#allocation2 + $0x608] sm:$0xff]  ;;  %v1110_v6 = vld [vmem:[#allocation2 + $0x618] sm:$0xff] }
 0x2b7   : > { %2685 = vst [vmem:[#allocation2 + $0x540] sm:$0xff] %v2429_v3  ;;  %2687 = vst [vmem:[#allocation2 + $0x550] sm:$0xff] %v2431_v4  ;;  %v2433_v13 = vadd.f32 %v1803_v11, %v1087_v1  ;;  %v2435_v14 = vadd.f32 %v2156_v12, %v1089_v2  ;;  %v1805_v15 = vpop.f32.mrb[87].mxu0  ;;  %v2158_v16 = vpop.f32.mrb[87].mxu1  ;;  %v1107_v3 = vld [vmem:[#allocation2 + $0x600] sm:$0xff]  ;;  %v1109_v4 = vld [vmem:[#allocation2 + $0x610] sm:$0xff] }
 0x2b8   : > { %2686 = vst [vmem:[#allocation2 + $0x548] sm:$0xff] %v2430_v9  ;;  %2688 = vst [vmem:[#allocation2 + $0x558] sm:$0xff] %v2432_v10  ;;  %v2434_v17 = vadd.f32 %v1805_v15, %v1088_v7  ;;  %v2436_v18 = vadd.f32 %v2158_v16, %v1090_v8  ;;  %v1111_v9 = vld [vmem:[#allocation2 + $0x620] sm:$0xff]  ;;  %v1113_v10 = vld [vmem:[#allocation2 + $0x630] sm:$0xff] }
 0x2b9   : > { %2689 = vst [vmem:[#allocation2 + $0x560] sm:$0xff] %v2433_v13  ;;  %2691 = vst [vmem:[#allocation2 + $0x570] sm:$0xff] %v2435_v14  ;;  %v1112_v15 = vld [vmem:[#allocation2 + $0x628] sm:$0xff]  ;;  %v1114_v16 = vld [vmem:[#allocation2 + $0x638] sm:$0xff] }
 0x2ba   : > { %2690 = vst [vmem:[#allocation2 + $0x568] sm:$0xff] %v2434_v17  ;;  %2692 = vst [vmem:[#allocation2 + $0x578] sm:$0xff] %v2436_v18 }
 0x2bc   : > { %v1809_v23 = vpop.f32.mrb[88].mxu0  ;;  %v2162_v24 = vpop.f32.mrb[88].mxu1 }
 0x2bd   : > { %v2437_v27 = vadd.f32 %v1809_v23, %v1091_v19  ;;  %v2439_v28 = vadd.f32 %v2162_v24, %v1093_v20  ;;  %v1811_v29 = vpop.f32.mrb[89].mxu0  ;;  %v2164_v30 = vpop.f32.mrb[89].mxu1 }
 0x2be   : > { %v2438_v33 = vadd.f32 %v1811_v29, %v1092_v21  ;;  %v2440_v34 = vadd.f32 %v2164_v30, %v1094_v22  ;;  %v1813_v35 = vpop.f32.mrb[90].mxu0  ;;  %v2166_v36 = vpop.f32.mrb[90].mxu1  ;;  %v1116_v29 = vld [vmem:[#allocation2 + $0x648] sm:$0xff]  ;;  %v1118_v30 = vld [vmem:[#allocation2 + $0x658] sm:$0xff] }
 0x2bf   : > { %2693 = vst [vmem:[#allocation2 + $0x580] sm:$0xff] %v2437_v27  ;;  %2695 = vst [vmem:[#allocation2 + $0x590] sm:$0xff] %v2439_v28  ;;  %v2441_v37 = vadd.f32 %v1813_v35, %v1095_v25  ;;  %v2443_v38 = vadd.f32 %v2166_v36, %v1097_v26  ;;  %v1815_v39 = vpop.f32.mrb[91].mxu0  ;;  %v2168_v40 = vpop.f32.mrb[91].mxu1  ;;  %v1115_v27 = vld [vmem:[#allocation2 + $0x640] sm:$0xff]  ;;  %v1117_v28 = vld [vmem:[#allocation2 + $0x650] sm:$0xff] }
 0x2c0   : > { %2694 = vst [vmem:[#allocation2 + $0x588] sm:$0xff] %v2438_v33  ;;  %2696 = vst [vmem:[#allocation2 + $0x598] sm:$0xff] %v2440_v34  ;;  %v2442_v41 = vadd.f32 %v1815_v39, %v1096_v31  ;;  %v2444_v42 = vadd.f32 %v2168_v40, %v1098_v32  ;;  %v1119_v33 = vld [vmem:[#allocation2 + $0x660] sm:$0xff]  ;;  %v1121_v34 = vld [vmem:[#allocation2 + $0x670] sm:$0xff] }
 0x2c1   : > { %2697 = vst [vmem:[#allocation2 + $0x5a0] sm:$0xff] %v2441_v37  ;;  %2699 = vst [vmem:[#allocation2 + $0x5b0] sm:$0xff] %v2443_v38  ;;  %v1120_v39 = vld [vmem:[#allocation2 + $0x668] sm:$0xff]  ;;  %v1122_v40 = vld [vmem:[#allocation2 + $0x678] sm:$0xff] }
 0x2c2   : > { %2698 = vst [vmem:[#allocation2 + $0x5a8] sm:$0xff] %v2442_v41  ;;  %2700 = vst [vmem:[#allocation2 + $0x5b8] sm:$0xff] %v2444_v42 }
 0x2c4   : > { %v1819_v47 = vpop.f32.mrb[92].mxu0  ;;  %v2172_v48 = vpop.f32.mrb[92].mxu1 }
 0x2c5   : > { %v2445_v51 = vadd.f32 %v1819_v47, %v1099_v43  ;;  %v2447_v52 = vadd.f32 %v2172_v48, %v1101_v44  ;;  %v1821_v53 = vpop.f32.mrb[93].mxu0  ;;  %v2174_v54 = vpop.f32.mrb[93].mxu1 }
 0x2c6   : > { %v2446_v57 = vadd.f32 %v1821_v53, %v1100_v45  ;;  %v2448_v58 = vadd.f32 %v2174_v54, %v1102_v46  ;;  %v1823_v59 = vpop.f32.mrb[94].mxu0  ;;  %v2176_v60 = vpop.f32.mrb[94].mxu1  ;;  %v1124_v53 = vld [vmem:[#allocation2 + $0x688] sm:$0xff]  ;;  %v1126_v54 = vld [vmem:[#allocation2 + $0x698] sm:$0xff] }
 0x2c7   : > { %2701 = vst [vmem:[#allocation2 + $0x5c0] sm:$0xff] %v2445_v51  ;;  %2703 = vst [vmem:[#allocation2 + $0x5d0] sm:$0xff] %v2447_v52  ;;  %v2449_v61 = vadd.f32 %v1823_v59, %v1103_v49  ;;  %v2451_v62 = vadd.f32 %v2176_v60, %v1105_v50  ;;  %v1825_v63 = vpop.f32.mrb[95].mxu0  ;;  %v2178_v0 = vpop.f32.mrb[95].mxu1  ;;  %v1123_v51 = vld [vmem:[#allocation2 + $0x680] sm:$0xff]  ;;  %v1125_v52 = vld [vmem:[#allocation2 + $0x690] sm:$0xff] }
 0x2c8   : > { %2702 = vst [vmem:[#allocation2 + $0x5c8] sm:$0xff] %v2446_v57  ;;  %2704 = vst [vmem:[#allocation2 + $0x5d8] sm:$0xff] %v2448_v58  ;;  %v2450_v1 = vadd.f32 %v1825_v63, %v1104_v55  ;;  %v2452_v2 = vadd.f32 %v2178_v0, %v1106_v56  ;;  %v1127_v57 = vld [vmem:[#allocation2 + $0x6a0] sm:$0xff]  ;;  %v1129_v58 = vld [vmem:[#allocation2 + $0x6b0] sm:$0xff] }
 0x2c9   : > { %2705 = vst [vmem:[#allocation2 + $0x5e0] sm:$0xff] %v2449_v61  ;;  %2707 = vst [vmem:[#allocation2 + $0x5f0] sm:$0xff] %v2451_v62  ;;  %v1128_v63 = vld [vmem:[#allocation2 + $0x6a8] sm:$0xff]  ;;  %v1130_v0 = vld [vmem:[#allocation2 + $0x6b8] sm:$0xff] }
 0x2ca   : > { %2706 = vst [vmem:[#allocation2 + $0x5e8] sm:$0xff] %v2450_v1  ;;  %2708 = vst [vmem:[#allocation2 + $0x5f8] sm:$0xff] %v2452_v2 }
 0x2cc   : > { %v1829_v7 = vpop.f32.mrb[96].mxu0  ;;  %v2182_v8 = vpop.f32.mrb[96].mxu1 }
 0x2cd   : > { %v2453_v11 = vadd.f32 %v1829_v7, %v1107_v3  ;;  %v2455_v12 = vadd.f32 %v2182_v8, %v1109_v4  ;;  %v1831_v13 = vpop.f32.mrb[97].mxu0  ;;  %v2184_v14 = vpop.f32.mrb[97].mxu1 }
 0x2ce   : > { %v2454_v17 = vadd.f32 %v1831_v13, %v1108_v5  ;;  %v2456_v18 = vadd.f32 %v2184_v14, %v1110_v6  ;;  %v1833_v19 = vpop.f32.mrb[98].mxu0  ;;  %v2186_v20 = vpop.f32.mrb[98].mxu1  ;;  %v1132_v13 = vld [vmem:[#allocation2 + $0x6c8] sm:$0xff]  ;;  %v1134_v14 = vld [vmem:[#allocation2 + $0x6d8] sm:$0xff] }
 0x2cf   : > { %2709 = vst [vmem:[#allocation2 + $0x600] sm:$0xff] %v2453_v11  ;;  %2711 = vst [vmem:[#allocation2 + $0x610] sm:$0xff] %v2455_v12  ;;  %v2457_v21 = vadd.f32 %v1833_v19, %v1111_v9  ;;  %v2459_v22 = vadd.f32 %v2186_v20, %v1113_v10  ;;  %v1835_v23 = vpop.f32.mrb[99].mxu0  ;;  %v2188_v24 = vpop.f32.mrb[99].mxu1  ;;  %v1131_v11 = vld [vmem:[#allocation2 + $0x6c0] sm:$0xff]  ;;  %v1133_v12 = vld [vmem:[#allocation2 + $0x6d0] sm:$0xff] }
 0x2d0   : > { %2710 = vst [vmem:[#allocation2 + $0x608] sm:$0xff] %v2454_v17  ;;  %2712 = vst [vmem:[#allocation2 + $0x618] sm:$0xff] %v2456_v18  ;;  %v2458_v25 = vadd.f32 %v1835_v23, %v1112_v15  ;;  %v2460_v26 = vadd.f32 %v2188_v24, %v1114_v16  ;;  %v1135_v17 = vld [vmem:[#allocation2 + $0x6e0] sm:$0xff]  ;;  %v1137_v18 = vld [vmem:[#allocation2 + $0x6f0] sm:$0xff] }
 0x2d1   : > { %2713 = vst [vmem:[#allocation2 + $0x620] sm:$0xff] %v2457_v21  ;;  %2715 = vst [vmem:[#allocation2 + $0x630] sm:$0xff] %v2459_v22  ;;  %v1136_v23 = vld [vmem:[#allocation2 + $0x6e8] sm:$0xff]  ;;  %v1138_v24 = vld [vmem:[#allocation2 + $0x6f8] sm:$0xff] }
 0x2d2   : > { %2714 = vst [vmem:[#allocation2 + $0x628] sm:$0xff] %v2458_v25  ;;  %2716 = vst [vmem:[#allocation2 + $0x638] sm:$0xff] %v2460_v26 }
 0x2d4   : > { %v1839_v31 = vpop.f32.mrb[100].mxu0  ;;  %v2192_v32 = vpop.f32.mrb[100].mxu1 }
 0x2d5   : > { %v2461_v35 = vadd.f32 %v1839_v31, %v1115_v27  ;;  %v2463_v36 = vadd.f32 %v2192_v32, %v1117_v28  ;;  %v1841_v37 = vpop.f32.mrb[101].mxu0  ;;  %v2194_v38 = vpop.f32.mrb[101].mxu1 }
 0x2d6   : > { %v2462_v41 = vadd.f32 %v1841_v37, %v1116_v29  ;;  %v2464_v42 = vadd.f32 %v2194_v38, %v1118_v30  ;;  %v1843_v43 = vpop.f32.mrb[102].mxu0  ;;  %v2196_v44 = vpop.f32.mrb[102].mxu1  ;;  %v1140_v37 = vld [vmem:[#allocation2 + $0x708] sm:$0xff]  ;;  %v1142_v38 = vld [vmem:[#allocation2 + $0x718] sm:$0xff] }
 0x2d7   : > { %2717 = vst [vmem:[#allocation2 + $0x640] sm:$0xff] %v2461_v35  ;;  %2719 = vst [vmem:[#allocation2 + $0x650] sm:$0xff] %v2463_v36  ;;  %v2465_v45 = vadd.f32 %v1843_v43, %v1119_v33  ;;  %v2467_v46 = vadd.f32 %v2196_v44, %v1121_v34  ;;  %v1845_v47 = vpop.f32.mrb[103].mxu0  ;;  %v2198_v48 = vpop.f32.mrb[103].mxu1  ;;  %v1139_v35 = vld [vmem:[#allocation2 + $0x700] sm:$0xff]  ;;  %v1141_v36 = vld [vmem:[#allocation2 + $0x710] sm:$0xff] }
 0x2d8   : > { %2718 = vst [vmem:[#allocation2 + $0x648] sm:$0xff] %v2462_v41  ;;  %2720 = vst [vmem:[#allocation2 + $0x658] sm:$0xff] %v2464_v42  ;;  %v2466_v49 = vadd.f32 %v1845_v47, %v1120_v39  ;;  %v2468_v50 = vadd.f32 %v2198_v48, %v1122_v40  ;;  %v1143_v41 = vld [vmem:[#allocation2 + $0x720] sm:$0xff]  ;;  %v1145_v42 = vld [vmem:[#allocation2 + $0x730] sm:$0xff] }
 0x2d9   : > { %2721 = vst [vmem:[#allocation2 + $0x660] sm:$0xff] %v2465_v45  ;;  %2723 = vst [vmem:[#allocation2 + $0x670] sm:$0xff] %v2467_v46  ;;  %v1144_v47 = vld [vmem:[#allocation2 + $0x728] sm:$0xff]  ;;  %v1146_v48 = vld [vmem:[#allocation2 + $0x738] sm:$0xff] }
 0x2da   : > { %2722 = vst [vmem:[#allocation2 + $0x668] sm:$0xff] %v2466_v49  ;;  %2724 = vst [vmem:[#allocation2 + $0x678] sm:$0xff] %v2468_v50 }
 0x2dc   : > { %v1849_v55 = vpop.f32.mrb[104].mxu0  ;;  %v2202_v56 = vpop.f32.mrb[104].mxu1 }
 0x2dd   : > { %v2469_v59 = vadd.f32 %v1849_v55, %v1123_v51  ;;  %v2471_v60 = vadd.f32 %v2202_v56, %v1125_v52  ;;  %v1851_v61 = vpop.f32.mrb[105].mxu0  ;;  %v2204_v62 = vpop.f32.mrb[105].mxu1 }
 0x2de   : > { %v2470_v1 = vadd.f32 %v1851_v61, %v1124_v53  ;;  %v2472_v2 = vadd.f32 %v2204_v62, %v1126_v54  ;;  %v1853_v3 = vpop.f32.mrb[106].mxu0  ;;  %v2206_v4 = vpop.f32.mrb[106].mxu1  ;;  %v1148_v61 = vld [vmem:[#allocation2 + $0x748] sm:$0xff]  ;;  %v1150_v62 = vld [vmem:[#allocation2 + $0x758] sm:$0xff] }
 0x2df   : > { %2725 = vst [vmem:[#allocation2 + $0x680] sm:$0xff] %v2469_v59  ;;  %2727 = vst [vmem:[#allocation2 + $0x690] sm:$0xff] %v2471_v60  ;;  %v2473_v5 = vadd.f32 %v1853_v3, %v1127_v57  ;;  %v2475_v6 = vadd.f32 %v2206_v4, %v1129_v58  ;;  %v1855_v7 = vpop.f32.mrb[107].mxu0  ;;  %v2208_v8 = vpop.f32.mrb[107].mxu1  ;;  %v1147_v59 = vld [vmem:[#allocation2 + $0x740] sm:$0xff]  ;;  %v1149_v60 = vld [vmem:[#allocation2 + $0x750] sm:$0xff] }
 0x2e0   : > { %2726 = vst [vmem:[#allocation2 + $0x688] sm:$0xff] %v2470_v1  ;;  %2728 = vst [vmem:[#allocation2 + $0x698] sm:$0xff] %v2472_v2  ;;  %v2474_v9 = vadd.f32 %v1855_v7, %v1128_v63  ;;  %v2476_v10 = vadd.f32 %v2208_v8, %v1130_v0  ;;  %v1151_v1 = vld [vmem:[#allocation2 + $0x760] sm:$0xff]  ;;  %v1153_v2 = vld [vmem:[#allocation2 + $0x770] sm:$0xff] }
 0x2e1   : > { %2729 = vst [vmem:[#allocation2 + $0x6a0] sm:$0xff] %v2473_v5  ;;  %2731 = vst [vmem:[#allocation2 + $0x6b0] sm:$0xff] %v2475_v6  ;;  %v1152_v7 = vld [vmem:[#allocation2 + $0x768] sm:$0xff]  ;;  %v1154_v8 = vld [vmem:[#allocation2 + $0x778] sm:$0xff] }
 0x2e2   : > { %2730 = vst [vmem:[#allocation2 + $0x6a8] sm:$0xff] %v2474_v9  ;;  %2732 = vst [vmem:[#allocation2 + $0x6b8] sm:$0xff] %v2476_v10 }
 0x2e4   : > { %v1859_v15 = vpop.f32.mrb[108].mxu0  ;;  %v2212_v16 = vpop.f32.mrb[108].mxu1 }
 0x2e5   : > { %v2477_v19 = vadd.f32 %v1859_v15, %v1131_v11  ;;  %v2479_v20 = vadd.f32 %v2212_v16, %v1133_v12  ;;  %v1861_v21 = vpop.f32.mrb[109].mxu0  ;;  %v2214_v22 = vpop.f32.mrb[109].mxu1 }
 0x2e6   : > { %v2478_v25 = vadd.f32 %v1861_v21, %v1132_v13  ;;  %v2480_v26 = vadd.f32 %v2214_v22, %v1134_v14  ;;  %v1863_v27 = vpop.f32.mrb[110].mxu0  ;;  %v2216_v28 = vpop.f32.mrb[110].mxu1  ;;  %v1156_v21 = vld [vmem:[#allocation2 + $0x788] sm:$0xff]  ;;  %v1158_v22 = vld [vmem:[#allocation2 + $0x798] sm:$0xff] }
 0x2e7   : > { %2733 = vst [vmem:[#allocation2 + $0x6c0] sm:$0xff] %v2477_v19  ;;  %2735 = vst [vmem:[#allocation2 + $0x6d0] sm:$0xff] %v2479_v20  ;;  %v2481_v29 = vadd.f32 %v1863_v27, %v1135_v17  ;;  %v2483_v30 = vadd.f32 %v2216_v28, %v1137_v18  ;;  %v1865_v31 = vpop.f32.mrb[111].mxu0  ;;  %v2218_v32 = vpop.f32.mrb[111].mxu1  ;;  %v1155_v19 = vld [vmem:[#allocation2 + $0x780] sm:$0xff]  ;;  %v1157_v20 = vld [vmem:[#allocation2 + $0x790] sm:$0xff] }
 0x2e8   : > { %2734 = vst [vmem:[#allocation2 + $0x6c8] sm:$0xff] %v2478_v25  ;;  %2736 = vst [vmem:[#allocation2 + $0x6d8] sm:$0xff] %v2480_v26  ;;  %v2482_v33 = vadd.f32 %v1865_v31, %v1136_v23  ;;  %v2484_v34 = vadd.f32 %v2218_v32, %v1138_v24  ;;  %v1159_v25 = vld [vmem:[#allocation2 + $0x7a0] sm:$0xff]  ;;  %v1161_v26 = vld [vmem:[#allocation2 + $0x7b0] sm:$0xff] }
 0x2e9   : > { %2737 = vst [vmem:[#allocation2 + $0x6e0] sm:$0xff] %v2481_v29  ;;  %2739 = vst [vmem:[#allocation2 + $0x6f0] sm:$0xff] %v2483_v30  ;;  %v1160_v31 = vld [vmem:[#allocation2 + $0x7a8] sm:$0xff]  ;;  %v1162_v32 = vld [vmem:[#allocation2 + $0x7b8] sm:$0xff] }
 0x2ea   : > { %2738 = vst [vmem:[#allocation2 + $0x6e8] sm:$0xff] %v2482_v33  ;;  %2740 = vst [vmem:[#allocation2 + $0x6f8] sm:$0xff] %v2484_v34 }
 0x2ec   : > { %v1869_v39 = vpop.f32.mrb[112].mxu0  ;;  %v2222_v40 = vpop.f32.mrb[112].mxu1 }
 0x2ed   : > { %v2485_v43 = vadd.f32 %v1869_v39, %v1139_v35  ;;  %v2487_v44 = vadd.f32 %v2222_v40, %v1141_v36  ;;  %v1871_v45 = vpop.f32.mrb[113].mxu0  ;;  %v2224_v46 = vpop.f32.mrb[113].mxu1 }
 0x2ee   : > { %v2486_v49 = vadd.f32 %v1871_v45, %v1140_v37  ;;  %v2488_v50 = vadd.f32 %v2224_v46, %v1142_v38  ;;  %v1873_v51 = vpop.f32.mrb[114].mxu0  ;;  %v2226_v52 = vpop.f32.mrb[114].mxu1  ;;  %v1164_v45 = vld [vmem:[#allocation2 + $0x7c8] sm:$0xff]  ;;  %v1166_v46 = vld [vmem:[#allocation2 + $0x7d8] sm:$0xff] }
 0x2ef   : > { %2741 = vst [vmem:[#allocation2 + $0x700] sm:$0xff] %v2485_v43  ;;  %2743 = vst [vmem:[#allocation2 + $0x710] sm:$0xff] %v2487_v44  ;;  %v2489_v53 = vadd.f32 %v1873_v51, %v1143_v41  ;;  %v2491_v54 = vadd.f32 %v2226_v52, %v1145_v42  ;;  %v1875_v55 = vpop.f32.mrb[115].mxu0  ;;  %v2228_v56 = vpop.f32.mrb[115].mxu1  ;;  %v1163_v43 = vld [vmem:[#allocation2 + $0x7c0] sm:$0xff]  ;;  %v1165_v44 = vld [vmem:[#allocation2 + $0x7d0] sm:$0xff] }
 0x2f0   : > { %2742 = vst [vmem:[#allocation2 + $0x708] sm:$0xff] %v2486_v49  ;;  %2744 = vst [vmem:[#allocation2 + $0x718] sm:$0xff] %v2488_v50  ;;  %v2490_v57 = vadd.f32 %v1875_v55, %v1144_v47  ;;  %v2492_v58 = vadd.f32 %v2228_v56, %v1146_v48  ;;  %v1167_v49 = vld [vmem:[#allocation2 + $0x7e0] sm:$0xff]  ;;  %v1169_v50 = vld [vmem:[#allocation2 + $0x7f0] sm:$0xff] }
 0x2f1   : > { %2745 = vst [vmem:[#allocation2 + $0x720] sm:$0xff] %v2489_v53  ;;  %2747 = vst [vmem:[#allocation2 + $0x730] sm:$0xff] %v2491_v54  ;;  %v1168_v55 = vld [vmem:[#allocation2 + $0x7e8] sm:$0xff]  ;;  %v1170_v56 = vld [vmem:[#allocation2 + $0x7f8] sm:$0xff] }
 0x2f2   : > { %2746 = vst [vmem:[#allocation2 + $0x728] sm:$0xff] %v2490_v57  ;;  %2748 = vst [vmem:[#allocation2 + $0x738] sm:$0xff] %v2492_v58 }
 0x2f4   : > { %v1879_v63 = vpop.f32.mrb[116].mxu0  ;;  %v2232_v0 = vpop.f32.mrb[116].mxu1 }
 0x2f5   : > { %v2493_v3 = vadd.f32 %v1879_v63, %v1147_v59  ;;  %v2495_v4 = vadd.f32 %v2232_v0, %v1149_v60  ;;  %v1881_v5 = vpop.f32.mrb[117].mxu0  ;;  %v2234_v6 = vpop.f32.mrb[117].mxu1 }
 0x2f6   : > { %v2494_v9 = vadd.f32 %v1881_v5, %v1148_v61  ;;  %v2496_v10 = vadd.f32 %v2234_v6, %v1150_v62  ;;  %v1883_v11 = vpop.f32.mrb[118].mxu0  ;;  %v2236_v12 = vpop.f32.mrb[118].mxu1  ;;  %v2785_v5 = vld [vmem:[#allocation2 + $0x40] sm:$0xff] (!%p5306_p11)  ;;  %v2786_v6 = vld [vmem:[#allocation2 + $0x48] sm:$0xff] (!%p5306_p11) }
 0x2f7   : > { %2749 = vst [vmem:[#allocation2 + $0x740] sm:$0xff] %v2493_v3  ;;  %2751 = vst [vmem:[#allocation2 + $0x750] sm:$0xff] %v2495_v4  ;;  %v2497_v13 = vadd.f32 %v1883_v11, %v1151_v1  ;;  %v2499_v14 = vadd.f32 %v2236_v12, %v1153_v2  ;;  %v1885_v15 = vpop.f32.mrb[119].mxu0  ;;  %v2238_v16 = vpop.f32.mrb[119].mxu1  ;;  %v3035_v3 = vlaneseq (!%p5306_p11)  ;;  %v3567_v12 = vld [vmem:[%s7985_s3] sm:$0xf] (!%p5306_p11) }
 0x2f8   : > { %2750 = vst [vmem:[#allocation2 + $0x748] sm:$0xff] %v2494_v9  ;;  %2752 = vst [vmem:[#allocation2 + $0x758] sm:$0xff] %v2496_v10  ;;  %v2498_v17 = vadd.f32 %v1885_v15, %v1152_v7  ;;  %v2500_v18 = vadd.f32 %v2238_v16, %v1154_v8  ;;  %v3033_v7 = vld [vmem:[%s7984_s2] sm:$0xf] (!%p5306_p11) }
 0x2f9   : > { %2753 = vst [vmem:[#allocation2 + $0x760] sm:$0xff] %v2497_v13  ;;  %2755 = vst [vmem:[#allocation2 + $0x770] sm:$0xff] %v2499_v14  ;;  %v3036_v4 = vshrl.u32 (!%p5306_p11), %v3035_v3, 7  ;;  %v2787_v13 = vld [vmem:[#allocation2 + $0x50] sm:$0xff] (!%p5306_p11)  ;;  %v2788_v14 = vld [vmem:[#allocation2 + $0x58] sm:$0xff] (!%p5306_p11) }
 0x2fa   : > { %2754 = vst [vmem:[#allocation2 + $0x768] sm:$0xff] %v2498_v17  ;;  %2756 = vst [vmem:[#allocation2 + $0x778] sm:$0xff] %v2500_v18  ;;  %v2777_v15 = vld [vmem:[#allocation2] sm:$0xff] (!%p5306_p11) }
 0x2fb   : > { %v3037_v8 = vsub.s32 (!%p5306_p11), 0, %v3036_v4  ;;  %v3041_v9 = vsub.s32 (!%p5306_p11), 1, %v3036_v4  ;;  %v3045_v10 = vsub.s32 (!%p5306_p11), 2, %v3036_v4  ;;  %v3049_v11 = vsub.s32 (!%p5306_p11), 3, %v3036_v4 }
 0x2fc   : > { %v1889_v23 = vpop.f32.mrb[120].mxu0  ;;  %v2242_v24 = vpop.f32.mrb[120].mxu1 }
 0x2fd   : > { %v2501_v27 = vadd.f32 %v1889_v23, %v1155_v19  ;;  %v2503_v28 = vadd.f32 %v2242_v24, %v1157_v20  ;;  %v1891_v29 = vpop.f32.mrb[121].mxu0  ;;  %v2244_v30 = vpop.f32.mrb[121].mxu1  ;;  %v6941_v16 = vrot.slane (!%p5306_p11), %v3033_v7, %v3037_v8  ;;  %v6943_v17 = vrot.slane (!%p5306_p11), %v3033_v7, %v3041_v9  ;;  %v2778_v20 = vld [vmem:[#allocation2 + $0x8] sm:$0xff] (!%p5306_p11) }
 0x2fe   : > { %v2502_v33 = vadd.f32 %v1891_v29, %v1156_v21  ;;  %v2504_v34 = vadd.f32 %v2244_v30, %v1158_v22  ;;  %v1893_v35 = vpop.f32.mrb[122].mxu0  ;;  %v2246_v36 = vpop.f32.mrb[122].mxu1  ;;  %v6945_v18 = vrot.slane (!%p5306_p11), %v3033_v7, %v3045_v10  ;;  %v6947_v19 = vrot.slane (!%p5306_p11), %v3033_v7, %v3049_v11  ;;  %v2779_v21 = vld [vmem:[#allocation2 + $0x10] sm:$0xff] (!%p5306_p11)  ;;  %v2780_v22 = vld [vmem:[#allocation2 + $0x18] sm:$0xff] (!%p5306_p11) }
 0x2ff   : > { %2757 = vst [vmem:[#allocation2 + $0x780] sm:$0xff] %v2501_v27  ;;  %2759 = vst [vmem:[#allocation2 + $0x790] sm:$0xff] %v2503_v28  ;;  %v2505_v37 = vadd.f32 %v1893_v35, %v1159_v25  ;;  %v2507_v38 = vadd.f32 %v2246_v36, %v1161_v26  ;;  %v1895_v39 = vpop.f32.mrb[123].mxu0  ;;  %v2248_v40 = vpop.f32.mrb[123].mxu1  ;;  %v6949_v23 = vrot.slane (!%p5306_p11), %v3567_v12, %v3037_v8 }
 0x300   : > { %2758 = vst [vmem:[#allocation2 + $0x788] sm:$0xff] %v2502_v33  ;;  %2760 = vst [vmem:[#allocation2 + $0x798] sm:$0xff] %v2504_v34  ;;  %v2506_v41 = vadd.f32 %v1895_v39, %v1160_v31  ;;  %v2508_v42 = vadd.f32 %v2248_v40, %v1162_v32  ;;  %v6951_v24 = vrot.slane (!%p5306_p11), %v3567_v12, %v3041_v9  ;;  %v2789_v39 = vld [vmem:[#allocation2 + $0x60] sm:$0xff] (!%p5306_p11) }
 0x301   : > { %2761 = vst [vmem:[#allocation2 + $0x7a0] sm:$0xff] %v2505_v37  ;;  %2763 = vst [vmem:[#allocation2 + $0x7b0] sm:$0xff] %v2507_v38  ;;  %v6953_v25 = vrot.slane (!%p5306_p11), %v3567_v12, %v3045_v10  ;;  %v6955_v26 = vrot.slane (!%p5306_p11), %v3567_v12, %v3049_v11  ;;  %v3063_v27 = vadd.f32 (!%p5306_p11), %v6941_v16, %v2785_v5  ;;  %v2797_v11 = vld [vmem:[#allocation2 + $0xa0] sm:$0xff] (!%p5306_p11) }
 0x302   : > { %2762 = vst [vmem:[#allocation2 + $0x7a8] sm:$0xff] %v2506_v41  ;;  %2764 = vst [vmem:[#allocation2 + $0x7b8] sm:$0xff] %v2508_v42  ;;  %v3064_v28 = vadd.f32 (!%p5306_p11), %v6943_v17, %v2786_v6  ;;  %v3065_v29 = vadd.f32 (!%p5306_p11), %v6945_v18, %v2787_v13  ;;  %v3066_v30 = vadd.f32 (!%p5306_p11), %v6947_v19, %v2788_v14 }
 0x303   : > { %v3055_v31 = vadd.f32 (!%p5306_p11), %v6941_v16, %v2777_v15  ;;  %v3056_v32 = vadd.f32 (!%p5306_p11), %v6943_v17, %v2778_v20  ;;  %v3057_v33 = vadd.f32 (!%p5306_p11), %v6945_v18, %v2779_v21  ;;  %v3058_v34 = vadd.f32 (!%p5306_p11), %v6947_v19, %v2780_v22  ;;  %v2798_v20 = vld [vmem:[#allocation2 + $0xa8] sm:$0xff] (!%p5306_p11)  ;;  %v2799_v21 = vld [vmem:[#allocation2 + $0xb0] sm:$0xff] (!%p5306_p11) }
 0x304   : > { %v1899_v47 = vpop.f32.mrb[124].mxu0  ;;  %v2252_v48 = vpop.f32.mrb[124].mxu1  ;;  %2776 = sbr.rel (%p5306_p11) target bundleno = 1190 (0x4a6), region = 78  ;;  %v3319_v35 = vmax.f32 (!%p5306_p11), %v3063_v27, 0.0  ;;  %v3320_v36 = vmax.f32 (!%p5306_p11), %v3064_v28, 0.0  ;;  %v3321_v37 = vmax.f32 (!%p5306_p11), %v3065_v29, 0.0 }
 0x305   : > { %v2509_v51 = vadd.f32 %v1899_v47, %v1163_v43  ;;  %v2511_v52 = vadd.f32 %v2252_v48, %v1165_v44  ;;  %v1901_v53 = vpop.f32.mrb[125].mxu0  ;;  %v2254_v54 = vpop.f32.mrb[125].mxu1  ;;  %v3322_v38 = vmax.f32 (!%p5306_p11), %v3066_v30, 0.0  ;;  %v3311_v40 = vmax.f32 (!%p5306_p11), %v3055_v31, 0.0  ;;  %v2790_v44 = vld [vmem:[#allocation2 + $0x68] sm:$0xff] (!%p5306_p11)  ;;  %v2800_v30 = vld [vmem:[#allocation2 + $0xb8] sm:$0xff] (!%p5306_p11) }
 0x306   : > { %v2510_v57 = vadd.f32 %v1901_v53, %v1164_v45  ;;  %v2512_v58 = vadd.f32 %v2254_v54, %v1166_v46  ;;  %v1903_v59 = vpop.f32.mrb[126].mxu0  ;;  %v2256_v60 = vpop.f32.mrb[126].mxu1  ;;  %v3312_v41 = vmax.f32 (!%p5306_p11), %v3056_v32, 0.0  ;;  %v3313_v42 = vmax.f32 (!%p5306_p11), %v3057_v33, 0.0  ;;  %v2791_v45 = vld [vmem:[#allocation2 + $0x70] sm:$0xff] (!%p5306_p11) }
 0x307   : > { %2765 = vst [vmem:[#allocation2 + $0x7c0] sm:$0xff] %v2509_v51  ;;  %2767 = vst [vmem:[#allocation2 + $0x7d0] sm:$0xff] %v2511_v52  ;;  %v2513_v61 = vadd.f32 %v1903_v59, %v1167_v49  ;;  %v2515_v62 = vadd.f32 %v2256_v60, %v1169_v50  ;;  %v1905_v63 = vpop.f32.mrb[127].mxu0  ;;  %v2258_v0 = vpop.f32.mrb[127].mxu1  ;;  %v3314_v43 = vmax.f32 (!%p5306_p11), %v3058_v34, 0.0  ;;  %v3597_v46 = vmul.f32 (!%p5306_p11), %v6949_v23, %v3319_v35  ;;  %v2792_v50 = vld [vmem:[#allocation2 + $0x78] sm:$0xff] (!%p5306_p11) }
 0x308   : > { %2766 = vst [vmem:[#allocation2 + $0x7c8] sm:$0xff] %v2510_v57  ;;  %2768 = vst [vmem:[#allocation2 + $0x7d8] sm:$0xff] %v2512_v58  ;;  %v2514_v1 = vadd.f32 %v1905_v63, %v1168_v55  ;;  %v2516_v2 = vadd.f32 %v2258_v0, %v1170_v56  ;;  %v3598_v47 = vmul.f32 (!%p5306_p11), %v6951_v24, %v3320_v36  ;;  %v2781_v51 = vld [vmem:[#allocation2 + $0x20] sm:$0xff] (!%p5306_p11)  ;;  %v2782_v52 = vld [vmem:[#allocation2 + $0x28] sm:$0xff] (!%p5306_p11) }
 0x309   : > { %2769 = vst [vmem:[#allocation2 + $0x7e0] sm:$0xff] %v2513_v61  ;;  %2771 = vst [vmem:[#allocation2 + $0x7f0] sm:$0xff] %v2515_v62  ;;  %v3599_v48 = vmul.f32 (!%p5306_p11), %v6953_v25, %v3321_v37  ;;  %v3600_v49 = vmul.f32 (!%p5306_p11), %v6955_v26, %v3322_v38  ;;  %v3589_v53 = vmul.f32 (!%p5306_p11), %v6949_v23, %v3311_v40  ;;  %v2783_v61 = vld [vmem:[#allocation2 + $0x30] sm:$0xff] (!%p5306_p11)  ;;  %v2784_v62 = vld [vmem:[#allocation2 + $0x38] sm:$0xff] (!%p5306_p11) }
 0x30a   : > { %2770 = vst [vmem:[#allocation2 + $0x7e8] sm:$0xff] %v2514_v1  ;;  %2772 = vst [vmem:[#allocation2 + $0x7f8] sm:$0xff] %v2516_v2  ;;  %v3590_v54 = vmul.f32 (!%p5306_p11), %v6951_v24, %v3312_v41  ;;  %v3591_v55 = vmul.f32 (!%p5306_p11), %v6953_v25, %v3313_v42  ;;  %v3592_v56 = vmul.f32 (!%p5306_p11), %v6955_v26, %v3314_v43  ;;  %v2794_v40 = vld [vmem:[#allocation2 + $0x88] sm:$0xff] (!%p5306_p11) }
 0x30b   : > { %v3855_v57 = vadd.f32 %v3598_v47, %v3597_v46  ;;  %v3067_v58 = vadd.f32 %v6941_v16, %v2789_v39  ;;  %v3068_v59 = vadd.f32 %v6943_v17, %v2790_v44  ;;  %v3069_v60 = vadd.f32 %v6945_v18, %v2791_v45  ;;  %v2793_v39 = vld [vmem:[#allocation2 + $0x80] sm:$0xff] }
 0x30c   : > { %v3845_v63 = vadd.f32 %v3590_v54, %v3589_v53  ;;  %v3070_v0 = vadd.f32 %v6947_v19, %v2792_v50  ;;  %v3059_v1 = vadd.f32 %v6941_v16, %v2781_v51  ;;  %v3060_v2 = vadd.f32 %v6943_v17, %v2782_v52  ;;  %v2796_v50 = vld [vmem:[#allocation2 + $0x98] sm:$0xff] }
 0x30d   : > { %v3856_v3 = vadd.f32 %v3855_v57, %v3599_v48  ;;  %v3323_v4 = vmax.f32 %v3067_v58, 0.0  ;;  %v3324_v5 = vmax.f32 %v3068_v59, 0.0  ;;  %v3325_v6 = vmax.f32 %v3069_v60, 0.0  ;;  %v2806_v60 = vld [vmem:[#allocation2 + $0xe8] sm:$0xff] }
 0x30e   : > { %v3846_v7 = vadd.f32 %v3845_v63, %v3591_v55  ;;  %v3326_v8 = vmax.f32 %v3070_v0, 0.0  ;;  %v3061_v9 = vadd.f32 %v6945_v18, %v2783_v61  ;;  %v3062_v10 = vadd.f32 %v6947_v19, %v2784_v62  ;;  %v2805_v55 = vld [vmem:[#allocation2 + $0xe0] sm:$0xff] }
 0x30f   : > { %v3857_v12 = vadd.f32 %v3856_v3, %v3600_v49  ;;  %v3601_v13 = vmul.f32 %v6949_v23, %v3323_v4  ;;  %v3602_v14 = vmul.f32 %v6951_v24, %v3324_v5  ;;  %v3603_v15 = vmul.f32 %v6953_v25, %v3325_v6  ;;  %v2795_v49 = vld [vmem:[#allocation2 + $0x90] sm:$0xff] }
 0x310   : > { %v3847_v22 = vadd.f32 %v3846_v7, %v3592_v56  ;;  %v3604_v27 = vmul.f32 %v6955_v26, %v3326_v8  ;;  %v3315_v28 = vmax.f32 %v3059_v1, 0.0  ;;  %v3316_v29 = vmax.f32 %v3060_v2, 0.0  ;;  %v2807_v1 = vld [vmem:[#allocation2 + $0xf0] sm:$0xff]  ;;  %v2808_v2 = vld [vmem:[#allocation2 + $0xf8] sm:$0xff] }
 0x311   : > { %3858 = vadd.xlane.f32.xlu1 %v3857_v12  ;;  %v3860_v31 = vadd.f32 %v3602_v14, %v3601_v13  ;;  %v3317_v32 = vmax.f32 %v3061_v9, 0.0  ;;  %v3318_v33 = vmax.f32 %v3062_v10, 0.0  ;;  %v3075_v34 = vadd.f32 %v6941_v16, %v2797_v11 }
 0x312   : > { %3848 = vadd.xlane.f32.xlu0 %v3847_v22  ;;  %v3593_v35 = vmul.f32 %v6949_v23, %v3315_v28  ;;  %v3594_v36 = vmul.f32 %v6951_v24, %v3316_v29  ;;  %v3076_v37 = vadd.f32 %v6943_v17, %v2798_v20  ;;  %v3077_v38 = vadd.f32 %v6945_v18, %v2799_v21  ;;  %v2802_v20 = vld [vmem:[#allocation2 + $0xc8] sm:$0xff]  ;;  %v2803_v29 = vld [vmem:[#allocation2 + $0xd0] sm:$0xff] }
 0x313   : > { %v3861_v41 = vadd.f32 %v3860_v31, %v3603_v15  ;;  %v3595_v42 = vmul.f32 %v6953_v25, %v3317_v32  ;;  %v3596_v43 = vmul.f32 %v6955_v26, %v3318_v33  ;;  %v3078_v44 = vadd.f32 %v6947_v19, %v2800_v30  ;;  %v2801_v15 = vld [vmem:[#allocation2 + $0xc0] sm:$0xff] }
 0x314   : > { %v3850_v45 = vadd.f32 %v3594_v36, %v3593_v35  ;;  %v3331_v46 = vmax.f32 %v3075_v34, 0.0  ;;  %v3332_v47 = vmax.f32 %v3076_v37, 0.0  ;;  %v3333_v48 = vmax.f32 %v3077_v38, 0.0  ;;  %v2804_v34 = vld [vmem:[#allocation2 + $0xd8] sm:$0xff] }
 0x315   : > { %v3862_v51 = vadd.f32 %v3861_v41, %v3604_v27  ;;  %v3334_v52 = vmax.f32 %v3078_v44, 0.0  ;;  %v3071_v53 = vadd.f32 %v6941_v16, %v2793_v39  ;;  %v3072_v54 = vadd.f32 %v6943_v17, %v2794_v40  ;;  %v2813_v39 = vld [vmem:[#allocation2 + $0x120] sm:$0xff]  ;;  %v2814_v40 = vld [vmem:[#allocation2 + $0x128] sm:$0xff] }
 0x316   : > { %v3851_v56 = vadd.f32 %v3850_v45, %v3595_v42  ;;  %v3609_v57 = vmul.f32 %v6949_v23, %v3331_v46  ;;  %v3610_v58 = vmul.f32 %v6951_v24, %v3332_v47  ;;  %v3611_v59 = vmul.f32 %v6953_v25, %v3333_v48 }
 0x317   : > { %3863 = vadd.xlane.f32.xlu1 %v3862_v51  ;;  %v3612_v61 = vmul.f32 %v6955_v26, %v3334_v52  ;;  %v3073_v62 = vadd.f32 %v6945_v18, %v2795_v49  ;;  %v3074_v63 = vadd.f32 %v6947_v19, %v2796_v50  ;;  %v3327_v0 = vmax.f32 %v3071_v53, 0.0  ;;  %v2815_v49 = vld [vmem:[#allocation2 + $0x130] sm:$0xff]  ;;  %v2816_v50 = vld [vmem:[#allocation2 + $0x138] sm:$0xff] }
 0x318   : > { %v3852_v3 = vadd.f32 %v3851_v56, %v3596_v43  ;;  %v3870_v4 = vadd.f32 %v3610_v58, %v3609_v57  ;;  %v3328_v5 = vmax.f32 %v3072_v54, 0.0  ;;  %v3083_v6 = vadd.f32 %v6941_v16, %v2805_v55 }
 0x319   : > { %v3329_v7 = vmax.f32 %v3073_v62, 0.0  ;;  %v3330_v8 = vmax.f32 %v3074_v63, 0.0  ;;  %v3605_v9 = vmul.f32 %v6949_v23, %v3327_v0  ;;  %v3084_v10 = vadd.f32 %v6943_v17, %v2806_v60  ;;  %v2810_v0 = vld [vmem:[#allocation2 + $0x108] sm:$0xff] }
 0x31a   : > { %3853 = vadd.xlane.f32.xlu0 %v3852_v3  ;;  %v3871_v11 = vadd.f32 %v3870_v4, %v3611_v59  ;;  %v3606_v12 = vmul.f32 %v6951_v24, %v3328_v5  ;;  %v3085_v13 = vadd.f32 %v6945_v18, %v2807_v1  ;;  %v3086_v14 = vadd.f32 %v6947_v19, %v2808_v2  ;;  %v2809_v59 = vld [vmem:[#allocation2 + $0x100] sm:$0xff]  ;;  %v2811_v1 = vld [vmem:[#allocation2 + $0x110] sm:$0xff] }
 0x31b   : > { %v3607_v21 = vmul.f32 %v6953_v25, %v3329_v7  ;;  %v3608_v22 = vmul.f32 %v6955_v26, %v3330_v8  ;;  %v3339_v27 = vmax.f32 %v3083_v6, 0.0  ;;  %v3340_v28 = vmax.f32 %v3084_v10, 0.0  ;;  %v2812_v6 = vld [vmem:[#allocation2 + $0x118] sm:$0xff] }
 0x31c   : > { %v3872_v30 = vadd.f32 %v3871_v11, %v3612_v61  ;;  %v3865_v31 = vadd.f32 %v3606_v12, %v3605_v9  ;;  %v3341_v32 = vmax.f32 %v3085_v13, 0.0  ;;  %v3342_v33 = vmax.f32 %v3086_v14, 0.0 }
 0x31d   : > { %v3617_v35 = vmul.f32 %v6949_v23, %v3339_v27  ;;  %v3618_v36 = vmul.f32 %v6951_v24, %v3340_v28  ;;  %v3079_v37 = vadd.f32 %v6941_v16, %v2801_v15  ;;  %v3080_v38 = vadd.f32 %v6943_v17, %v2802_v20  ;;  %v2821_v15 = vld [vmem:[#allocation2 + $0x160] sm:$0xff]  ;;  %v2822_v20 = vld [vmem:[#allocation2 + $0x168] sm:$0xff] }
 0x31e   : > { %3873 = vadd.xlane.f32.xlu1 %v3872_v30  ;;  %v3866_v41 = vadd.f32 %v3865_v31, %v3607_v21  ;;  %v3619_v42 = vmul.f32 %v6953_v25, %v3341_v32  ;;  %v3620_v43 = vmul.f32 %v6955_v26, %v3342_v33  ;;  %v3081_v44 = vadd.f32 %v6945_v18, %v2803_v29  ;;  %v2823_v29 = vld [vmem:[#allocation2 + $0x170] sm:$0xff] }
 0x31f   : > { %v3880_v45 = vadd.f32 %v3618_v36, %v3617_v35  ;;  %v3082_v46 = vadd.f32 %v6947_v19, %v2804_v34  ;;  %v3335_v47 = vmax.f32 %v3079_v37, 0.0  ;;  %v3336_v48 = vmax.f32 %v3080_v38, 0.0  ;;  %v2824_v34 = vld [vmem:[#allocation2 + $0x178] sm:$0xff] }
 0x320   : > { %v3867_v51 = vadd.f32 %v3866_v41, %v3608_v22  ;;  %v3337_v52 = vmax.f32 %v3081_v44, 0.0  ;;  %v3091_v53 = vadd.f32 %v6941_v16, %v2813_v39  ;;  %v3092_v54 = vadd.f32 %v6943_v17, %v2814_v40  ;;  %v2817_v39 = vld [vmem:[#allocation2 + $0x140] sm:$0xff]  ;;  %v2818_v44 = vld [vmem:[#allocation2 + $0x148] sm:$0xff] }
 0x321   : > { %v3881_v55 = vadd.f32 %v3880_v45, %v3619_v42  ;;  %v3338_v56 = vmax.f32 %v3082_v46, 0.0  ;;  %v3613_v57 = vmul.f32 %v6949_v23, %v3335_v47  ;;  %v3614_v58 = vmul.f32 %v6951_v24, %v3336_v48 }
 0x322   : > { %3868 = vadd.xlane.f32.xlu0 %v3867_v51  ;;  %v3615_v60 = vmul.f32 %v6953_v25, %v3337_v52  ;;  %v3093_v61 = vadd.f32 %v6945_v18, %v2815_v49  ;;  %v3094_v62 = vadd.f32 %v6947_v19, %v2816_v50  ;;  %v3347_v63 = vmax.f32 %v3091_v53, 0.0  ;;  %v2819_v49 = vld [vmem:[#allocation2 + $0x150] sm:$0xff]  ;;  %v2820_v50 = vld [vmem:[#allocation2 + $0x158] sm:$0xff] }
 0x323   : > { %v3882_v2 = vadd.f32 %v3881_v55, %v3620_v43  ;;  %v3616_v3 = vmul.f32 %v6955_v26, %v3338_v56  ;;  %v3875_v4 = vadd.f32 %v3614_v58, %v3613_v57  ;;  %v3348_v5 = vmax.f32 %v3092_v54, 0.0 }
 0x324   : > { %v3349_v7 = vmax.f32 %v3093_v61, 0.0  ;;  %v3350_v8 = vmax.f32 %v3094_v62, 0.0  ;;  %v3625_v9 = vmul.f32 %v6949_v23, %v3347_v63  ;;  %v3087_v10 = vadd.f32 %v6941_v16, %v2809_v59  ;;  %v2829_v59 = vld [vmem:[#allocation2 + $0x1a0] sm:$0xff] }
 0x325   : > { %3883 = vadd.xlane.f32.xlu1 %v3882_v2  ;;  %v3876_v11 = vadd.f32 %v3875_v4, %v3615_v60  ;;  %v3626_v12 = vmul.f32 %v6951_v24, %v3348_v5  ;;  %v3088_v13 = vadd.f32 %v6943_v17, %v2810_v0  ;;  %v3089_v14 = vadd.f32 %v6945_v18, %v2811_v1  ;;  %v2830_v0 = vld [vmem:[#allocation2 + $0x1a8] sm:$0xff]  ;;  %v2831_v5 = vld [vmem:[#allocation2 + $0x1b0] sm:$0xff] }
 0x326   : > { %v3627_v21 = vmul.f32 %v6953_v25, %v3349_v7  ;;  %v3628_v22 = vmul.f32 %v6955_v26, %v3350_v8  ;;  %v3090_v27 = vadd.f32 %v6947_v19, %v2812_v6  ;;  %v3343_v28 = vmax.f32 %v3087_v10, 0.0  ;;  %v2832_v6 = vld [vmem:[#allocation2 + $0x1b8] sm:$0xff] }
 0x327   : > { %v3877_v30 = vadd.f32 %v3876_v11, %v3616_v3  ;;  %v3890_v31 = vadd.f32 %v3626_v12, %v3625_v9  ;;  %v3344_v32 = vmax.f32 %v3088_v13, 0.0  ;;  %v3345_v33 = vmax.f32 %v3089_v14, 0.0 }
 0x328   : > { %v3346_v35 = vmax.f32 %v3090_v27, 0.0  ;;  %v3621_v36 = vmul.f32 %v6949_v23, %v3343_v28  ;;  %v3099_v37 = vadd.f32 %v6941_v16, %v2821_v15  ;;  %v3100_v38 = vadd.f32 %v6943_v17, %v2822_v20  ;;  %v2825_v15 = vld [vmem:[#allocation2 + $0x180] sm:$0xff]  ;;  %v2826_v20 = vld [vmem:[#allocation2 + $0x188] sm:$0xff] }
 0x329   : > { %3878 = vadd.xlane.f32.xlu0 %v3877_v30  ;;  %v3891_v40 = vadd.f32 %v3890_v31, %v3627_v21  ;;  %v3622_v41 = vmul.f32 %v6951_v24, %v3344_v32  ;;  %v3623_v42 = vmul.f32 %v6953_v25, %v3345_v33  ;;  %v3101_v43 = vadd.f32 %v6945_v18, %v2823_v29  ;;  %v2827_v29 = vld [vmem:[#allocation2 + $0x190] sm:$0xff] }
 0x32a   : > { %v3624_v45 = vmul.f32 %v6955_v26, %v3346_v35  ;;  %v3102_v46 = vadd.f32 %v6947_v19, %v2824_v34  ;;  %v3355_v47 = vmax.f32 %v3099_v37, 0.0  ;;  %v3356_v48 = vmax.f32 %v3100_v38, 0.0  ;;  %v2828_v34 = vld [vmem:[#allocation2 + $0x198] sm:$0xff] }
 0x32b   : > { %v3892_v51 = vadd.f32 %v3891_v40, %v3628_v22  ;;  %v3885_v52 = vadd.f32 %v3622_v41, %v3621_v36  ;;  %v3357_v53 = vmax.f32 %v3101_v43, 0.0  ;;  %v3095_v54 = vadd.f32 %v6941_v16, %v2817_v39  ;;  %v2837_v43 = vld [vmem:[#allocation2 + $0x1e0] sm:$0xff] }
 0x32c   : > { %v3358_v55 = vmax.f32 %v3102_v46, 0.0  ;;  %v3633_v56 = vmul.f32 %v6949_v23, %v3355_v47  ;;  %v3634_v57 = vmul.f32 %v6951_v24, %v3356_v48  ;;  %v3096_v58 = vadd.f32 %v6943_v17, %v2818_v44  ;;  %v2838_v44 = vld [vmem:[#allocation2 + $0x1e8] sm:$0xff] }
 0x32d   : > { %3893 = vadd.xlane.f32.xlu1 %v3892_v51  ;;  %v3886_v60 = vadd.f32 %v3885_v52, %v3623_v42  ;;  %v3635_v61 = vmul.f32 %v6953_v25, %v3357_v53  ;;  %v3097_v62 = vadd.f32 %v6945_v18, %v2819_v49  ;;  %v3098_v63 = vadd.f32 %v6947_v19, %v2820_v50  ;;  %v2839_v49 = vld [vmem:[#allocation2 + $0x1f0] sm:$0xff] }
 0x32e   : > { %v3636_v1 = vmul.f32 %v6955_v26, %v3358_v55  ;;  %v3900_v2 = vadd.f32 %v3634_v57, %v3633_v56  ;;  %v3351_v3 = vmax.f32 %v3095_v54, 0.0  ;;  %v3352_v4 = vmax.f32 %v3096_v58, 0.0  ;;  %v2840_v54 = vld [vmem:[#allocation2 + $0x1f8] sm:$0xff] }
 0x32f   : > { %v3887_v7 = vadd.f32 %v3886_v60, %v3624_v45  ;;  %v3353_v8 = vmax.f32 %v3097_v62, 0.0  ;;  %v3354_v9 = vmax.f32 %v3098_v63, 0.0  ;;  %v3107_v10 = vadd.f32 %v6941_v16, %v2829_v59  ;;  %v2833_v59 = vld [vmem:[#allocation2 + $0x1c0] sm:$0xff] }
 0x330   : > { %v3901_v11 = vadd.f32 %v3900_v2, %v3635_v61  ;;  %v3629_v12 = vmul.f32 %v6949_v23, %v3351_v3  ;;  %v3630_v13 = vmul.f32 %v6951_v24, %v3352_v4  ;;  %v3108_v14 = vadd.f32 %v6943_v17, %v2830_v0  ;;  %v2834_v0 = vld [vmem:[#allocation2 + $0x1c8] sm:$0xff] }
 0x331   : > { %3888 = vadd.xlane.f32.xlu0 %v3887_v7  ;;  %v3631_v21 = vmul.f32 %v6953_v25, %v3353_v8  ;;  %v3632_v22 = vmul.f32 %v6955_v26, %v3354_v9  ;;  %v3109_v27 = vadd.f32 %v6945_v18, %v2831_v5  ;;  %v3110_v28 = vadd.f32 %v6947_v19, %v2832_v6  ;;  %v2835_v5 = vld [vmem:[#allocation2 + $0x1d0] sm:$0xff]  ;;  %v2836_v6 = vld [vmem:[#allocation2 + $0x1d8] sm:$0xff] }
 0x332   : > { %v3902_v30 = vadd.f32 %v3901_v11, %v3636_v1  ;;  %v3895_v31 = vadd.f32 %v3630_v13, %v3629_v12  ;;  %v3363_v32 = vmax.f32 %v3107_v10, 0.0  ;;  %v3364_v33 = vmax.f32 %v3108_v14, 0.0 }
 0x333   : > { %v3365_v35 = vmax.f32 %v3109_v27, 0.0  ;;  %v3366_v36 = vmax.f32 %v3110_v28, 0.0  ;;  %v3103_v37 = vadd.f32 %v6941_v16, %v2825_v15  ;;  %v3104_v38 = vadd.f32 %v6943_v17, %v2826_v20  ;;  %v2845_v15 = vld [vmem:[#allocation2 + $0x220] sm:$0xff]  ;;  %v2846_v28 = vld [vmem:[#allocation2 + $0x228] sm:$0xff] }
 0x334   : > { %3903 = vadd.xlane.f32.xlu1 %v3902_v30  ;;  %v3896_v39 = vadd.f32 %v3895_v31, %v3631_v21  ;;  %v3641_v40 = vmul.f32 %v6949_v23, %v3363_v32  ;;  %v3642_v41 = vmul.f32 %v6951_v24, %v3364_v33  ;;  %v3105_v42 = vadd.f32 %v6945_v18, %v2827_v29  ;;  %v2847_v33 = vld [vmem:[#allocation2 + $0x230] sm:$0xff] }
 0x335   : > { %v3643_v45 = vmul.f32 %v6953_v25, %v3365_v35  ;;  %v3644_v46 = vmul.f32 %v6955_v26, %v3366_v36  ;;  %v3106_v47 = vadd.f32 %v6947_v19, %v2828_v34  ;;  %v3359_v48 = vmax.f32 %v3103_v37, 0.0  ;;  %v2848_v34 = vld [vmem:[#allocation2 + $0x238] sm:$0xff] }
 0x336   : > { %v3897_v50 = vadd.f32 %v3896_v39, %v3632_v22  ;;  %v3910_v51 = vadd.f32 %v3642_v41, %v3641_v40  ;;  %v3360_v52 = vmax.f32 %v3104_v38, 0.0  ;;  %v3361_v53 = vmax.f32 %v3105_v42, 0.0 }
 0x337   : > { %v3362_v55 = vmax.f32 %v3106_v47, 0.0  ;;  %v3637_v56 = vmul.f32 %v6949_v23, %v3359_v48  ;;  %v3115_v57 = vadd.f32 %v6941_v16, %v2837_v43  ;;  %v3116_v58 = vadd.f32 %v6943_v17, %v2838_v44  ;;  %v2841_v43 = vld [vmem:[#allocation2 + $0x200] sm:$0xff]  ;;  %v2842_v44 = vld [vmem:[#allocation2 + $0x208] sm:$0xff] }
 0x338   : > { %3898 = vadd.xlane.f32.xlu0 %v3897_v50  ;;  %v3911_v60 = vadd.f32 %v3910_v51, %v3643_v45  ;;  %v3638_v61 = vmul.f32 %v6951_v24, %v3360_v52  ;;  %v3639_v62 = vmul.f32 %v6953_v25, %v3361_v53  ;;  %v3117_v63 = vadd.f32 %v6945_v18, %v2839_v49  ;;  %v2843_v49 = vld [vmem:[#allocation2 + $0x210] sm:$0xff] }
 0x339   : > { %v3640_v1 = vmul.f32 %v6955_v26, %v3362_v55  ;;  %v3118_v2 = vadd.f32 %v6947_v19, %v2840_v54  ;;  %v3371_v3 = vmax.f32 %v3115_v57, 0.0  ;;  %v3372_v4 = vmax.f32 %v3116_v58, 0.0  ;;  %v2844_v54 = vld [vmem:[#allocation2 + $0x218] sm:$0xff] }
 0x33a   : > { %v3912_v7 = vadd.f32 %v3911_v60, %v3644_v46  ;;  %v3905_v8 = vadd.f32 %v3638_v61, %v3637_v56  ;;  %v3373_v9 = vmax.f32 %v3117_v63, 0.0  ;;  %v3111_v10 = vadd.f32 %v6941_v16, %v2833_v59  ;;  %v2853_v63 = vld [vmem:[#allocation2 + $0x260] sm:$0xff] }
 0x33b   : > { %v3374_v11 = vmax.f32 %v3118_v2, 0.0  ;;  %v3649_v12 = vmul.f32 %v6949_v23, %v3371_v3  ;;  %v3650_v13 = vmul.f32 %v6951_v24, %v3372_v4  ;;  %v3112_v14 = vadd.f32 %v6943_v17, %v2834_v0  ;;  %v2854_v0 = vld [vmem:[#allocation2 + $0x268] sm:$0xff] }
 0x33c   : > { %3913 = vadd.xlane.f32.xlu1 %v3912_v7  ;;  %v3906_v20 = vadd.f32 %v3905_v8, %v3639_v62  ;;  %v3651_v21 = vmul.f32 %v6953_v25, %v3373_v9  ;;  %v3113_v22 = vadd.f32 %v6945_v18, %v2835_v5  ;;  %v3114_v27 = vadd.f32 %v6947_v19, %v2836_v6  ;;  %v2855_v5 = vld [vmem:[#allocation2 + $0x270] sm:$0xff] }
 0x33d   : > { %v3652_v29 = vmul.f32 %v6955_v26, %v3374_v11  ;;  %v3920_v30 = vadd.f32 %v3650_v13, %v3649_v12  ;;  %v3367_v31 = vmax.f32 %v3111_v10, 0.0  ;;  %v3368_v32 = vmax.f32 %v3112_v14, 0.0  ;;  %v2856_v10 = vld [vmem:[#allocation2 + $0x278] sm:$0xff] }
 0x33e   : > { %v3907_v35 = vadd.f32 %v3906_v20, %v3640_v1  ;;  %v3369_v36 = vmax.f32 %v3113_v22, 0.0  ;;  %v3370_v37 = vmax.f32 %v3114_v27, 0.0  ;;  %v3123_v38 = vadd.f32 %v6941_v16, %v2845_v15  ;;  %v2849_v15 = vld [vmem:[#allocation2 + $0x240] sm:$0xff] }
 0x33f   : > { %v3921_v39 = vadd.f32 %v3920_v30, %v3651_v21  ;;  %v3645_v40 = vmul.f32 %v6949_v23, %v3367_v31  ;;  %v3646_v41 = vmul.f32 %v6951_v24, %v3368_v32  ;;  %v3124_v42 = vadd.f32 %v6943_v17, %v2846_v28  ;;  %v2850_v28 = vld [vmem:[#allocation2 + $0x248] sm:$0xff] }
 0x340   : > { %3908 = vadd.xlane.f32.xlu0 %v3907_v35  ;;  %v3647_v45 = vmul.f32 %v6953_v25, %v3369_v36  ;;  %v3648_v46 = vmul.f32 %v6955_v26, %v3370_v37  ;;  %v3125_v47 = vadd.f32 %v6945_v18, %v2847_v33  ;;  %v3126_v48 = vadd.f32 %v6947_v19, %v2848_v34  ;;  %v2851_v33 = vld [vmem:[#allocation2 + $0x250] sm:$0xff]  ;;  %v2852_v34 = vld [vmem:[#allocation2 + $0x258] sm:$0xff] }
 0x341   : > { %v3922_v50 = vadd.f32 %v3921_v39, %v3652_v29  ;;  %v3915_v51 = vadd.f32 %v3646_v41, %v3645_v40  ;;  %v3379_v52 = vmax.f32 %v3123_v38, 0.0  ;;  %v3380_v53 = vmax.f32 %v3124_v42, 0.0 }
 0x342   : > { %v3381_v55 = vmax.f32 %v3125_v47, 0.0  ;;  %v3382_v56 = vmax.f32 %v3126_v48, 0.0  ;;  %v3119_v57 = vadd.f32 %v6941_v16, %v2841_v43  ;;  %v3120_v58 = vadd.f32 %v6943_v17, %v2842_v44  ;;  %v2861_v43 = vld [vmem:[#allocation2 + $0x2a0] sm:$0xff]  ;;  %v2862_v48 = vld [vmem:[#allocation2 + $0x2a8] sm:$0xff] }
 0x343   : > { %3923 = vadd.xlane.f32.xlu1 %v3922_v50  ;;  %v3916_v59 = vadd.f32 %v3915_v51, %v3647_v45  ;;  %v3657_v60 = vmul.f32 %v6949_v23, %v3379_v52  ;;  %v3658_v61 = vmul.f32 %v6951_v24, %v3380_v53  ;;  %v3121_v62 = vadd.f32 %v6945_v18, %v2843_v49  ;;  %v2863_v53 = vld [vmem:[#allocation2 + $0x2b0] sm:$0xff] }
 0x344   : > { %v3659_v1 = vmul.f32 %v6953_v25, %v3381_v55  ;;  %v3660_v2 = vmul.f32 %v6955_v26, %v3382_v56  ;;  %v3122_v3 = vadd.f32 %v6947_v19, %v2844_v54  ;;  %v3375_v4 = vmax.f32 %v3119_v57, 0.0  ;;  %v2864_v54 = vld [vmem:[#allocation2 + $0x2b8] sm:$0xff] }
 0x345   : > { %v3917_v6 = vadd.f32 %v3916_v59, %v3648_v46  ;;  %v3930_v7 = vadd.f32 %v3658_v61, %v3657_v60  ;;  %v3376_v8 = vmax.f32 %v3120_v58, 0.0  ;;  %v3377_v9 = vmax.f32 %v3121_v62, 0.0 }
 0x346   : > { %v3378_v11 = vmax.f32 %v3122_v3, 0.0  ;;  %v3653_v12 = vmul.f32 %v6949_v23, %v3375_v4  ;;  %v3131_v13 = vadd.f32 %v6941_v16, %v2853_v63  ;;  %v3132_v14 = vadd.f32 %v6943_v17, %v2854_v0  ;;  %v2857_v63 = vld [vmem:[#allocation2 + $0x280] sm:$0xff]  ;;  %v2858_v0 = vld [vmem:[#allocation2 + $0x288] sm:$0xff] }
 0x347   : > { %3918 = vadd.xlane.f32.xlu0 %v3917_v6  ;;  %v3931_v20 = vadd.f32 %v3930_v7, %v3659_v1  ;;  %v3654_v21 = vmul.f32 %v6951_v24, %v3376_v8  ;;  %v3655_v22 = vmul.f32 %v6953_v25, %v3377_v9  ;;  %v3133_v27 = vadd.f32 %v6945_v18, %v2855_v5  ;;  %v2859_v5 = vld [vmem:[#allocation2 + $0x290] sm:$0xff] }
 0x348   : > { %v3656_v29 = vmul.f32 %v6955_v26, %v3378_v11  ;;  %v3134_v30 = vadd.f32 %v6947_v19, %v2856_v10  ;;  %v3387_v31 = vmax.f32 %v3131_v13, 0.0  ;;  %v3388_v32 = vmax.f32 %v3132_v14, 0.0  ;;  %v2860_v10 = vld [vmem:[#allocation2 + $0x298] sm:$0xff] }
 0x349   : > { %v3932_v35 = vadd.f32 %v3931_v20, %v3660_v2  ;;  %v3925_v36 = vadd.f32 %v3654_v21, %v3653_v12  ;;  %v3389_v37 = vmax.f32 %v3133_v27, 0.0  ;;  %v3127_v38 = vadd.f32 %v6941_v16, %v2849_v15  ;;  %v2869_v27 = vld [vmem:[#allocation2 + $0x2e0] sm:$0xff] }
 0x34a   : > { %v3390_v39 = vmax.f32 %v3134_v30, 0.0  ;;  %v3665_v40 = vmul.f32 %v6949_v23, %v3387_v31  ;;  %v3666_v41 = vmul.f32 %v6951_v24, %v3388_v32  ;;  %v3128_v42 = vadd.f32 %v6943_v17, %v2850_v28  ;;  %v2870_v28 = vld [vmem:[#allocation2 + $0x2e8] sm:$0xff] }
 0x34b   : > { %3933 = vadd.xlane.f32.xlu1 %v3932_v35  ;;  %v3926_v44 = vadd.f32 %v3925_v36, %v3655_v22  ;;  %v3667_v45 = vmul.f32 %v6953_v25, %v3389_v37  ;;  %v3129_v46 = vadd.f32 %v6945_v18, %v2851_v33  ;;  %v3130_v47 = vadd.f32 %v6947_v19, %v2852_v34  ;;  %v2871_v33 = vld [vmem:[#allocation2 + $0x2f0] sm:$0xff] }
 0x34c   : > { %v3668_v49 = vmul.f32 %v6955_v26, %v3390_v39  ;;  %v3940_v50 = vadd.f32 %v3666_v41, %v3665_v40  ;;  %v3383_v51 = vmax.f32 %v3127_v38, 0.0  ;;  %v3384_v52 = vmax.f32 %v3128_v42, 0.0  ;;  %v2872_v38 = vld [vmem:[#allocation2 + $0x2f8] sm:$0xff] }
 0x34d   : > { %v3927_v55 = vadd.f32 %v3926_v44, %v3656_v29  ;;  %v3385_v56 = vmax.f32 %v3129_v46, 0.0  ;;  %v3386_v57 = vmax.f32 %v3130_v47, 0.0  ;;  %v3139_v58 = vadd.f32 %v6941_v16, %v2861_v43  ;;  %v2865_v43 = vld [vmem:[#allocation2 + $0x2c0] sm:$0xff] }
 0x34e   : > { %v3941_v59 = vadd.f32 %v3940_v50, %v3667_v45  ;;  %v3661_v60 = vmul.f32 %v6949_v23, %v3383_v51  ;;  %v3662_v61 = vmul.f32 %v6951_v24, %v3384_v52  ;;  %v3140_v62 = vadd.f32 %v6943_v17, %v2862_v48  ;;  %v2866_v48 = vld [vmem:[#allocation2 + $0x2c8] sm:$0xff] }
 0x34f   : > { %3928 = vadd.xlane.f32.xlu0 %v3927_v55  ;;  %v3663_v1 = vmul.f32 %v6953_v25, %v3385_v56  ;;  %v3664_v2 = vmul.f32 %v6955_v26, %v3386_v57  ;;  %v3141_v3 = vadd.f32 %v6945_v18, %v2863_v53  ;;  %v3142_v4 = vadd.f32 %v6947_v19, %v2864_v54  ;;  %v2867_v53 = vld [vmem:[#allocation2 + $0x2d0] sm:$0xff]  ;;  %v2868_v54 = vld [vmem:[#allocation2 + $0x2d8] sm:$0xff] }
 0x350   : > { %v3942_v6 = vadd.f32 %v3941_v59, %v3668_v49  ;;  %v3935_v7 = vadd.f32 %v3662_v61, %v3661_v60  ;;  %v3395_v8 = vmax.f32 %v3139_v58, 0.0  ;;  %v3396_v9 = vmax.f32 %v3140_v62, 0.0 }
 0x351   : > { %v3397_v11 = vmax.f32 %v3141_v3, 0.0  ;;  %v3398_v12 = vmax.f32 %v3142_v4, 0.0  ;;  %v3135_v13 = vadd.f32 %v6941_v16, %v2857_v63  ;;  %v3136_v14 = vadd.f32 %v6943_v17, %v2858_v0  ;;  %v2877_v63 = vld [vmem:[#allocation2 + $0x320] sm:$0xff]  ;;  %v2878_v4 = vld [vmem:[#allocation2 + $0x328] sm:$0xff] }
 0x352   : > { %3943 = vadd.xlane.f32.xlu1 %v3942_v6  ;;  %v3936_v15 = vadd.f32 %v3935_v7, %v3663_v1  ;;  %v3673_v20 = vmul.f32 %v6949_v23, %v3395_v8  ;;  %v3674_v21 = vmul.f32 %v6951_v24, %v3396_v9  ;;  %v3137_v22 = vadd.f32 %v6945_v18, %v2859_v5  ;;  %v2879_v9 = vld [vmem:[#allocation2 + $0x330] sm:$0xff] }
 0x353   : > { %v3675_v29 = vmul.f32 %v6953_v25, %v3397_v11  ;;  %v3676_v30 = vmul.f32 %v6955_v26, %v3398_v12  ;;  %v3138_v31 = vadd.f32 %v6947_v19, %v2860_v10  ;;  %v3391_v32 = vmax.f32 %v3135_v13, 0.0  ;;  %v2880_v10 = vld [vmem:[#allocation2 + $0x338] sm:$0xff] }
 0x354   : > { %v3937_v34 = vadd.f32 %v3936_v15, %v3664_v2  ;;  %v3950_v35 = vadd.f32 %v3674_v21, %v3673_v20  ;;  %v3392_v36 = vmax.f32 %v3136_v14, 0.0  ;;  %v3393_v37 = vmax.f32 %v3137_v22, 0.0 }
 0x355   : > { %v3394_v39 = vmax.f32 %v3138_v31, 0.0  ;;  %v3669_v40 = vmul.f32 %v6949_v23, %v3391_v32  ;;  %v3147_v41 = vadd.f32 %v6941_v16, %v2869_v27  ;;  %v3148_v42 = vadd.f32 %v6943_v17, %v2870_v28  ;;  %v2873_v27 = vld [vmem:[#allocation2 + $0x300] sm:$0xff]  ;;  %v2874_v28 = vld [vmem:[#allocation2 + $0x308] sm:$0xff] }
 0x356   : > { %3938 = vadd.xlane.f32.xlu0 %v3937_v34  ;;  %v3951_v44 = vadd.f32 %v3950_v35, %v3675_v29  ;;  %v3670_v45 = vmul.f32 %v6951_v24, %v3392_v36  ;;  %v3671_v46 = vmul.f32 %v6953_v25, %v3393_v37  ;;  %v3149_v47 = vadd.f32 %v6945_v18, %v2871_v33  ;;  %v2875_v33 = vld [vmem:[#allocation2 + $0x310] sm:$0xff] }
 0x357   : > { %v3672_v49 = vmul.f32 %v6955_v26, %v3394_v39  ;;  %v3150_v50 = vadd.f32 %v6947_v19, %v2872_v38  ;;  %v3403_v51 = vmax.f32 %v3147_v41, 0.0  ;;  %v3404_v52 = vmax.f32 %v3148_v42, 0.0  ;;  %v2876_v38 = vld [vmem:[#allocation2 + $0x318] sm:$0xff] }
 0x358   : > { %v3952_v55 = vadd.f32 %v3951_v44, %v3676_v30  ;;  %v3945_v56 = vadd.f32 %v3670_v45, %v3669_v40  ;;  %v3405_v57 = vmax.f32 %v3149_v47, 0.0  ;;  %v3143_v58 = vadd.f32 %v6941_v16, %v2865_v43  ;;  %v2885_v47 = vld [vmem:[#allocation2 + $0x360] sm:$0xff] }
 0x359   : > { %v3406_v59 = vmax.f32 %v3150_v50, 0.0  ;;  %v3681_v60 = vmul.f32 %v6949_v23, %v3403_v51  ;;  %v3682_v61 = vmul.f32 %v6951_v24, %v3404_v52  ;;  %v3144_v62 = vadd.f32 %v6943_v17, %v2866_v48  ;;  %v2886_v48 = vld [vmem:[#allocation2 + $0x368] sm:$0xff] }
 0x35a   : > { %3953 = vadd.xlane.f32.xlu1 %v3952_v55  ;;  %v3946_v0 = vadd.f32 %v3945_v56, %v3671_v46  ;;  %v3683_v1 = vmul.f32 %v6953_v25, %v3405_v57  ;;  %v3145_v2 = vadd.f32 %v6945_v18, %v2867_v53  ;;  %v3146_v3 = vadd.f32 %v6947_v19, %v2868_v54  ;;  %v2887_v53 = vld [vmem:[#allocation2 + $0x370] sm:$0xff] }
 0x35b   : > { %v3684_v5 = vmul.f32 %v6955_v26, %v3406_v59  ;;  %v3960_v6 = vadd.f32 %v3682_v61, %v3681_v60  ;;  %v3399_v7 = vmax.f32 %v3143_v58, 0.0  ;;  %v3400_v8 = vmax.f32 %v3144_v62, 0.0  ;;  %v2888_v58 = vld [vmem:[#allocation2 + $0x378] sm:$0xff] }
 0x35c   : > { %v3947_v11 = vadd.f32 %v3946_v0, %v3672_v49  ;;  %v3401_v12 = vmax.f32 %v3145_v2, 0.0  ;;  %v3402_v13 = vmax.f32 %v3146_v3, 0.0  ;;  %v3155_v14 = vadd.f32 %v6941_v16, %v2877_v63  ;;  %v2881_v63 = vld [vmem:[#allocation2 + $0x340] sm:$0xff] }
 0x35d   : > { %v3961_v15 = vadd.f32 %v3960_v6, %v3683_v1  ;;  %v3677_v20 = vmul.f32 %v6949_v23, %v3399_v7  ;;  %v3678_v21 = vmul.f32 %v6951_v24, %v3400_v8  ;;  %v3156_v22 = vadd.f32 %v6943_v17, %v2878_v4  ;;  %v2882_v4 = vld [vmem:[#allocation2 + $0x348] sm:$0xff] }
 0x35e   : > { %3948 = vadd.xlane.f32.xlu0 %v3947_v11  ;;  %v3679_v29 = vmul.f32 %v6953_v25, %v3401_v12  ;;  %v3680_v30 = vmul.f32 %v6955_v26, %v3402_v13  ;;  %v3157_v31 = vadd.f32 %v6945_v18, %v2879_v9  ;;  %v3158_v32 = vadd.f32 %v6947_v19, %v2880_v10  ;;  %v2883_v9 = vld [vmem:[#allocation2 + $0x350] sm:$0xff]  ;;  %v2884_v10 = vld [vmem:[#allocation2 + $0x358] sm:$0xff] }
 0x35f   : > { %v3962_v34 = vadd.f32 %v3961_v15, %v3684_v5  ;;  %v3955_v35 = vadd.f32 %v3678_v21, %v3677_v20  ;;  %v3411_v36 = vmax.f32 %v3155_v14, 0.0  ;;  %v3412_v37 = vmax.f32 %v3156_v22, 0.0 }
 0x360   : > { %v3413_v39 = vmax.f32 %v3157_v31, 0.0  ;;  %v3414_v40 = vmax.f32 %v3158_v32, 0.0  ;;  %v3151_v41 = vadd.f32 %v6941_v16, %v2873_v27  ;;  %v3152_v42 = vadd.f32 %v6943_v17, %v2874_v28  ;;  %v2893_v27 = vld [vmem:[#allocation2 + $0x3a0] sm:$0xff]  ;;  %v2894_v32 = vld [vmem:[#allocation2 + $0x3a8] sm:$0xff] }
 0x361   : > { %3963 = vadd.xlane.f32.xlu1 %v3962_v34  ;;  %v3956_v43 = vadd.f32 %v3955_v35, %v3679_v29  ;;  %v3689_v44 = vmul.f32 %v6949_v23, %v3411_v36  ;;  %v3690_v45 = vmul.f32 %v6951_v24, %v3412_v37  ;;  %v3153_v46 = vadd.f32 %v6945_v18, %v2875_v33  ;;  %v2895_v37 = vld [vmem:[#allocation2 + $0x3b0] sm:$0xff] }
 0x362   : > { %v3691_v49 = vmul.f32 %v6953_v25, %v3413_v39  ;;  %v3692_v50 = vmul.f32 %v6955_v26, %v3414_v40  ;;  %v3154_v51 = vadd.f32 %v6947_v19, %v2876_v38  ;;  %v3407_v52 = vmax.f32 %v3151_v41, 0.0  ;;  %v2896_v38 = vld [vmem:[#allocation2 + $0x3b8] sm:$0xff] }
 0x363   : > { %v3957_v54 = vadd.f32 %v3956_v43, %v3680_v30  ;;  %v3970_v55 = vadd.f32 %v3690_v45, %v3689_v44  ;;  %v3408_v56 = vmax.f32 %v3152_v42, 0.0  ;;  %v3409_v57 = vmax.f32 %v3153_v46, 0.0 }
 0x364   : > { %v3410_v59 = vmax.f32 %v3154_v51, 0.0  ;;  %v3685_v60 = vmul.f32 %v6949_v23, %v3407_v52  ;;  %v3163_v61 = vadd.f32 %v6941_v16, %v2885_v47  ;;  %v3164_v62 = vadd.f32 %v6943_v17, %v2886_v48  ;;  %v2889_v47 = vld [vmem:[#allocation2 + $0x380] sm:$0xff]  ;;  %v2890_v48 = vld [vmem:[#allocation2 + $0x388] sm:$0xff] }
 0x365   : > { %3958 = vadd.xlane.f32.xlu0 %v3957_v54  ;;  %v3971_v0 = vadd.f32 %v3970_v55, %v3691_v49  ;;  %v3686_v1 = vmul.f32 %v6951_v24, %v3408_v56  ;;  %v3687_v2 = vmul.f32 %v6953_v25, %v3409_v57  ;;  %v3165_v3 = vadd.f32 %v6945_v18, %v2887_v53  ;;  %v2891_v53 = vld [vmem:[#allocation2 + $0x390] sm:$0xff] }
 0x366   : > { %v3688_v5 = vmul.f32 %v6955_v26, %v3410_v59  ;;  %v3166_v6 = vadd.f32 %v6947_v19, %v2888_v58  ;;  %v3419_v7 = vmax.f32 %v3163_v61, 0.0  ;;  %v3420_v8 = vmax.f32 %v3164_v62, 0.0  ;;  %v2892_v58 = vld [vmem:[#allocation2 + $0x398] sm:$0xff] }
 0x367   : > { %v3972_v11 = vadd.f32 %v3971_v0, %v3692_v50  ;;  %v3965_v12 = vadd.f32 %v3686_v1, %v3685_v60  ;;  %v3421_v13 = vmax.f32 %v3165_v3, 0.0  ;;  %v3159_v14 = vadd.f32 %v6941_v16, %v2881_v63  ;;  %v2901_v3 = vld [vmem:[#allocation2 + $0x3e0] sm:$0xff] }
 0x368   : > { %v3422_v15 = vmax.f32 %v3166_v6, 0.0  ;;  %v3697_v20 = vmul.f32 %v6949_v23, %v3419_v7  ;;  %v3698_v21 = vmul.f32 %v6951_v24, %v3420_v8  ;;  %v3160_v22 = vadd.f32 %v6943_v17, %v2882_v4  ;;  %v2902_v4 = vld [vmem:[#allocation2 + $0x3e8] sm:$0xff] }
 0x369   : > { %3973 = vadd.xlane.f32.xlu1 %v3972_v11  ;;  %v3966_v28 = vadd.f32 %v3965_v12, %v3687_v2  ;;  %v3699_v29 = vmul.f32 %v6953_v25, %v3421_v13  ;;  %v3161_v30 = vadd.f32 %v6945_v18, %v2883_v9  ;;  %v3162_v31 = vadd.f32 %v6947_v19, %v2884_v10  ;;  %v2903_v9 = vld [vmem:[#allocation2 + $0x3f0] sm:$0xff] }
 0x36a   : > { %v3700_v33 = vmul.f32 %v6955_v26, %v3422_v15  ;;  %v3980_v34 = vadd.f32 %v3698_v21, %v3697_v20  ;;  %v3415_v35 = vmax.f32 %v3159_v14, 0.0  ;;  %v3416_v36 = vmax.f32 %v3160_v22, 0.0  ;;  %v2904_v14 = vld [vmem:[#allocation2 + $0x3f8] sm:$0xff] }
 0x36b   : > { %v3967_v39 = vadd.f32 %v3966_v28, %v3688_v5  ;;  %v3417_v40 = vmax.f32 %v3161_v30, 0.0  ;;  %v3418_v41 = vmax.f32 %v3162_v31, 0.0  ;;  %v3171_v42 = vadd.f32 %v6941_v16, %v2893_v27  ;;  %v2897_v27 = vld [vmem:[#allocation2 + $0x3c0] sm:$0xff] }
 0x36c   : > { %v3981_v43 = vadd.f32 %v3980_v34, %v3699_v29  ;;  %v3693_v44 = vmul.f32 %v6949_v23, %v3415_v35  ;;  %v3694_v45 = vmul.f32 %v6951_v24, %v3416_v36  ;;  %v3172_v46 = vadd.f32 %v6943_v17, %v2894_v32  ;;  %v2898_v32 = vld [vmem:[#allocation2 + $0x3c8] sm:$0xff] }
 0x36d   : > { %3968 = vadd.xlane.f32.xlu0 %v3967_v39  ;;  %v3695_v49 = vmul.f32 %v6953_v25, %v3417_v40  ;;  %v3696_v50 = vmul.f32 %v6955_v26, %v3418_v41  ;;  %v3173_v51 = vadd.f32 %v6945_v18, %v2895_v37  ;;  %v3174_v52 = vadd.f32 %v6947_v19, %v2896_v38  ;;  %v2899_v37 = vld [vmem:[#allocation2 + $0x3d0] sm:$0xff]  ;;  %v2900_v38 = vld [vmem:[#allocation2 + $0x3d8] sm:$0xff] }
 0x36e   : > { %v3982_v54 = vadd.f32 %v3981_v43, %v3700_v33  ;;  %v3975_v55 = vadd.f32 %v3694_v45, %v3693_v44  ;;  %v3427_v56 = vmax.f32 %v3171_v42, 0.0  ;;  %v3428_v57 = vmax.f32 %v3172_v46, 0.0 }
 0x36f   : > { %v3429_v59 = vmax.f32 %v3173_v51, 0.0  ;;  %v3430_v60 = vmax.f32 %v3174_v52, 0.0  ;;  %v3167_v61 = vadd.f32 %v6941_v16, %v2889_v47  ;;  %v3168_v62 = vadd.f32 %v6943_v17, %v2890_v48  ;;  %v2909_v47 = vld [vmem:[#allocation2 + $0x420] sm:$0xff]  ;;  %v2910_v52 = vld [vmem:[#allocation2 + $0x428] sm:$0xff] }
 0x370   : > { %3983 = vadd.xlane.f32.xlu1 %v3982_v54  ;;  %v3976_v63 = vadd.f32 %v3975_v55, %v3695_v49  ;;  %v3705_v0 = vmul.f32 %v6949_v23, %v3427_v56  ;;  %v3706_v1 = vmul.f32 %v6951_v24, %v3428_v57  ;;  %v3169_v2 = vadd.f32 %v6945_v18, %v2891_v53  ;;  %v2911_v57 = vld [vmem:[#allocation2 + $0x430] sm:$0xff] }
 0x371   : > { %v3707_v5 = vmul.f32 %v6953_v25, %v3429_v59  ;;  %v3708_v6 = vmul.f32 %v6955_v26, %v3430_v60  ;;  %v3170_v7 = vadd.f32 %v6947_v19, %v2892_v58  ;;  %v3423_v8 = vmax.f32 %v3167_v61, 0.0  ;;  %v2912_v58 = vld [vmem:[#allocation2 + $0x438] sm:$0xff] }
 0x372   : > { %v3977_v10 = vadd.f32 %v3976_v63, %v3696_v50  ;;  %v3990_v11 = vadd.f32 %v3706_v1, %v3705_v0  ;;  %v3424_v12 = vmax.f32 %v3168_v62, 0.0  ;;  %v3425_v13 = vmax.f32 %v3169_v2, 0.0 }
 0x373   : > { %v3426_v15 = vmax.f32 %v3170_v7, 0.0  ;;  %v3701_v20 = vmul.f32 %v6949_v23, %v3423_v8  ;;  %v3179_v21 = vadd.f32 %v6941_v16, %v2901_v3  ;;  %v3180_v22 = vadd.f32 %v6943_v17, %v2902_v4  ;;  %v2905_v3 = vld [vmem:[#allocation2 + $0x400] sm:$0xff]  ;;  %v2906_v4 = vld [vmem:[#allocation2 + $0x408] sm:$0xff] }
 0x374   : > { %3978 = vadd.xlane.f32.xlu0 %v3977_v10  ;;  %v3991_v28 = vadd.f32 %v3990_v11, %v3707_v5  ;;  %v3702_v29 = vmul.f32 %v6951_v24, %v3424_v12  ;;  %v3703_v30 = vmul.f32 %v6953_v25, %v3425_v13  ;;  %v3181_v31 = vadd.f32 %v6945_v18, %v2903_v9  ;;  %v2907_v9 = vld [vmem:[#allocation2 + $0x410] sm:$0xff] }
 0x375   : > { %v3704_v33 = vmul.f32 %v6955_v26, %v3426_v15  ;;  %v3182_v34 = vadd.f32 %v6947_v19, %v2904_v14  ;;  %v3435_v35 = vmax.f32 %v3179_v21, 0.0  ;;  %v3436_v36 = vmax.f32 %v3180_v22, 0.0  ;;  %v2908_v14 = vld [vmem:[#allocation2 + $0x418] sm:$0xff] }
 0x376   : > { %v3992_v39 = vadd.f32 %v3991_v28, %v3708_v6  ;;  %v3985_v40 = vadd.f32 %v3702_v29, %v3701_v20  ;;  %v3437_v41 = vmax.f32 %v3181_v31, 0.0  ;;  %v3175_v42 = vadd.f32 %v6941_v16, %v2897_v27  ;;  %v2917_v31 = vld [vmem:[#allocation2 + $0x460] sm:$0xff] }
 0x377   : > { %v3438_v43 = vmax.f32 %v3182_v34, 0.0  ;;  %v3713_v44 = vmul.f32 %v6949_v23, %v3435_v35  ;;  %v3714_v45 = vmul.f32 %v6951_v24, %v3436_v36  ;;  %v3176_v46 = vadd.f32 %v6943_v17, %v2898_v32  ;;  %v2918_v32 = vld [vmem:[#allocation2 + $0x468] sm:$0xff] }
 0x378   : > { %3993 = vadd.xlane.f32.xlu1 %v3992_v39  ;;  %v3986_v48 = vadd.f32 %v3985_v40, %v3703_v30  ;;  %v3715_v49 = vmul.f32 %v6953_v25, %v3437_v41  ;;  %v3177_v50 = vadd.f32 %v6945_v18, %v2899_v37  ;;  %v3178_v51 = vadd.f32 %v6947_v19, %v2900_v38  ;;  %v2919_v37 = vld [vmem:[#allocation2 + $0x470] sm:$0xff] }
 0x379   : > { %v3716_v53 = vmul.f32 %v6955_v26, %v3438_v43  ;;  %v4000_v54 = vadd.f32 %v3714_v45, %v3713_v44  ;;  %v3431_v55 = vmax.f32 %v3175_v42, 0.0  ;;  %v3432_v56 = vmax.f32 %v3176_v46, 0.0  ;;  %v2920_v42 = vld [vmem:[#allocation2 + $0x478] sm:$0xff] }
 0x37a   : > { %v3987_v59 = vadd.f32 %v3986_v48, %v3704_v33  ;;  %v3433_v60 = vmax.f32 %v3177_v50, 0.0  ;;  %v3434_v61 = vmax.f32 %v3178_v51, 0.0  ;;  %v3187_v62 = vadd.f32 %v6941_v16, %v2909_v47  ;;  %v2913_v47 = vld [vmem:[#allocation2 + $0x440] sm:$0xff] }
 0x37b   : > { %v4001_v63 = vadd.f32 %v4000_v54, %v3715_v49  ;;  %v3709_v0 = vmul.f32 %v6949_v23, %v3431_v55  ;;  %v3710_v1 = vmul.f32 %v6951_v24, %v3432_v56  ;;  %v3188_v2 = vadd.f32 %v6943_v17, %v2910_v52  ;;  %v2914_v52 = vld [vmem:[#allocation2 + $0x448] sm:$0xff] }
 0x37c   : > { %3988 = vadd.xlane.f32.xlu0 %v3987_v59  ;;  %v3711_v5 = vmul.f32 %v6953_v25, %v3433_v60  ;;  %v3712_v6 = vmul.f32 %v6955_v26, %v3434_v61  ;;  %v3189_v7 = vadd.f32 %v6945_v18, %v2911_v57  ;;  %v3190_v8 = vadd.f32 %v6947_v19, %v2912_v58  ;;  %v2915_v57 = vld [vmem:[#allocation2 + $0x450] sm:$0xff]  ;;  %v2916_v58 = vld [vmem:[#allocation2 + $0x458] sm:$0xff] }
 0x37d   : > { %v4002_v10 = vadd.f32 %v4001_v63, %v3716_v53  ;;  %v3995_v11 = vadd.f32 %v3710_v1, %v3709_v0  ;;  %v3443_v12 = vmax.f32 %v3187_v62, 0.0  ;;  %v3444_v13 = vmax.f32 %v3188_v2, 0.0 }
 0x37e   : > { %v3445_v15 = vmax.f32 %v3189_v7, 0.0  ;;  %v3446_v20 = vmax.f32 %v3190_v8, 0.0  ;;  %v3183_v21 = vadd.f32 %v6941_v16, %v2905_v3  ;;  %v3184_v22 = vadd.f32 %v6943_v17, %v2906_v4  ;;  %v2925_v3 = vld [vmem:[#allocation2 + $0x4a0] sm:$0xff]  ;;  %v2926_v8 = vld [vmem:[#allocation2 + $0x4a8] sm:$0xff] }
 0x37f   : > { %4003 = vadd.xlane.f32.xlu1 %v4002_v10  ;;  %v3996_v27 = vadd.f32 %v3995_v11, %v3711_v5  ;;  %v3721_v28 = vmul.f32 %v6949_v23, %v3443_v12  ;;  %v3722_v29 = vmul.f32 %v6951_v24, %v3444_v13  ;;  %v3185_v30 = vadd.f32 %v6945_v18, %v2907_v9  ;;  %v2927_v13 = vld [vmem:[#allocation2 + $0x4b0] sm:$0xff] }
 0x380   : > { %v3723_v33 = vmul.f32 %v6953_v25, %v3445_v15  ;;  %v3724_v34 = vmul.f32 %v6955_v26, %v3446_v20  ;;  %v3186_v35 = vadd.f32 %v6947_v19, %v2908_v14  ;;  %v3439_v36 = vmax.f32 %v3183_v21, 0.0  ;;  %v2928_v14 = vld [vmem:[#allocation2 + $0x4b8] sm:$0xff] }
 0x381   : > { %v3997_v38 = vadd.f32 %v3996_v27, %v3712_v6  ;;  %v4010_v39 = vadd.f32 %v3722_v29, %v3721_v28  ;;  %v3440_v40 = vmax.f32 %v3184_v22, 0.0  ;;  %v3441_v41 = vmax.f32 %v3185_v30, 0.0 }
 0x382   : > { %v3442_v43 = vmax.f32 %v3186_v35, 0.0  ;;  %v3717_v44 = vmul.f32 %v6949_v23, %v3439_v36  ;;  %v3195_v45 = vadd.f32 %v6941_v16, %v2917_v31  ;;  %v3196_v46 = vadd.f32 %v6943_v17, %v2918_v32  ;;  %v2921_v31 = vld [vmem:[#allocation2 + $0x480] sm:$0xff]  ;;  %v2922_v32 = vld [vmem:[#allocation2 + $0x488] sm:$0xff] }
 0x383   : > { %3998 = vadd.xlane.f32.xlu0 %v3997_v38  ;;  %v4011_v48 = vadd.f32 %v4010_v39, %v3723_v33  ;;  %v3718_v49 = vmul.f32 %v6951_v24, %v3440_v40  ;;  %v3719_v50 = vmul.f32 %v6953_v25, %v3441_v41  ;;  %v3197_v51 = vadd.f32 %v6945_v18, %v2919_v37  ;;  %v2923_v37 = vld [vmem:[#allocation2 + $0x490] sm:$0xff] }
 0x384   : > { %v3720_v53 = vmul.f32 %v6955_v26, %v3442_v43  ;;  %v3198_v54 = vadd.f32 %v6947_v19, %v2920_v42  ;;  %v3451_v55 = vmax.f32 %v3195_v45, 0.0  ;;  %v3452_v56 = vmax.f32 %v3196_v46, 0.0  ;;  %v2924_v42 = vld [vmem:[#allocation2 + $0x498] sm:$0xff] }
 0x385   : > { %v4012_v59 = vadd.f32 %v4011_v48, %v3724_v34  ;;  %v4005_v60 = vadd.f32 %v3718_v49, %v3717_v44  ;;  %v3453_v61 = vmax.f32 %v3197_v51, 0.0  ;;  %v3191_v62 = vadd.f32 %v6941_v16, %v2913_v47  ;;  %v2933_v51 = vld [vmem:[#allocation2 + $0x4e0] sm:$0xff] }
 0x386   : > { %v3454_v63 = vmax.f32 %v3198_v54, 0.0  ;;  %v3729_v0 = vmul.f32 %v6949_v23, %v3451_v55  ;;  %v3730_v1 = vmul.f32 %v6951_v24, %v3452_v56  ;;  %v3192_v2 = vadd.f32 %v6943_v17, %v2914_v52  ;;  %v2934_v52 = vld [vmem:[#allocation2 + $0x4e8] sm:$0xff] }
 0x387   : > { %4013 = vadd.xlane.f32.xlu1 %v4012_v59  ;;  %v4006_v4 = vadd.f32 %v4005_v60, %v3719_v50  ;;  %v3731_v5 = vmul.f32 %v6953_v25, %v3453_v61  ;;  %v3193_v6 = vadd.f32 %v6945_v18, %v2915_v57  ;;  %v3194_v7 = vadd.f32 %v6947_v19, %v2916_v58  ;;  %v2935_v57 = vld [vmem:[#allocation2 + $0x4f0] sm:$0xff] }
 0x388   : > { %v3732_v9 = vmul.f32 %v6955_v26, %v3454_v63  ;;  %v4020_v10 = vadd.f32 %v3730_v1, %v3729_v0  ;;  %v3447_v11 = vmax.f32 %v3191_v62, 0.0  ;;  %v3448_v12 = vmax.f32 %v3192_v2, 0.0  ;;  %v2936_v62 = vld [vmem:[#allocation2 + $0x4f8] sm:$0xff] }
 0x389   : > { %v4007_v15 = vadd.f32 %v4006_v4, %v3720_v53  ;;  %v3449_v20 = vmax.f32 %v3193_v6, 0.0  ;;  %v3450_v21 = vmax.f32 %v3194_v7, 0.0  ;;  %v3203_v22 = vadd.f32 %v6941_v16, %v2925_v3  ;;  %v2929_v3 = vld [vmem:[#allocation2 + $0x4c0] sm:$0xff] }
 0x38a   : > { %v4021_v27 = vadd.f32 %v4020_v10, %v3731_v5  ;;  %v3725_v28 = vmul.f32 %v6949_v23, %v3447_v11  ;;  %v3726_v29 = vmul.f32 %v6951_v24, %v3448_v12  ;;  %v3204_v30 = vadd.f32 %v6943_v17, %v2926_v8  ;;  %v2930_v8 = vld [vmem:[#allocation2 + $0x4c8] sm:$0xff] }
 0x38b   : > { %4008 = vadd.xlane.f32.xlu0 %v4007_v15  ;;  %v3727_v33 = vmul.f32 %v6953_v25, %v3449_v20  ;;  %v3728_v34 = vmul.f32 %v6955_v26, %v3450_v21  ;;  %v3205_v35 = vadd.f32 %v6945_v18, %v2927_v13  ;;  %v3206_v36 = vadd.f32 %v6947_v19, %v2928_v14  ;;  %v2931_v13 = vld [vmem:[#allocation2 + $0x4d0] sm:$0xff]  ;;  %v2932_v14 = vld [vmem:[#allocation2 + $0x4d8] sm:$0xff] }
 0x38c   : > { %v4022_v38 = vadd.f32 %v4021_v27, %v3732_v9  ;;  %v4015_v39 = vadd.f32 %v3726_v29, %v3725_v28  ;;  %v3459_v40 = vmax.f32 %v3203_v22, 0.0  ;;  %v3460_v41 = vmax.f32 %v3204_v30, 0.0 }
 0x38d   : > { %v3461_v43 = vmax.f32 %v3205_v35, 0.0  ;;  %v3462_v44 = vmax.f32 %v3206_v36, 0.0  ;;  %v3199_v45 = vadd.f32 %v6941_v16, %v2921_v31  ;;  %v3200_v46 = vadd.f32 %v6943_v17, %v2922_v32  ;;  %v2941_v31 = vld [vmem:[#allocation2 + $0x520] sm:$0xff]  ;;  %v2942_v36 = vld [vmem:[#allocation2 + $0x528] sm:$0xff] }
 0x38e   : > { %4023 = vadd.xlane.f32.xlu1 %v4022_v38  ;;  %v4016_v47 = vadd.f32 %v4015_v39, %v3727_v33  ;;  %v3737_v48 = vmul.f32 %v6949_v23, %v3459_v40  ;;  %v3738_v49 = vmul.f32 %v6951_v24, %v3460_v41  ;;  %v3201_v50 = vadd.f32 %v6945_v18, %v2923_v37  ;;  %v2943_v41 = vld [vmem:[#allocation2 + $0x530] sm:$0xff] }
 0x38f   : > { %v3739_v53 = vmul.f32 %v6953_v25, %v3461_v43  ;;  %v3740_v54 = vmul.f32 %v6955_v26, %v3462_v44  ;;  %v3202_v55 = vadd.f32 %v6947_v19, %v2924_v42  ;;  %v3455_v56 = vmax.f32 %v3199_v45, 0.0  ;;  %v2944_v42 = vld [vmem:[#allocation2 + $0x538] sm:$0xff] }
 0x390   : > { %v4017_v58 = vadd.f32 %v4016_v47, %v3728_v34  ;;  %v4030_v59 = vadd.f32 %v3738_v49, %v3737_v48  ;;  %v3456_v60 = vmax.f32 %v3200_v46, 0.0  ;;  %v3457_v61 = vmax.f32 %v3201_v50, 0.0 }
 0x391   : > { %v3458_v63 = vmax.f32 %v3202_v55, 0.0  ;;  %v3733_v0 = vmul.f32 %v6949_v23, %v3455_v56  ;;  %v3211_v1 = vadd.f32 %v6941_v16, %v2933_v51  ;;  %v3212_v2 = vadd.f32 %v6943_v17, %v2934_v52  ;;  %v2937_v51 = vld [vmem:[#allocation2 + $0x500] sm:$0xff]  ;;  %v2938_v52 = vld [vmem:[#allocation2 + $0x508] sm:$0xff] }
 0x392   : > { %4018 = vadd.xlane.f32.xlu0 %v4017_v58  ;;  %v4031_v4 = vadd.f32 %v4030_v59, %v3739_v53  ;;  %v3734_v5 = vmul.f32 %v6951_v24, %v3456_v60  ;;  %v3735_v6 = vmul.f32 %v6953_v25, %v3457_v61  ;;  %v3213_v7 = vadd.f32 %v6945_v18, %v2935_v57  ;;  %v2939_v57 = vld [vmem:[#allocation2 + $0x510] sm:$0xff] }
 0x393   : > { %v3736_v9 = vmul.f32 %v6955_v26, %v3458_v63  ;;  %v3214_v10 = vadd.f32 %v6947_v19, %v2936_v62  ;;  %v3467_v11 = vmax.f32 %v3211_v1, 0.0  ;;  %v3468_v12 = vmax.f32 %v3212_v2, 0.0  ;;  %v2940_v62 = vld [vmem:[#allocation2 + $0x518] sm:$0xff] }
 0x394   : > { %v4032_v15 = vadd.f32 %v4031_v4, %v3740_v54  ;;  %v4025_v20 = vadd.f32 %v3734_v5, %v3733_v0  ;;  %v3469_v21 = vmax.f32 %v3213_v7, 0.0  ;;  %v3207_v22 = vadd.f32 %v6941_v16, %v2929_v3  ;;  %v2949_v7 = vld [vmem:[#allocation2 + $0x560] sm:$0xff] }
 0x395   : > { %v3470_v27 = vmax.f32 %v3214_v10, 0.0  ;;  %v3745_v28 = vmul.f32 %v6949_v23, %v3467_v11  ;;  %v3746_v29 = vmul.f32 %v6951_v24, %v3468_v12  ;;  %v3208_v30 = vadd.f32 %v6943_v17, %v2930_v8  ;;  %v2950_v8 = vld [vmem:[#allocation2 + $0x568] sm:$0xff] }
 0x396   : > { %4033 = vadd.xlane.f32.xlu1 %v4032_v15  ;;  %v4026_v32 = vadd.f32 %v4025_v20, %v3735_v6  ;;  %v3747_v33 = vmul.f32 %v6953_v25, %v3469_v21  ;;  %v3209_v34 = vadd.f32 %v6945_v18, %v2931_v13  ;;  %v3210_v35 = vadd.f32 %v6947_v19, %v2932_v14  ;;  %v2951_v13 = vld [vmem:[#allocation2 + $0x570] sm:$0xff] }
 0x397   : > { %v3748_v37 = vmul.f32 %v6955_v26, %v3470_v27  ;;  %v4040_v38 = vadd.f32 %v3746_v29, %v3745_v28  ;;  %v3463_v39 = vmax.f32 %v3207_v22, 0.0  ;;  %v3464_v40 = vmax.f32 %v3208_v30, 0.0  ;;  %v2952_v22 = vld [vmem:[#allocation2 + $0x578] sm:$0xff] }
 0x398   : > { %v4027_v43 = vadd.f32 %v4026_v32, %v3736_v9  ;;  %v3465_v44 = vmax.f32 %v3209_v34, 0.0  ;;  %v3466_v45 = vmax.f32 %v3210_v35, 0.0  ;;  %v3219_v46 = vadd.f32 %v6941_v16, %v2941_v31  ;;  %v2945_v31 = vld [vmem:[#allocation2 + $0x540] sm:$0xff] }
 0x399   : > { %v4041_v47 = vadd.f32 %v4040_v38, %v3747_v33  ;;  %v3741_v48 = vmul.f32 %v6949_v23, %v3463_v39  ;;  %v3742_v49 = vmul.f32 %v6951_v24, %v3464_v40  ;;  %v3220_v50 = vadd.f32 %v6943_v17, %v2942_v36  ;;  %v2946_v36 = vld [vmem:[#allocation2 + $0x548] sm:$0xff] }
 0x39a   : > { %4028 = vadd.xlane.f32.xlu0 %v4027_v43  ;;  %v3743_v53 = vmul.f32 %v6953_v25, %v3465_v44  ;;  %v3744_v54 = vmul.f32 %v6955_v26, %v3466_v45  ;;  %v3221_v55 = vadd.f32 %v6945_v18, %v2943_v41  ;;  %v3222_v56 = vadd.f32 %v6947_v19, %v2944_v42  ;;  %v2947_v41 = vld [vmem:[#allocation2 + $0x550] sm:$0xff]  ;;  %v2948_v42 = vld [vmem:[#allocation2 + $0x558] sm:$0xff] }
 0x39b   : > { %v4042_v58 = vadd.f32 %v4041_v47, %v3748_v37  ;;  %v4035_v59 = vadd.f32 %v3742_v49, %v3741_v48  ;;  %v3475_v60 = vmax.f32 %v3219_v46, 0.0  ;;  %v3476_v61 = vmax.f32 %v3220_v50, 0.0 }
 0x39c   : > { %v3477_v63 = vmax.f32 %v3221_v55, 0.0  ;;  %v3478_v0 = vmax.f32 %v3222_v56, 0.0  ;;  %v3215_v1 = vadd.f32 %v6941_v16, %v2937_v51  ;;  %v3216_v2 = vadd.f32 %v6943_v17, %v2938_v52  ;;  %v2957_v51 = vld [vmem:[#allocation2 + $0x5a0] sm:$0xff]  ;;  %v2958_v56 = vld [vmem:[#allocation2 + $0x5a8] sm:$0xff] }
 0x39d   : > { %4043 = vadd.xlane.f32.xlu1 %v4042_v58  ;;  %v4036_v3 = vadd.f32 %v4035_v59, %v3743_v53  ;;  %v3753_v4 = vmul.f32 %v6949_v23, %v3475_v60  ;;  %v3754_v5 = vmul.f32 %v6951_v24, %v3476_v61  ;;  %v3217_v6 = vadd.f32 %v6945_v18, %v2939_v57  ;;  %v2959_v61 = vld [vmem:[#allocation2 + $0x5b0] sm:$0xff] }
 0x39e   : > { %v3755_v9 = vmul.f32 %v6953_v25, %v3477_v63  ;;  %v3756_v10 = vmul.f32 %v6955_v26, %v3478_v0  ;;  %v3218_v11 = vadd.f32 %v6947_v19, %v2940_v62  ;;  %v3471_v12 = vmax.f32 %v3215_v1, 0.0  ;;  %v2960_v62 = vld [vmem:[#allocation2 + $0x5b8] sm:$0xff] }
 0x39f   : > { %v4037_v14 = vadd.f32 %v4036_v3, %v3744_v54  ;;  %v4050_v15 = vadd.f32 %v3754_v5, %v3753_v4  ;;  %v3472_v20 = vmax.f32 %v3216_v2, 0.0  ;;  %v3473_v21 = vmax.f32 %v3217_v6, 0.0 }
 0x3a0   : > { %v3474_v27 = vmax.f32 %v3218_v11, 0.0  ;;  %v3749_v28 = vmul.f32 %v6949_v23, %v3471_v12  ;;  %v3227_v29 = vadd.f32 %v6941_v16, %v2949_v7  ;;  %v3228_v30 = vadd.f32 %v6943_v17, %v2950_v8  ;;  %v2953_v7 = vld [vmem:[#allocation2 + $0x580] sm:$0xff]  ;;  %v2954_v8 = vld [vmem:[#allocation2 + $0x588] sm:$0xff] }
 0x3a1   : > { %4038 = vadd.xlane.f32.xlu0 %v4037_v14  ;;  %v4051_v32 = vadd.f32 %v4050_v15, %v3755_v9  ;;  %v3750_v33 = vmul.f32 %v6951_v24, %v3472_v20  ;;  %v3751_v34 = vmul.f32 %v6953_v25, %v3473_v21  ;;  %v3229_v35 = vadd.f32 %v6945_v18, %v2951_v13  ;;  %v2955_v13 = vld [vmem:[#allocation2 + $0x590] sm:$0xff] }
 0x3a2   : > { %v3752_v37 = vmul.f32 %v6955_v26, %v3474_v27  ;;  %v3230_v38 = vadd.f32 %v6947_v19, %v2952_v22  ;;  %v3483_v39 = vmax.f32 %v3227_v29, 0.0  ;;  %v3484_v40 = vmax.f32 %v3228_v30, 0.0  ;;  %v2956_v22 = vld [vmem:[#allocation2 + $0x598] sm:$0xff] }
 0x3a3   : > { %v4052_v43 = vadd.f32 %v4051_v32, %v3756_v10  ;;  %v4045_v44 = vadd.f32 %v3750_v33, %v3749_v28  ;;  %v3485_v45 = vmax.f32 %v3229_v35, 0.0  ;;  %v3223_v46 = vadd.f32 %v6941_v16, %v2945_v31  ;;  %v2965_v35 = vld [vmem:[#allocation2 + $0x5e0] sm:$0xff] }
 0x3a4   : > { %v3486_v47 = vmax.f32 %v3230_v38, 0.0  ;;  %v3761_v48 = vmul.f32 %v6949_v23, %v3483_v39  ;;  %v3762_v49 = vmul.f32 %v6951_v24, %v3484_v40  ;;  %v3224_v50 = vadd.f32 %v6943_v17, %v2946_v36  ;;  %v2966_v36 = vld [vmem:[#allocation2 + $0x5e8] sm:$0xff] }
 0x3a5   : > { %4053 = vadd.xlane.f32.xlu1 %v4052_v43  ;;  %v4046_v52 = vadd.f32 %v4045_v44, %v3751_v34  ;;  %v3763_v53 = vmul.f32 %v6953_v25, %v3485_v45  ;;  %v3225_v54 = vadd.f32 %v6945_v18, %v2947_v41  ;;  %v3226_v55 = vadd.f32 %v6947_v19, %v2948_v42  ;;  %v2967_v41 = vld [vmem:[#allocation2 + $0x5f0] sm:$0xff] }
 0x3a6   : > { %v3764_v57 = vmul.f32 %v6955_v26, %v3486_v47  ;;  %v4060_v58 = vadd.f32 %v3762_v49, %v3761_v48  ;;  %v3479_v59 = vmax.f32 %v3223_v46, 0.0  ;;  %v3480_v60 = vmax.f32 %v3224_v50, 0.0  ;;  %v2968_v46 = vld [vmem:[#allocation2 + $0x5f8] sm:$0xff] }
 0x3a7   : > { %v4047_v63 = vadd.f32 %v4046_v52, %v3752_v37  ;;  %v3481_v0 = vmax.f32 %v3225_v54, 0.0  ;;  %v3482_v1 = vmax.f32 %v3226_v55, 0.0  ;;  %v3235_v2 = vadd.f32 %v6941_v16, %v2957_v51  ;;  %v2961_v51 = vld [vmem:[#allocation2 + $0x5c0] sm:$0xff] }
 0x3a8   : > { %v4061_v3 = vadd.f32 %v4060_v58, %v3763_v53  ;;  %v3757_v4 = vmul.f32 %v6949_v23, %v3479_v59  ;;  %v3758_v5 = vmul.f32 %v6951_v24, %v3480_v60  ;;  %v3236_v6 = vadd.f32 %v6943_v17, %v2958_v56  ;;  %v2962_v56 = vld [vmem:[#allocation2 + $0x5c8] sm:$0xff] }
 0x3a9   : > { %4048 = vadd.xlane.f32.xlu0 %v4047_v63  ;;  %v3759_v9 = vmul.f32 %v6953_v25, %v3481_v0  ;;  %v3760_v10 = vmul.f32 %v6955_v26, %v3482_v1  ;;  %v3237_v11 = vadd.f32 %v6945_v18, %v2959_v61  ;;  %v3238_v12 = vadd.f32 %v6947_v19, %v2960_v62  ;;  %v2963_v61 = vld [vmem:[#allocation2 + $0x5d0] sm:$0xff]  ;;  %v2964_v62 = vld [vmem:[#allocation2 + $0x5d8] sm:$0xff] }
 0x3aa   : > { %v4062_v14 = vadd.f32 %v4061_v3, %v3764_v57  ;;  %v4055_v15 = vadd.f32 %v3758_v5, %v3757_v4  ;;  %v3491_v20 = vmax.f32 %v3235_v2, 0.0  ;;  %v3492_v21 = vmax.f32 %v3236_v6, 0.0 }
 0x3ab   : > { %v3493_v27 = vmax.f32 %v3237_v11, 0.0  ;;  %v3494_v28 = vmax.f32 %v3238_v12, 0.0  ;;  %v3231_v29 = vadd.f32 %v6941_v16, %v2953_v7  ;;  %v3232_v30 = vadd.f32 %v6943_v17, %v2954_v8  ;;  %v2973_v7 = vld [vmem:[#allocation2 + $0x620] sm:$0xff]  ;;  %v2974_v12 = vld [vmem:[#allocation2 + $0x628] sm:$0xff] }
 0x3ac   : > { %4063 = vadd.xlane.f32.xlu1 %v4062_v14  ;;  %v4056_v31 = vadd.f32 %v4055_v15, %v3759_v9  ;;  %v3769_v32 = vmul.f32 %v6949_v23, %v3491_v20  ;;  %v3770_v33 = vmul.f32 %v6951_v24, %v3492_v21  ;;  %v3233_v34 = vadd.f32 %v6945_v18, %v2955_v13  ;;  %v2975_v21 = vld [vmem:[#allocation2 + $0x630] sm:$0xff] }
 0x3ad   : > { %v3771_v37 = vmul.f32 %v6953_v25, %v3493_v27  ;;  %v3772_v38 = vmul.f32 %v6955_v26, %v3494_v28  ;;  %v3234_v39 = vadd.f32 %v6947_v19, %v2956_v22  ;;  %v3487_v40 = vmax.f32 %v3231_v29, 0.0  ;;  %v2976_v22 = vld [vmem:[#allocation2 + $0x638] sm:$0xff] }
 0x3ae   : > { %v4057_v42 = vadd.f32 %v4056_v31, %v3760_v10  ;;  %v4070_v43 = vadd.f32 %v3770_v33, %v3769_v32  ;;  %v3488_v44 = vmax.f32 %v3232_v30, 0.0  ;;  %v3489_v45 = vmax.f32 %v3233_v34, 0.0 }
 0x3af   : > { %v3490_v47 = vmax.f32 %v3234_v39, 0.0  ;;  %v3765_v48 = vmul.f32 %v6949_v23, %v3487_v40  ;;  %v3243_v49 = vadd.f32 %v6941_v16, %v2965_v35  ;;  %v3244_v50 = vadd.f32 %v6943_v17, %v2966_v36  ;;  %v2969_v35 = vld [vmem:[#allocation2 + $0x600] sm:$0xff]  ;;  %v2970_v36 = vld [vmem:[#allocation2 + $0x608] sm:$0xff] }
 0x3b0   : > { %4058 = vadd.xlane.f32.xlu0 %v4057_v42  ;;  %v4071_v52 = vadd.f32 %v4070_v43, %v3771_v37  ;;  %v3766_v53 = vmul.f32 %v6951_v24, %v3488_v44  ;;  %v3767_v54 = vmul.f32 %v6953_v25, %v3489_v45  ;;  %v3245_v55 = vadd.f32 %v6945_v18, %v2967_v41  ;;  %v2971_v41 = vld [vmem:[#allocation2 + $0x610] sm:$0xff] }
 0x3b1   : > { %v3768_v57 = vmul.f32 %v6955_v26, %v3490_v47  ;;  %v3246_v58 = vadd.f32 %v6947_v19, %v2968_v46  ;;  %v3499_v59 = vmax.f32 %v3243_v49, 0.0  ;;  %v3500_v60 = vmax.f32 %v3244_v50, 0.0  ;;  %v2972_v46 = vld [vmem:[#allocation2 + $0x618] sm:$0xff] }
 0x3b2   : > { %v4072_v63 = vadd.f32 %v4071_v52, %v3772_v38  ;;  %v4065_v0 = vadd.f32 %v3766_v53, %v3765_v48  ;;  %v3501_v1 = vmax.f32 %v3245_v55, 0.0  ;;  %v3239_v2 = vadd.f32 %v6941_v16, %v2961_v51  ;;  %v2981_v55 = vld [vmem:[#allocation2 + $0x660] sm:$0xff] }
 0x3b3   : > { %v3502_v3 = vmax.f32 %v3246_v58, 0.0  ;;  %v3777_v4 = vmul.f32 %v6949_v23, %v3499_v59  ;;  %v3778_v5 = vmul.f32 %v6951_v24, %v3500_v60  ;;  %v3240_v6 = vadd.f32 %v6943_v17, %v2962_v56  ;;  %v2982_v56 = vld [vmem:[#allocation2 + $0x668] sm:$0xff] }
 0x3b4   : > { %4073 = vadd.xlane.f32.xlu1 %v4072_v63  ;;  %v4066_v8 = vadd.f32 %v4065_v0, %v3767_v54  ;;  %v3779_v9 = vmul.f32 %v6953_v25, %v3501_v1  ;;  %v3241_v10 = vadd.f32 %v6945_v18, %v2963_v61  ;;  %v3242_v11 = vadd.f32 %v6947_v19, %v2964_v62  ;;  %v2983_v62 = vld [vmem:[#allocation2 + $0x670] sm:$0xff] }
 0x3b5   : > { %v3780_v13 = vmul.f32 %v6955_v26, %v3502_v3  ;;  %v4080_v14 = vadd.f32 %v3778_v5, %v3777_v4  ;;  %v3495_v15 = vmax.f32 %v3239_v2, 0.0  ;;  %v3496_v20 = vmax.f32 %v3240_v6, 0.0  ;;  %v2984_v3 = vld [vmem:[#allocation2 + $0x678] sm:$0xff] }
 0x3b6   : > { %v4067_v27 = vadd.f32 %v4066_v8, %v3768_v57  ;;  %v3497_v28 = vmax.f32 %v3241_v10, 0.0  ;;  %v3498_v29 = vmax.f32 %v3242_v11, 0.0  ;;  %v3251_v30 = vadd.f32 %v6941_v16, %v2973_v7  ;;  %v7350_v57 = vpop.xlane.xlu1 %3858  ;;  %v2977_v8 = vld [vmem:[#allocation2 + $0x640] sm:$0xff] }
 0x3b7   : > { %v4081_v31 = vadd.f32 %v4080_v14, %v3779_v9  ;;  %v3773_v32 = vmul.f32 %v6949_v23, %v3495_v15  ;;  %v3774_v33 = vmul.f32 %v6951_v24, %v3496_v20  ;;  %v3252_v34 = vadd.f32 %v6943_v17, %v2974_v12 }
 0x3b8   : > { %4068 = vadd.xlane.f32.xlu0 %v4067_v27  ;;  %v3775_v37 = vmul.f32 %v6953_v25, %v3497_v28  ;;  %v3776_v38 = vmul.f32 %v6955_v26, %v3498_v29  ;;  %v3253_v39 = vadd.f32 %v6945_v18, %v2975_v21  ;;  %v3254_v40 = vadd.f32 %v6947_v19, %v2976_v22  ;;  %v2979_v22 = vld [vmem:[#allocation2 + $0x650] sm:$0xff]  ;;  %v2980_v27 = vld [vmem:[#allocation2 + $0x658] sm:$0xff]  ;;  %v7363_v28 = vpop.xlane.xlu0 %3848 }
 0x3b9   : > { %v4082_v42 = vadd.f32 %v4081_v31, %v3780_v13  ;;  %v4075_v43 = vadd.f32 %v3774_v33, %v3773_v32  ;;  %v3507_v44 = vmax.f32 %v3251_v30, 0.0  ;;  %v3508_v45 = vmax.f32 %v3252_v34, 0.0  ;;  %v2978_v13 = vld [vmem:[#allocation2 + $0x648] sm:$0xff] }
 0x3ba   : > { %v3509_v47 = vmax.f32 %v3253_v39, 0.0  ;;  %v3510_v48 = vmax.f32 %v3254_v40, 0.0  ;;  %v3247_v49 = vadd.f32 %v6941_v16, %v2969_v35  ;;  %v3248_v50 = vadd.f32 %v6943_v17, %v2970_v36  ;;  %v7366_v33 = vpop.xlane.xlu1 %3863 }
 0x3bb   : > { %4083 = vadd.xlane.f32.xlu1 %v4082_v42  ;;  %v4076_v51 = vadd.f32 %v4075_v43, %v3775_v37  ;;  %v3785_v52 = vmul.f32 %v6949_v23, %v3507_v44  ;;  %v3786_v53 = vmul.f32 %v6951_v24, %v3508_v45  ;;  %v3249_v54 = vadd.f32 %v6945_v18, %v2971_v41  ;;  %v2990_v43 = vld [vmem:[#allocation2 + $0x6a8] sm:$0xff] }
 0x3bc   : > { %v3787_v58 = vmul.f32 %v6953_v25, %v3509_v47  ;;  %v3788_v59 = vmul.f32 %v6955_v26, %v3510_v48  ;;  %v3250_v60 = vadd.f32 %v6947_v19, %v2972_v46  ;;  %v3503_v61 = vmax.f32 %v3247_v49, 0.0  ;;  %v2991_v48 = vld [vmem:[#allocation2 + $0x6b0] sm:$0xff]  ;;  %v2992_v49 = vld [vmem:[#allocation2 + $0x6b8] sm:$0xff] }
 0x3bd   : > { %v4077_v63 = vadd.f32 %v4076_v51, %v3776_v38  ;;  %v4090_v0 = vadd.f32 %v3786_v53, %v3785_v52  ;;  %v3504_v1 = vmax.f32 %v3248_v50, 0.0  ;;  %v3505_v2 = vmax.f32 %v3249_v54, 0.0  ;;  %v2989_v38 = vld [vmem:[#allocation2 + $0x6a0] sm:$0xff] }
 0x3be   : > { %v3506_v4 = vmax.f32 %v3250_v60, 0.0  ;;  %v3781_v5 = vmul.f32 %v6949_v23, %v3503_v61  ;;  %v3259_v6 = vadd.f32 %v6941_v16, %v2981_v55  ;;  %v3260_v7 = vadd.f32 %v6943_v17, %v2982_v56  ;;  %v2986_v60 = vld [vmem:[#allocation2 + $0x688] sm:$0xff]  ;;  %v7379_v61 = vpop.xlane.xlu0 %3853 }
 0x3bf   : > { %4078 = vadd.xlane.f32.xlu0 %v4077_v63  ;;  %v4091_v9 = vadd.f32 %v4090_v0, %v3787_v58  ;;  %v3782_v10 = vmul.f32 %v6951_v24, %v3504_v1  ;;  %v3783_v11 = vmul.f32 %v6953_v25, %v3505_v2  ;;  %v3261_v12 = vadd.f32 %v6945_v18, %v2983_v62  ;;  %v2987_v2 = vld [vmem:[#allocation2 + $0x690] sm:$0xff] }
 0x3c0   : > { %v3784_v14 = vmul.f32 %v6955_v26, %v3506_v4  ;;  %v3262_v15 = vadd.f32 %v6947_v19, %v2984_v3  ;;  %v3515_v20 = vmax.f32 %v3259_v6, 0.0  ;;  %v3516_v21 = vmax.f32 %v3260_v7, 0.0  ;;  %v7385_v3 = vpop.xlane.xlu1 %3873 }
 0x3c1   : > { %v4092_v29 = vadd.f32 %v4091_v9, %v3788_v59  ;;  %v4085_v30 = vadd.f32 %v3782_v10, %v3781_v5  ;;  %v3517_v31 = vmax.f32 %v3261_v12, 0.0  ;;  %v3255_v32 = vadd.f32 %v6941_v16, %v2977_v8  ;;  %v2985_v59 = vld [vmem:[#allocation2 + $0x680] sm:$0xff]  ;;  %v2988_v8 = vld [vmem:[#allocation2 + $0x698] sm:$0xff] }
 0x3c2   : > { %v3518_v34 = vmax.f32 %v3262_v15, 0.0  ;;  %v3793_v35 = vmul.f32 %v6949_v23, %v3515_v20  ;;  %v3794_v36 = vmul.f32 %v6951_v24, %v3516_v21  ;;  %v3256_v37 = vadd.f32 %v6943_v17, %v2978_v13  ;;  %v2997_v21 = vld [vmem:[#allocation2 + $0x6e0] sm:$0xff] }
 0x3c3   : > { %4093 = vadd.xlane.f32.xlu1 %v4092_v29  ;;  %v4086_v39 = vadd.f32 %v4085_v30, %v3783_v11  ;;  %v3795_v40 = vmul.f32 %v6953_v25, %v3517_v31  ;;  %v3257_v41 = vadd.f32 %v6945_v18, %v2979_v22  ;;  %v3258_v42 = vadd.f32 %v6947_v19, %v2980_v27  ;;  %v2998_v22 = vld [vmem:[#allocation2 + $0x6e8] sm:$0xff] }
 0x3c4   : > { %v3796_v44 = vmul.f32 %v6955_v26, %v3518_v34  ;;  %v4100_v45 = vadd.f32 %v3794_v36, %v3793_v35  ;;  %v3511_v46 = vmax.f32 %v3255_v32, 0.0  ;;  %v3512_v47 = vmax.f32 %v3256_v37, 0.0  ;;  %v2999_v32 = vld [vmem:[#allocation2 + $0x6f0] sm:$0xff] }
 0x3c5   : > { %v4087_v50 = vadd.f32 %v4086_v39, %v3784_v14  ;;  %v3513_v51 = vmax.f32 %v3257_v41, 0.0  ;;  %v3514_v52 = vmax.f32 %v3258_v42, 0.0  ;;  %v3267_v53 = vadd.f32 %v6941_v16, %v2989_v38  ;;  %v3000_v38 = vld [vmem:[#allocation2 + $0x6f8] sm:$0xff]  ;;  %v7395_v39 = vpop.xlane.xlu0 %3868 }
 0x3c6   : > { %v4101_v54 = vadd.f32 %v4100_v45, %v3795_v40  ;;  %v3789_v55 = vmul.f32 %v6949_v23, %v3511_v46  ;;  %v3790_v56 = vmul.f32 %v6951_v24, %v3512_v47  ;;  %v3268_v58 = vadd.f32 %v6943_v17, %v2990_v43  ;;  %v7400_v45 = vpop.xlane.xlu1 %3883 }
 0x3c7   : > { %4088 = vadd.xlane.f32.xlu0 %v4087_v50  ;;  %v3791_v62 = vmul.f32 %v6953_v25, %v3513_v51  ;;  %v3792_v63 = vmul.f32 %v6955_v26, %v3514_v52  ;;  %v3269_v0 = vadd.f32 %v6945_v18, %v2991_v48  ;;  %v3270_v1 = vadd.f32 %v6947_v19, %v2992_v49  ;;  %v2994_v50 = vld [vmem:[#allocation2 + $0x6c8] sm:$0xff] }
 0x3c8   : > { %v4102_v4 = vadd.f32 %v4101_v54, %v3796_v44  ;;  %v4095_v5 = vadd.f32 %v3790_v56, %v3789_v55  ;;  %v3523_v6 = vmax.f32 %v3267_v53, 0.0  ;;  %v3524_v7 = vmax.f32 %v3268_v58, 0.0  ;;  %v2993_v44 = vld [vmem:[#allocation2 + $0x6c0] sm:$0xff]  ;;  %v2995_v55 = vld [vmem:[#allocation2 + $0x6d0] sm:$0xff]  ;;  %v2996_v56 = vld [vmem:[#allocation2 + $0x6d8] sm:$0xff] }
 0x3c9   : > { %v3525_v9 = vmax.f32 %v3269_v0, 0.0  ;;  %v3526_v10 = vmax.f32 %v3270_v1, 0.0  ;;  %v3263_v11 = vadd.f32 %v6941_v16, %v2985_v59  ;;  %v3264_v12 = vadd.f32 %v6943_v17, %v2986_v60 }
 0x3ca   : > { %4103 = vadd.xlane.f32.xlu1 %v4102_v4  ;;  %v4096_v13 = vadd.f32 %v4095_v5, %v3791_v62  ;;  %v3801_v14 = vmul.f32 %v6949_v23, %v3523_v6  ;;  %v3802_v15 = vmul.f32 %v6951_v24, %v3524_v7  ;;  %v3265_v20 = vadd.f32 %v6945_v18, %v2987_v2  ;;  %v3005_v4 = vld [vmem:[#allocation2 + $0x720] sm:$0xff] }
 0x3cb   : > { %v3803_v27 = vmul.f32 %v6953_v25, %v3525_v9  ;;  %v3804_v29 = vmul.f32 %v6955_v26, %v3526_v10  ;;  %v3266_v30 = vadd.f32 %v6947_v19, %v2988_v8  ;;  %v3519_v31 = vmax.f32 %v3263_v11, 0.0  ;;  %v3006_v9 = vld [vmem:[#allocation2 + $0x728] sm:$0xff]  ;;  %v7414_v10 = vpop.xlane.xlu0 %3878 }
 0x3cc   : > { %v4097_v34 = vadd.f32 %v4096_v13, %v3792_v63  ;;  %v4110_v35 = vadd.f32 %v3802_v15, %v3801_v14  ;;  %v3520_v36 = vmax.f32 %v3264_v12, 0.0  ;;  %v3521_v37 = vmax.f32 %v3265_v20, 0.0  ;;  %v3007_v15 = vld [vmem:[#allocation2 + $0x730] sm:$0xff]  ;;  %v3008_v20 = vld [vmem:[#allocation2 + $0x738] sm:$0xff] }
 0x3cd   : > { %v3522_v40 = vmax.f32 %v3266_v30, 0.0  ;;  %v3797_v41 = vmul.f32 %v6949_v23, %v3519_v31  ;;  %v3275_v42 = vadd.f32 %v6941_v16, %v2997_v21  ;;  %v3276_v43 = vadd.f32 %v6943_v17, %v2998_v22  ;;  %v7417_v21 = vpop.xlane.xlu1 %3893 }
 0x3ce   : > { %4098 = vadd.xlane.f32.xlu0 %v4097_v34  ;;  %v4111_v46 = vadd.f32 %v4110_v35, %v3803_v27  ;;  %v3798_v47 = vmul.f32 %v6951_v24, %v3520_v36  ;;  %v3799_v48 = vmul.f32 %v6953_v25, %v3521_v37  ;;  %v3277_v49 = vadd.f32 %v6945_v18, %v2999_v32  ;;  %v3001_v36 = vld [vmem:[#allocation2 + $0x700] sm:$0xff]  ;;  %v3002_v37 = vld [vmem:[#allocation2 + $0x708] sm:$0xff] }
 0x3cf   : > { %v3800_v51 = vmul.f32 %v6955_v26, %v3522_v40  ;;  %v3278_v52 = vadd.f32 %v6947_v19, %v3000_v38  ;;  %v3531_v53 = vmax.f32 %v3275_v42, 0.0  ;;  %v3532_v54 = vmax.f32 %v3276_v43, 0.0  ;;  %v3003_v43 = vld [vmem:[#allocation2 + $0x710] sm:$0xff] }
 0x3d0   : > { %v4112_v58 = vadd.f32 %v4111_v46, %v3804_v29  ;;  %v4105_v59 = vadd.f32 %v3798_v47, %v3797_v41  ;;  %v3533_v60 = vmax.f32 %v3277_v49, 0.0  ;;  %v3271_v62 = vadd.f32 %v6941_v16, %v2993_v44  ;;  %v3004_v49 = vld [vmem:[#allocation2 + $0x718] sm:$0xff] }
 0x3d1   : > { %v3534_v63 = vmax.f32 %v3278_v52, 0.0  ;;  %v3809_v0 = vmul.f32 %v6949_v23, %v3531_v53  ;;  %v3810_v1 = vmul.f32 %v6951_v24, %v3532_v54  ;;  %v3272_v2 = vadd.f32 %v6943_v17, %v2994_v50  ;;  %v7429_v54 = vpop.xlane.xlu0 %3888 }
 0x3d2   : > { %4113 = vadd.xlane.f32.xlu1 %v4112_v58  ;;  %v4106_v5 = vadd.f32 %v4105_v59, %v3799_v48  ;;  %v3811_v6 = vmul.f32 %v6953_v25, %v3533_v60  ;;  %v3273_v7 = vadd.f32 %v6945_v18, %v2995_v55  ;;  %v3274_v8 = vadd.f32 %v6947_v19, %v2996_v56  ;;  %v3013_v60 = vld [vmem:[#allocation2 + $0x760] sm:$0xff] }
 0x3d3   : > { %v3812_v11 = vmul.f32 %v6955_v26, %v3534_v63  ;;  %v4120_v12 = vadd.f32 %v3810_v1, %v3809_v0  ;;  %v3527_v13 = vmax.f32 %v3271_v62, 0.0  ;;  %v3528_v14 = vmax.f32 %v3272_v2, 0.0  ;;  %v3014_v62 = vld [vmem:[#allocation2 + $0x768] sm:$0xff]  ;;  %v7434_v63 = vpop.xlane.xlu1 %3903 }
 0x3d4   : > { %v4107_v22 = vadd.f32 %v4106_v5, %v3800_v51  ;;  %v3529_v27 = vmax.f32 %v3273_v7, 0.0  ;;  %v3530_v29 = vmax.f32 %v3274_v8, 0.0  ;;  %v3283_v30 = vadd.f32 %v6941_v16, %v3005_v4  ;;  %v3015_v5 = vld [vmem:[#allocation2 + $0x770] sm:$0xff] }
 0x3d5   : > { %v4121_v31 = vadd.f32 %v4120_v12, %v3811_v6  ;;  %v3805_v32 = vmul.f32 %v6949_v23, %v3527_v13  ;;  %v3806_v34 = vmul.f32 %v6951_v24, %v3528_v14  ;;  %v3284_v35 = vadd.f32 %v6943_v17, %v3006_v9 }
 0x3d6   : > { %4108 = vadd.xlane.f32.xlu0 %v4107_v22  ;;  %v3807_v38 = vmul.f32 %v6953_v25, %v3529_v27  ;;  %v3808_v40 = vmul.f32 %v6955_v26, %v3530_v29  ;;  %v3285_v41 = vadd.f32 %v6945_v18, %v3007_v15  ;;  %v3286_v42 = vadd.f32 %v6947_v19, %v3008_v20  ;;  %v3009_v20 = vld [vmem:[#allocation2 + $0x740] sm:$0xff] }
 0x3d7   : > { %v4122_v44 = vadd.f32 %v4121_v31, %v3812_v11  ;;  %v4115_v46 = vadd.f32 %v3806_v34, %v3805_v32  ;;  %v3539_v47 = vmax.f32 %v3283_v30, 0.0  ;;  %v3540_v48 = vmax.f32 %v3284_v35, 0.0  ;;  %v3016_v11 = vld [vmem:[#allocation2 + $0x778] sm:$0xff]  ;;  %v3010_v31 = vld [vmem:[#allocation2 + $0x748] sm:$0xff] }
 0x3d8   : > { %v3541_v50 = vmax.f32 %v3285_v41, 0.0  ;;  %v3542_v51 = vmax.f32 %v3286_v42, 0.0  ;;  %v3279_v52 = vadd.f32 %v6941_v16, %v3001_v36  ;;  %v3280_v53 = vadd.f32 %v6943_v17, %v3002_v37  ;;  %v3011_v37 = vld [vmem:[#allocation2 + $0x750] sm:$0xff] }
 0x3d9   : > { %4123 = vadd.xlane.f32.xlu1 %v4122_v44  ;;  %v4116_v55 = vadd.f32 %v4115_v46, %v3807_v38  ;;  %v3817_v56 = vmul.f32 %v6949_v23, %v3539_v47  ;;  %v3818_v58 = vmul.f32 %v6951_v24, %v3540_v48  ;;  %v3281_v59 = vadd.f32 %v6945_v18, %v3003_v43  ;;  %v3012_v38 = vld [vmem:[#allocation2 + $0x758] sm:$0xff]  ;;  %v7450_v46 = vpop.xlane.xlu1 %3913 }
 0x3da   : > { %v3819_v0 = vmul.f32 %v6953_v25, %v3541_v50  ;;  %v3820_v1 = vmul.f32 %v6955_v26, %v3542_v51  ;;  %v3282_v2 = vadd.f32 %v6947_v19, %v3004_v49  ;;  %v3535_v4 = vmax.f32 %v3279_v52, 0.0  ;;  %v3021_v51 = vld [vmem:[#allocation2 + $0x7a0] sm:$0xff] }
 0x3db   : > { %v4117_v6 = vadd.f32 %v4116_v55, %v3808_v40  ;;  %v4130_v7 = vadd.f32 %v3818_v58, %v3817_v56  ;;  %v3536_v8 = vmax.f32 %v3280_v53, 0.0  ;;  %v3537_v9 = vmax.f32 %v3281_v59, 0.0  ;;  %v7447_v40 = vpop.xlane.xlu0 %3898  ;;  %v3022_v58 = vld [vmem:[#allocation2 + $0x7a8] sm:$0xff] }
 0x3dc   : > { %v3538_v12 = vmax.f32 %v3282_v2, 0.0  ;;  %v3813_v13 = vmul.f32 %v6949_v23, %v3535_v4  ;;  %v3291_v14 = vadd.f32 %v6941_v16, %v3013_v60  ;;  %v3292_v15 = vadd.f32 %v6943_v17, %v3014_v62  ;;  %v3024_v2 = vld [vmem:[#allocation2 + $0x7b8] sm:$0xff] }
 0x3dd   : > { %4118 = vadd.xlane.f32.xlu0 %v4117_v6  ;;  %v4131_v22 = vadd.f32 %v4130_v7, %v3819_v0  ;;  %v3814_v27 = vmul.f32 %v6951_v24, %v3536_v8  ;;  %v3815_v29 = vmul.f32 %v6953_v25, %v3537_v9  ;;  %v3293_v30 = vadd.f32 %v6945_v18, %v3015_v5 }
 0x3de   : > { %v3816_v32 = vmul.f32 %v6955_v26, %v3538_v12  ;;  %v3294_v34 = vadd.f32 %v6947_v19, %v3016_v11  ;;  %v3547_v35 = vmax.f32 %v3291_v14, 0.0  ;;  %v3548_v36 = vmax.f32 %v3292_v15, 0.0  ;;  %v3018_v14 = vld [vmem:[#allocation2 + $0x788] sm:$0xff] }
 0x3df   : > { %v4132_v41 = vadd.f32 %v4131_v22, %v3820_v1  ;;  %v4125_v42 = vadd.f32 %v3814_v27, %v3813_v13  ;;  %v3549_v43 = vmax.f32 %v3293_v30, 0.0  ;;  %v3287_v44 = vadd.f32 %v6941_v16, %v3009_v20  ;;  %v3023_v1 = vld [vmem:[#allocation2 + $0x7b0] sm:$0xff]  ;;  %v3017_v13 = vld [vmem:[#allocation2 + $0x780] sm:$0xff]  ;;  %v7463_v15 = vpop.xlane.xlu0 %3908 }
 0x3e0   : > { %v3550_v47 = vmax.f32 %v3294_v34, 0.0  ;;  %v3825_v48 = vmul.f32 %v6949_v23, %v3547_v35  ;;  %v3826_v49 = vmul.f32 %v6951_v24, %v3548_v36  ;;  %v3288_v50 = vadd.f32 %v6943_v17, %v3010_v31  ;;  %v3019_v30 = vld [vmem:[#allocation2 + $0x790] sm:$0xff]  ;;  %v7469_v31 = vpop.xlane.xlu1 %3923 }
 0x3e1   : > { %4133 = vadd.xlane.f32.xlu1 %v4132_v41  ;;  %v4126_v52 = vadd.f32 %v4125_v42, %v3815_v29  ;;  %v3827_v53 = vmul.f32 %v6953_v25, %v3549_v43  ;;  %v3289_v55 = vadd.f32 %v6945_v18, %v3011_v37  ;;  %v3290_v56 = vadd.f32 %v6947_v19, %v3012_v38  ;;  %v3020_v37 = vld [vmem:[#allocation2 + $0x798] sm:$0xff] }
 0x3e2   : > { %v3828_v59 = vmul.f32 %v6955_v26, %v3550_v47  ;;  %v4140_v60 = vadd.f32 %v3826_v49, %v3825_v48  ;;  %v3543_v62 = vmax.f32 %v3287_v44, 0.0  ;;  %v3544_v0 = vmax.f32 %v3288_v50, 0.0  ;;  %v3029_v50 = vld [vmem:[#allocation2 + $0x7e0] sm:$0xff] }
 0x3e3   : > { %v4127_v4 = vadd.f32 %v4126_v52, %v3816_v32  ;;  %v3545_v5 = vmax.f32 %v3289_v55, 0.0  ;;  %v3546_v6 = vmax.f32 %v3290_v56, 0.0  ;;  %v3299_v7 = vadd.f32 %v6941_v16, %v3021_v51  ;;  %v3030_v51 = vld [vmem:[#allocation2 + $0x7e8] sm:$0xff] }
 0x3e4   : > { %v4141_v8 = vadd.f32 %v4140_v60, %v3827_v53  ;;  %v3821_v9 = vmul.f32 %v6949_v23, %v3543_v62  ;;  %v3822_v11 = vmul.f32 %v6951_v24, %v3544_v0  ;;  %v3300_v12 = vadd.f32 %v6943_v17, %v3022_v58  ;;  %v3031_v58 = vld [vmem:[#allocation2 + $0x7f0] sm:$0xff] }
 0x3e5   : > { %4128 = vadd.xlane.f32.xlu0 %v4127_v4  ;;  %v3823_v20 = vmul.f32 %v6953_v25, %v3545_v5  ;;  %v3824_v22 = vmul.f32 %v6955_v26, %v3546_v6  ;;  %v3301_v27 = vadd.f32 %v6945_v18, %v3023_v1  ;;  %v3302_v29 = vadd.f32 %v6947_v19, %v3024_v2  ;;  %v3032_v1 = vld [vmem:[#allocation2 + $0x7f8] sm:$0xff]  ;;  %v7481_v2 = vpop.xlane.xlu0 %3918 }
 0x3e6   : > { %v4142_v32 = vadd.f32 %v4141_v8, %v3828_v59  ;;  %v4135_v34 = vadd.f32 %v3822_v11, %v3821_v9  ;;  %v3555_v35 = vmax.f32 %v3299_v7, 0.0  ;;  %v3556_v36 = vmax.f32 %v3300_v12, 0.0  ;;  %v3025_v8 = vld [vmem:[#allocation2 + $0x7c0] sm:$0xff]  ;;  %v7486_v9 = vpop.xlane.xlu1 %3933 }
 0x3e7   : > { %v3557_v38 = vmax.f32 %v3301_v27, 0.0  ;;  %v3558_v41 = vmax.f32 %v3302_v29, 0.0  ;;  %v3295_v42 = vadd.f32 %v6941_v16, %v3017_v13  ;;  %v3296_v43 = vadd.f32 %v6943_v17, %v3018_v14 }
 0x3e8   : > { %4143 = vadd.xlane.f32.xlu1 %v4142_v32  ;;  %v4136_v44 = vadd.f32 %v4135_v34, %v3823_v20  ;;  %v3833_v47 = vmul.f32 %v6949_v23, %v3555_v35  ;;  %v3834_v48 = vmul.f32 %v6951_v24, %v3556_v36  ;;  %v3297_v49 = vadd.f32 %v6945_v18, %v3019_v30  ;;  %v3026_v20 = vld [vmem:[#allocation2 + $0x7c8] sm:$0xff]  ;;  %v3027_v32 = vld [vmem:[#allocation2 + $0x7d0] sm:$0xff]  ;;  %v3028_v34 = vld [vmem:[#allocation2 + $0x7d8] sm:$0xff] }
 0x3e9   : > { %v3835_v52 = vmul.f32 %v6953_v25, %v3557_v38  ;;  %v3836_v53 = vmul.f32 %v6955_v26, %v3558_v41  ;;  %v3298_v55 = vadd.f32 %v6947_v19, %v3020_v37  ;;  %v3551_v56 = vmax.f32 %v3295_v42, 0.0 }
 0x3ea   : > { %v4137_v59 = vadd.f32 %v4136_v44, %v3824_v22  ;;  %v4150_v60 = vadd.f32 %v3834_v48, %v3833_v47  ;;  %v3552_v62 = vmax.f32 %v3296_v43, 0.0  ;;  %v3553_v0 = vmax.f32 %v3297_v49, 0.0 }
 0x3eb   : > { %v3554_v4 = vmax.f32 %v3298_v55, 0.0  ;;  %v3829_v5 = vmul.f32 %v6949_v23, %v3551_v56  ;;  %v3307_v6 = vadd.f32 %v6941_v16, %v3029_v50  ;;  %v3308_v7 = vadd.f32 %v6943_v17, %v3030_v51  ;;  %v7500_v51 = vpop.xlane.xlu0 %3928  ;;  %v7503_v56 = vpop.xlane.xlu1 %3943 }
 0x3ec   : > { %4138 = vadd.xlane.f32.xlu0 %v4137_v59  ;;  %v4151_v11 = vadd.f32 %v4150_v60, %v3835_v52  ;;  %v3830_v12 = vmul.f32 %v6951_v24, %v3552_v62  ;;  %v3831_v13 = vmul.f32 %v6953_v25, %v3553_v0  ;;  %v3309_v14 = vadd.f32 %v6945_v18, %v3031_v58 }
 0x3ed   : > { %v3832_v22 = vmul.f32 %v6955_v26, %v3554_v4  ;;  %v3310_v27 = vadd.f32 %v6947_v19, %v3032_v1  ;;  %v3563_v29 = vmax.f32 %v3307_v6, 0.0  ;;  %v3564_v30 = vmax.f32 %v3308_v7, 0.0 }
 0x3ee   : > { %v4152_v35 = vadd.f32 %v4151_v11, %v3836_v53  ;;  %v4145_v36 = vadd.f32 %v3830_v12, %v3829_v5  ;;  %v3565_v37 = vmax.f32 %v3309_v14, 0.0  ;;  %v3303_v38 = vadd.f32 %v6941_v16, %v3025_v8 }
 0x3ef   : > { %v3566_v41 = vmax.f32 %v3310_v27, 0.0  ;;  %v3841_v42 = vmul.f32 %v6949_v23, %v3563_v29  ;;  %v3842_v43 = vmul.f32 %v6951_v24, %v3564_v30  ;;  %v3304_v44 = vadd.f32 %v6943_v17, %v3026_v20  ;;  %v7528_v14 = vpop.xlane.xlu1 %3953 }
 0x3f0   : > { %4153 = vadd.xlane.f32.xlu1 %v4152_v35  ;;  %v4146_v47 = vadd.f32 %v4145_v36, %v3831_v13  ;;  %v3843_v48 = vmul.f32 %v6953_v25, %v3565_v37  ;;  %v3305_v49 = vadd.f32 %v6945_v18, %v3027_v32  ;;  %v3306_v50 = vadd.f32 %v6947_v19, %v3028_v34 }
 0x3f1   : > { %v3844_v16 = vmul.f32 %v6955_v26, %v3566_v41  ;;  %v4160_v52 = vadd.f32 %v3842_v43, %v3841_v42  ;;  %v3559_v53 = vmax.f32 %v3303_v38, 0.0  ;;  %v3560_v55 = vmax.f32 %v3304_v44, 0.0 }
 0x3f2   : > { %v4147_v58 = vadd.f32 %v4146_v47, %v3832_v22  ;;  %v3561_v59 = vmax.f32 %v3305_v49, 0.0  ;;  %v3562_v17 = vmax.f32 %v3306_v50, 0.0  ;;  %v7506_v60 = vstv %s7479_s24 }
 0x3f3   : > { %v4161_v62 = vadd.f32 %v4160_v52, %v3843_v48  ;;  %v3837_v0 = vmul.f32 %v6949_v23, %v3559_v53  ;;  %v3838_v18 = vmul.f32 %v6951_v24, %v3560_v55  ;;  %v4169_v4 = vadd.f32 %v7506_v60, %v7350_v57  ;;  %v7524_v57 = vpop.xlane.xlu0 %3938  ;;  %v7544_v36 = vpop.xlane.xlu1 %3963 }
 0x3f4   : > { %4148 = vadd.xlane.f32.xlu0 %v4147_v58  ;;  %v3839_v19 = vmul.f32 %v6953_v25, %v3561_v59  ;;  %v3840_v1 = vmul.f32 %v6955_v26, %v3562_v17  ;;  %v4167_v5 = vadd.f32 %v7506_v60, %v7363_v28  ;;  %v4170_v8 = vadd.f32 %v7506_v60, %v7366_v33 }
 0x3f5   : > { %v4162_v6 = vadd.f32 %v4161_v62, %v3844_v16  ;;  %v4155_v7 = vadd.f32 %v3838_v18, %v3837_v0  ;;  %v4168_v23 = vadd.f32 %v7506_v60, %v7379_v61  ;;  %v5309_v24 = vmul.f32 -1.442695, %v4169_v4 }
 0x3f6   : > { %v5307_v11 = vmul.f32 -1.442695, %v4167_v5  ;;  %v4172_v25 = vadd.f32 %v7506_v60, %v7385_v3  ;;  %v4171_v26 = vadd.f32 %v7506_v60, %v7395_v39  ;;  %v5310_v12 = vmul.f32 -1.442695, %v4170_v8 }
 0x3f7   : > { %4163 = vadd.xlane.f32.xlu1 %v4162_v6  ;;  %v4156_v28 = vadd.f32 %v4155_v7, %v3839_v19  ;;  %v5308_v13 = vmul.f32 -1.442695, %v4168_v23  ;;  %v4174_v33 = vadd.f32 %v7506_v60, %v7400_v45  ;;  %5692 = vpow2.f32 %v5309_v24 }
 0x3f8   : > { %v5312_v61 = vmul.f32 -1.442695, %v4172_v25  ;;  %v4173_v20 = vadd.f32 %v7506_v60, %v7414_v10  ;;  %5694 = vpow2.f32 %v5307_v11  ;;  %v5311_v22 = vmul.f32 -1.442695, %v4171_v26 }
 0x3f9   : > { %v4157_v3 = vadd.f32 %v4156_v28, %v3840_v1  ;;  %v4176_v39 = vadd.f32 %v7506_v60, %v7417_v21  ;;  %5696 = vpow2.f32 %v5310_v12  ;;  %v5314_v27 = vmul.f32 -1.442695, %v4174_v33  ;;  %v7542_v21 = vpop.xlane.xlu0 %3948 }
 0x3fa   : > { %v4175_v29 = vadd.f32 %v7506_v60, %v7429_v54  ;;  %v4178_v45 = vadd.f32 %v7506_v60, %v7434_v63  ;;  %5698 = vpow2.f32 %v5308_v13  ;;  %v5313_v30 = vmul.f32 -1.442695, %v4173_v20 }
 0x3fb   : > { %4158 = vadd.xlane.f32.xlu0 %v4157_v3  ;;  %v4177_v10 = vadd.f32 %v7506_v60, %v7447_v40  ;;  %5700 = vpow2.f32 %v5312_v61  ;;  %v5316_v32 = vmul.f32 -1.442695, %v4176_v39  ;;  %v4180_v34 = vadd.f32 %v7506_v60, %v7450_v46  ;;  %v7548_v46 = vpop.xlane.xlu1 %3973 }
 0x3fc   : > { %5702 = vpow2.f32 %v5311_v22  ;;  %v5315_v35 = vmul.f32 -1.442695, %v4175_v29  ;;  %v5318_v54 = vmul.f32 -1.442695, %v4178_v45  ;;  %v4179_v19 = vadd.f32 %v7506_v60, %v7463_v15 }
 0x3fd   : > { %5704 = vpow2.f32 %v5314_v27  ;;  %v5317_v63 = vmul.f32 -1.442695, %v4177_v10  ;;  %v5320_v37 = vmul.f32 -1.442695, %v4180_v34  ;;  %v7546_v40 = vpop.xlane.xlu0 %3958  ;;  %v4182_v5 = vadd.f32 %v7506_v60, %v7469_v31 }
 0x3fe   : > { %5706 = vpow2.f32 %v5313_v30  ;;  %v4181_v8 = vadd.f32 %v7506_v60, %v7481_v2  ;;  %v4184_v15 = vadd.f32 %v7506_v60, %v7486_v9  ;;  %v5319_v26 = vmul.f32 -1.442695, %v4179_v19 }
 0x3ff   : > { %5708 = vpow2.f32 %v5316_v32  ;;  %v7552_v62 = vpop.xlane.xlu1 %3983  ;;  %v4183_v31 = vadd.f32 %v7506_v60, %v7500_v51  ;;  %v5322_v13 = vmul.f32 -1.442695, %v4182_v5  ;;  %v4186_v33 = vadd.f32 %v7506_v60, %v7503_v56 }
 0x400   : > { %5710 = vpow2.f32 %v5315_v35  ;;  %v5321_v20 = vmul.f32 -1.442695, %v4181_v8  ;;  %v4185_v51 = vadd.f32 %v7506_v60, %v7524_v57  ;;  %v5324_v22 = vmul.f32 -1.442695, %v4184_v15 }
 0x401   : > { %v5693_v38 = vpop.eup %5692  ;;  %5712 = vpow2.f32 %v5318_v54  ;;  %v7550_v58 = vpop.xlane.xlu0 %3968  ;;  %v4188_v56 = vadd.f32 %v7506_v60, %v7528_v14  ;;  %v5323_v27 = vmul.f32 -1.442695, %v4183_v31  ;;  %v4187_v29 = vadd.f32 %v7506_v60, %v7542_v21 }
 0x402   : > { %v5695_v41 = vpop.eup %5694  ;;  %v4425_v42 = vadd.f32 1.0, %v5693_v38  ;;  %5714 = vpow2.f32 %v5317_v63  ;;  %v5326_v57 = vmul.f32 -1.442695, %v4186_v33  ;;  %v4190_v30 = vadd.f32 %v7506_v60, %v7544_v36 }
 0x403   : > { %v5697_v43 = vpop.eup %5696  ;;  %v4423_v44 = vadd.f32 1.0, %v5695_v41  ;;  %5716 = vpow2.f32 %v5320_v37  ;;  %v5325_v14 = vmul.f32 -1.442695, %v4185_v51  ;;  %v4189_v32 = vadd.f32 %v7506_v60, %v7546_v40 }
 0x404   : > { %v5699_v47 = vpop.eup %5698  ;;  %5718 = vrcp.f32 %v4425_v42  ;;  %v4426_v48 = vadd.f32 1.0, %v5697_v43  ;;  %v5328_v35 = vmul.f32 -1.442695, %v4188_v56  ;;  %v4192_v36 = vadd.f32 %v7506_v60, %v7548_v46 }
 0x405   : > { %v5701_v49 = vpop.eup %5700  ;;  %5720 = vrcp.f32 %v4423_v44  ;;  %v4424_v50 = vadd.f32 1.0, %v5699_v47  ;;  %v7564_v28 = vpop.xlane.xlu0 %3978  ;;  %v5327_v37 = vmul.f32 -1.442695, %v4187_v29  ;;  %v4191_v38 = vadd.f32 %v7506_v60, %v7550_v58 }
 0x406   : > { %v5703_v16 = vpop.eup %5702  ;;  %5722 = vrcp.f32 %v4426_v48  ;;  %v4428_v52 = vadd.f32 1.0, %v5701_v49  ;;  %v7568_v61 = vpop.xlane.xlu1 %3993  ;;  %v5330_v41 = vmul.f32 -1.442695, %v4190_v30  ;;  %v5329_v46 = vmul.f32 -1.442695, %v4189_v32 }
 0x407   : > { %v5705_v53 = vpop.eup %5704  ;;  %5724 = vrcp.f32 %v4424_v50  ;;  %v4427_v55 = vadd.f32 1.0, %v5703_v16  ;;  %v5332_v44 = vmul.f32 -1.442695, %v4192_v36  ;;  %v5331_v48 = vmul.f32 -1.442695, %v4191_v38 }
 0x408   : > { %v5707_v59 = vpop.eup %5706  ;;  %5726 = vrcp.f32 %v4428_v52  ;;  %v4430_v17 = vadd.f32 1.0, %v5705_v53  ;;  %v4196_v33 = vadd.f32 %v7506_v60, %v7568_v61 }
 0x409   : > { %v5709_v0 = vpop.eup %5708  ;;  %5728 = vrcp.f32 %v4427_v55  ;;  %v4429_v18 = vadd.f32 1.0, %v5707_v59  ;;  %v7590_v34 = vpop.xlane.xlu0 %3988 }
 0x40a   : > { %v5711_v1 = vpop.eup %5710  ;;  %5730 = vrcp.f32 %v4430_v17  ;;  %v4432_v4 = vadd.f32 1.0, %v5709_v0  ;;  %v5336_v30 = vmul.f32 -1.442695, %v4196_v33 }
 0x40b   : > { %v5713_v6 = vpop.eup %5712  ;;  %5732 = vrcp.f32 %v4429_v18  ;;  %v4431_v7 = vadd.f32 1.0, %v5711_v1 }
 0x40c   : > { %v5715_v23 = vpop.eup %5714  ;;  %5734 = vrcp.f32 %v4432_v4  ;;  %v4434_v24 = vadd.f32 1.0, %v5713_v6  ;;  %v7596_v54 = vpop.xlane.xlu1 %4003 }
 0x40d   : > { %v5717_v11 = vpop.eup %5716  ;;  %5736 = vrcp.f32 %v4431_v7  ;;  %v4433_v25 = vadd.f32 1.0, %v5715_v23 }
 0x40e   : > { %v5719_v12 = vpop.eup %5718  ;;  %5738 = vrcp.f32 %v4434_v24  ;;  %v4436_v2 = vadd.f32 1.0, %v5717_v11 }
 0x40f   : > { %v5721_v9 = vpop.eup %5720  ;;  %4618 = vst.msk [vmem:[%s6483_s18 + $0x10] sm:$0xff] %vm4615_vm0, %v5719_v12  ;;  %5740 = vrcp.f32 %v4433_v25  ;;  %v4194_v25 = vadd.f32 %v7506_v60, %v7552_v62  ;;  %v4193_v12 = vadd.f32 %v7506_v60, %v7564_v28  ;;  %v4195_v62 = vadd.f32 %v7506_v60, %v7590_v34 }
 0x410   : > { %v5723_v3 = vpop.eup %5722  ;;  %4616 = vst.msk [vmem:[%s6483_s18] sm:$0xff] %vm4615_vm0, %v5721_v9  ;;  %5742 = vrcp.f32 %v4436_v2  ;;  %v3999_v49 = vpop.xlane.xlu0 %3998 }
 0x411   : > { %v5725_v39 = vpop.eup %5724  ;;  %4619 = vst.msk [vmem:[%s6483_s18 + $0x18] sm:$0xff] %vm4615_vm0, %v5723_v3  ;;  %5744 = vpow2.f32 %v5319_v26  ;;  %v5334_v28 = vmul.f32 -1.442695, %v4194_v25  ;;  %v5333_v29 = vmul.f32 -1.442695, %v4193_v12 }
 0x412   : > { %v5727_v45 = vpop.eup %5726  ;;  %4617 = vst.msk [vmem:[%s6483_s18 + $0x8] sm:$0xff] %vm4615_vm0, %v5725_v39  ;;  %5746 = vpow2.f32 %v5322_v13  ;;  %v4198_v39 = vadd.f32 %v7506_v60, %v7596_v54  ;;  %v5335_v32 = vmul.f32 -1.442695, %v4195_v62 }
 0x413   : > { %v5729_v10 = vpop.eup %5728  ;;  %4621 = vst.msk [vmem:[%s6483_s18 + $0x28] sm:$0xff] %vm4615_vm0, %v5727_v45  ;;  %5748 = vpow2.f32 %v5321_v20  ;;  %v4197_v45 = vadd.f32 %v7506_v60, %v3999_v49 }
 0x414   : > { %v5731_v21 = vpop.eup %5730  ;;  %4620 = vst.msk [vmem:[%s6483_s18 + $0x20] sm:$0xff] %vm4615_vm0, %v5729_v10  ;;  %5750 = vpow2.f32 %v5324_v22  ;;  %v4014_v16 = vpop.xlane.xlu1 %4013 }
 0x415   : > { %v5733_v63 = vpop.eup %5732  ;;  %4623 = vst.msk [vmem:[%s6483_s18 + $0x38] sm:$0xff] %vm4615_vm0, %v5731_v21  ;;  %5752 = vpow2.f32 %v5323_v27  ;;  %v4200_v10 = vadd.f32 %v7506_v60, %v4014_v16 }
 0x416   : > { %v5735_v40 = vpop.eup %5734  ;;  %4622 = vst.msk [vmem:[%s6483_s18 + $0x30] sm:$0xff] %vm4615_vm0, %v5733_v63  ;;  %5754 = vpow2.f32 %v5326_v57 }
 0x417   : > { %v5737_v42 = vpop.eup %5736  ;;  %4625 = vst.msk [vmem:[%s6483_s18 + $0x48] sm:$0xff] %vm4615_vm0, %v5735_v40  ;;  %5756 = vpow2.f32 %v5325_v14 }
 0x418   : > { %v5739_v43 = vpop.eup %5738  ;;  %4624 = vst.msk [vmem:[%s6483_s18 + $0x40] sm:$0xff] %vm4615_vm0, %v5737_v42  ;;  %5758 = vpow2.f32 %v5328_v35  ;;  %v4009_v1 = vpop.xlane.xlu0 %4008  ;;  %v5338_v35 = vmul.f32 -1.442695, %v4198_v39  ;;  %v5340_v42 = vmul.f32 -1.442695, %v4200_v10 }
 0x419   : > { %v5741_v47 = vpop.eup %5740  ;;  %4627 = vst.msk [vmem:[%s6483_s18 + $0x58] sm:$0xff] %vm4615_vm0, %v5739_v43  ;;  %5760 = vpow2.f32 %v5327_v37  ;;  %v4199_v34 = vadd.f32 %v7506_v60, %v4009_v1  ;;  %v5337_v37 = vmul.f32 -1.442695, %v4197_v45 }
 0x41a   : > { %v5743_v50 = vpop.eup %5742  ;;  %4626 = vst.msk [vmem:[%s6483_s18 + $0x50] sm:$0xff] %vm4615_vm0, %v5741_v47  ;;  %5762 = vpow2.f32 %v5330_v41 }
 0x41b   : > { %v5745_v52 = vpop.eup %5744  ;;  %4629 = vst.msk [vmem:[%s6483_s18 + $0x68] sm:$0xff] %vm4615_vm0, %v5743_v50  ;;  %5764 = vpow2.f32 %v5329_v46  ;;  %v4024_v6 = vpop.xlane.xlu1 %4023 }
 0x41c   : > { %v5747_v53 = vpop.eup %5746  ;;  %v4435_v55 = vadd.f32 1.0, %v5745_v52  ;;  %5766 = vpow2.f32 %v5332_v44  ;;  %v4202_v36 = vadd.f32 %v7506_v60, %v4024_v6  ;;  %v5339_v44 = vmul.f32 -1.442695, %v4199_v34 }
 0x41d   : > { %v5749_v58 = vpop.eup %5748  ;;  %v4438_v59 = vadd.f32 1.0, %v5747_v53  ;;  %5768 = vpow2.f32 %v5331_v48 }
 0x41e   : > { %v5751_v17 = vpop.eup %5750  ;;  %5770 = vrcp.f32 %v4435_v55  ;;  %v4437_v0 = vadd.f32 1.0, %v5749_v58  ;;  %v5342_v49 = vmul.f32 -1.442695, %v4202_v36 }
 0x41f   : > { %v5753_v18 = vpop.eup %5752  ;;  %5772 = vrcp.f32 %v4438_v59  ;;  %v4440_v19 = vadd.f32 1.0, %v5751_v17  ;;  %v4019_v9 = vpop.xlane.xlu0 %4018 }
 0x420   : > { %v5755_v4 = vpop.eup %5754  ;;  %5774 = vrcp.f32 %v4437_v0  ;;  %v4439_v5 = vadd.f32 1.0, %v5753_v18  ;;  %v4201_v38 = vadd.f32 %v7506_v60, %v4019_v9 }
 0x421   : > { %v5757_v7 = vpop.eup %5756  ;;  %5776 = vrcp.f32 %v4440_v19  ;;  %v4442_v8 = vadd.f32 1.0, %v5755_v4 }
 0x422   : > { %v5759_v23 = vpop.eup %5758  ;;  %5778 = vrcp.f32 %v4439_v5  ;;  %v4441_v24 = vadd.f32 1.0, %v5757_v7  ;;  %v5341_v52 = vmul.f32 -1.442695, %v4201_v38 }
 0x423   : > { %v5761_v15 = vpop.eup %5760  ;;  %5780 = vrcp.f32 %v4442_v8  ;;  %v4444_v11 = vadd.f32 1.0, %v5759_v23  ;;  %v4034_v3 = vpop.xlane.xlu1 %4033 }
 0x424   : > { %v5763_v26 = vpop.eup %5762  ;;  %5782 = vrcp.f32 %v4441_v24  ;;  %v4443_v31 = vadd.f32 1.0, %v5761_v15  ;;  %v4204_v46 = vadd.f32 %v7506_v60, %v4034_v3 }
 0x425   : > { %v5765_v2 = vpop.eup %5764  ;;  %5784 = vrcp.f32 %v4444_v11  ;;  %v4446_v13 = vadd.f32 1.0, %v5763_v26 }
 0x426   : > { %v5767_v20 = vpop.eup %5766  ;;  %5786 = vrcp.f32 %v4443_v31  ;;  %v4445_v51 = vadd.f32 1.0, %v5765_v2  ;;  %v5344_v55 = vmul.f32 -1.442695, %v4204_v46 }
 0x427   : > { %v5769_v22 = vpop.eup %5768  ;;  %5788 = vrcp.f32 %v4446_v13  ;;  %v4448_v56 = vadd.f32 1.0, %v5767_v20  ;;  %v4029_v54 = vpop.xlane.xlu0 %4028 }
 0x428   : > { %v5771_v27 = vpop.eup %5770  ;;  %5790 = vrcp.f32 %v4445_v51  ;;  %v4447_v61 = vadd.f32 1.0, %v5769_v22  ;;  %v4203_v47 = vadd.f32 %v7506_v60, %v4029_v54 }
 0x429   : > { %v5773_v57 = vpop.eup %5772  ;;  %4628 = vst.msk [vmem:[%s6483_s18 + $0x60] sm:$0xff] %vm4615_vm0, %v5771_v27  ;;  %5792 = vrcp.f32 %v4448_v56 }
 0x42a   : > { %v5775_v14 = vpop.eup %5774  ;;  %4631 = vst.msk [vmem:[%s6483_s18 + $0x78] sm:$0xff] %vm4615_vm0, %v5773_v57  ;;  %5794 = vrcp.f32 %v4447_v61  ;;  %v4044_v40 = vpop.xlane.xlu1 %4043  ;;  %v5343_v59 = vmul.f32 -1.442695, %v4203_v47 }
 0x42b   : > { %v5777_v21 = vpop.eup %5776  ;;  %4630 = vst.msk [vmem:[%s6483_s18 + $0x70] sm:$0xff] %vm4615_vm0, %v5775_v14  ;;  %5796 = vpow2.f32 %v5334_v28  ;;  %v4206_v50 = vadd.f32 %v7506_v60, %v4044_v40 }
 0x42c   : > { %v5779_v63 = vpop.eup %5778  ;;  %4633 = vst.msk [vmem:[%s6483_s18 + $0x88] sm:$0xff] %vm4615_vm0, %v5777_v21  ;;  %5798 = vpow2.f32 %v5333_v29 }
 0x42d   : > { %v5781_v41 = vpop.eup %5780  ;;  %4632 = vst.msk [vmem:[%s6483_s18 + $0x80] sm:$0xff] %vm4615_vm0, %v5779_v63  ;;  %5800 = vpow2.f32 %v5336_v30  ;;  %v5346_v18 = vmul.f32 -1.442695, %v4206_v50 }
 0x42e   : > { %v5783_v43 = vpop.eup %5782  ;;  %4635 = vst.msk [vmem:[%s6483_s18 + $0x98] sm:$0xff] %vm4615_vm0, %v5781_v41  ;;  %5802 = vpow2.f32 %v5335_v32  ;;  %v4039_v17 = vpop.xlane.xlu0 %4038 }
 0x42f   : > { %v5785_v48 = vpop.eup %5784  ;;  %4634 = vst.msk [vmem:[%s6483_s18 + $0x90] sm:$0xff] %vm4615_vm0, %v5783_v43  ;;  %5804 = vpow2.f32 %v5338_v35  ;;  %v4205_v62 = vadd.f32 %v7506_v60, %v4039_v17 }
 0x430   : > { %v5787_v16 = vpop.eup %5786  ;;  %4637 = vst.msk [vmem:[%s6483_s18 + $0xa8] sm:$0xff] %vm4615_vm0, %v5785_v48  ;;  %5806 = vpow2.f32 %v5337_v37 }
 0x431   : > { %v5789_v53 = vpop.eup %5788  ;;  %4636 = vst.msk [vmem:[%s6483_s18 + $0xa0] sm:$0xff] %vm4615_vm0, %v5787_v16  ;;  %5808 = vpow2.f32 %v5340_v42  ;;  %v5345_v32 = vmul.f32 -1.442695, %v4205_v62 }
 0x432   : > { %v5791_v58 = vpop.eup %5790  ;;  %4639 = vst.msk [vmem:[%s6483_s18 + $0xb8] sm:$0xff] %vm4615_vm0, %v5789_v53  ;;  %5810 = vpow2.f32 %v5339_v44  ;;  %v4054_v1 = vpop.xlane.xlu1 %4053 }
 0x433   : > { %v5793_v0 = vpop.eup %5792  ;;  %4638 = vst.msk [vmem:[%s6483_s18 + $0xb0] sm:$0xff] %vm4615_vm0, %v5791_v58  ;;  %5812 = vpow2.f32 %v5342_v49  ;;  %v4208_v56 = vadd.f32 %v7506_v60, %v4054_v1 }
 0x434   : > { %v5795_v19 = vpop.eup %5794  ;;  %4641 = vst.msk [vmem:[%s6483_s18 + $0xc8] sm:$0xff] %vm4615_vm0, %v5793_v0  ;;  %5814 = vpow2.f32 %v5341_v52 }
 0x435   : > { %v5797_v4 = vpop.eup %5796  ;;  %4640 = vst.msk [vmem:[%s6483_s18 + $0xc0] sm:$0xff] %vm4615_vm0, %v5795_v19  ;;  %5816 = vpow2.f32 %v5344_v55  ;;  %v5348_v36 = vmul.f32 -1.442695, %v4208_v56 }
 0x436   : > { %v5799_v5 = vpop.eup %5798  ;;  %v4450_v6 = vadd.f32 1.0, %v5797_v4  ;;  %5818 = vpow2.f32 %v5343_v59  ;;  %v4049_v15 = vpop.xlane.xlu0 %4048 }
 0x437   : > { %v5801_v7 = vpop.eup %5800  ;;  %v4449_v8 = vadd.f32 1.0, %v5799_v5  ;;  %5820 = vpow2.f32 %v5346_v18  ;;  %v4207_v61 = vadd.f32 %v7506_v60, %v4049_v15 }
 0x438   : > { %v5803_v23 = vpop.eup %5802  ;;  %5822 = vrcp.f32 %v4450_v6  ;;  %v4452_v24 = vadd.f32 1.0, %v5801_v7 }
 0x439   : > { %v5805_v11 = vpop.eup %5804  ;;  %5824 = vrcp.f32 %v4449_v8  ;;  %v4451_v25 = vadd.f32 1.0, %v5803_v23  ;;  %v4064_v12 = vpop.xlane.xlu1 %4063  ;;  %v5347_v37 = vmul.f32 -1.442695, %v4207_v61 }
 0x43a   : > { %v5807_v26 = vpop.eup %5806  ;;  %5826 = vrcp.f32 %v4452_v24  ;;  %v4454_v31 = vadd.f32 1.0, %v5805_v11  ;;  %v4210_v57 = vadd.f32 %v7506_v60, %v4064_v12 }
 0x43b   : > { %v5809_v2 = vpop.eup %5808  ;;  %5828 = vrcp.f32 %v4451_v25  ;;  %v4453_v13 = vadd.f32 1.0, %v5807_v26 }
 0x43c   : > { %v5811_v33 = vpop.eup %5810  ;;  %5830 = vrcp.f32 %v4454_v31  ;;  %v4456_v9 = vadd.f32 1.0, %v5809_v2  ;;  %v5350_v40 = vmul.f32 -1.442695, %v4210_v57 }
 0x43d   : > { %v5813_v20 = vpop.eup %5812  ;;  %5832 = vrcp.f32 %v4453_v13  ;;  %v4455_v51 = vadd.f32 1.0, %v5811_v33  ;;  %v4059_v28 = vpop.xlane.xlu0 %4058 }
 0x43e   : > { %v5815_v3 = vpop.eup %5814  ;;  %5834 = vrcp.f32 %v4456_v9  ;;  %v4458_v22 = vadd.f32 1.0, %v5813_v20  ;;  %v4209_v34 = vadd.f32 %v7506_v60, %v4059_v28 }
 0x43f   : > { %v5817_v39 = vpop.eup %5816  ;;  %5836 = vrcp.f32 %v4455_v51  ;;  %v4457_v27 = vadd.f32 1.0, %v5815_v3 }
 0x440   : > { %v5819_v29 = vpop.eup %5818  ;;  %5838 = vrcp.f32 %v4458_v22  ;;  %v4460_v45 = vadd.f32 1.0, %v5817_v39  ;;  %v5349_v46 = vmul.f32 -1.442695, %v4209_v34 }
 0x441   : > { %v4074_v30 = vpop.xlane.xlu1 %4073  ;;  %v5821_v10 = vpop.eup %5820  ;;  %5840 = vrcp.f32 %v4457_v27  ;;  %v4459_v14 = vadd.f32 1.0, %v5819_v29 }
 0x442   : > { %v5823_v21 = vpop.eup %5822  ;;  %5842 = vrcp.f32 %v4460_v45  ;;  %v4462_v35 = vadd.f32 1.0, %v5821_v10  ;;  %v4212_v54 = vadd.f32 %v7506_v60, %v4074_v30 }
 0x443   : > { %v5825_v63 = vpop.eup %5824  ;;  %4643 = vst.msk [vmem:[%s6483_s18 + $0xd8] sm:$0xff] %vm4615_vm0, %v5823_v21  ;;  %5844 = vrcp.f32 %v4459_v14 }
 0x444   : > { %v5827_v38 = vpop.eup %5826  ;;  %4642 = vst.msk [vmem:[%s6483_s18 + $0xd0] sm:$0xff] %vm4615_vm0, %v5825_v63  ;;  %5846 = vrcp.f32 %v4462_v35  ;;  %v5352_v47 = vmul.f32 -1.442695, %v4212_v54 }
 0x445   : > { %v4069_v41 = vpop.xlane.xlu0 %4068  ;;  %v5829_v42 = vpop.eup %5828  ;;  %4645 = vst.msk [vmem:[%s6483_s18 + $0xe8] sm:$0xff] %vm4615_vm0, %v5827_v38  ;;  %5848 = vpow2.f32 %v5345_v32 }
 0x446   : > { %v4211_v43 = vadd.f32 %v7506_v60, %v4069_v41  ;;  %v5831_v44 = vpop.eup %5830  ;;  %4644 = vst.msk [vmem:[%s6483_s18 + $0xe0] sm:$0xff] %vm4615_vm0, %v5829_v42  ;;  %5850 = vpow2.f32 %v5348_v36 }
 0x447   : > { %v5833_v48 = vpop.eup %5832  ;;  %4647 = vst.msk [vmem:[%s6483_s18 + $0xf8] sm:$0xff] %vm4615_vm0, %v5831_v44  ;;  %5852 = vpow2.f32 %v5347_v37 }
 0x448   : > { %v5351_v49 = vmul.f32 -1.442695, %v4211_v43  ;;  %v4084_v50 = vpop.xlane.xlu1 %4083  ;;  %v5835_v16 = vpop.eup %5834  ;;  %4646 = vst.msk [vmem:[%s6483_s18 + $0xf0] sm:$0xff] %vm4615_vm0, %v5833_v48  ;;  %5854 = vpow2.f32 %v5350_v40 }
 0x449   : > { %v4214_v52 = vadd.f32 %v7506_v60, %v4084_v50  ;;  %v5837_v53 = vpop.eup %5836  ;;  %4649 = vst.msk [vmem:[%s6483_s18 + $0x108] sm:$0xff] %vm4615_vm0, %v5835_v16  ;;  %5856 = vpow2.f32 %v5349_v46 }
 0x44a   : > { %v5839_v55 = vpop.eup %5838  ;;  %4648 = vst.msk [vmem:[%s6483_s18 + $0x100] sm:$0xff] %vm4615_vm0, %v5837_v53  ;;  %5858 = vpow2.f32 %v5352_v47 }
 0x44b   : > { %v5354_v58 = vmul.f32 -1.442695, %v4214_v52  ;;  %v5841_v59 = vpop.eup %5840  ;;  %4651 = vst.msk [vmem:[%s6483_s18 + $0x118] sm:$0xff] %vm4615_vm0, %v5839_v55  ;;  %5860 = vpow2.f32 %v5351_v49 }
 0x44c   : > { %v4079_v17 = vpop.xlane.xlu0 %4078  ;;  %v5843_v0 = vpop.eup %5842  ;;  %4650 = vst.msk [vmem:[%s6483_s18 + $0x110] sm:$0xff] %vm4615_vm0, %v5841_v59 }
 0x44d   : > { %5862 = vpow2.f32 %v5354_v58  ;;  %v4213_v18 = vadd.f32 %v7506_v60, %v4079_v17  ;;  %v5845_v19 = vpop.eup %5844  ;;  %4653 = vst.msk [vmem:[%s6483_s18 + $0x128] sm:$0xff] %vm4615_vm0, %v5843_v0 }
 0x44e   : > { %v5847_v1 = vpop.eup %5846  ;;  %4652 = vst.msk [vmem:[%s6483_s18 + $0x120] sm:$0xff] %vm4615_vm0, %v5845_v19 }
 0x44f   : > { %v5353_v4 = vmul.f32 -1.442695, %v4213_v18  ;;  %v5849_v5 = vpop.eup %5848  ;;  %4655 = vst.msk [vmem:[%s6483_s18 + $0x138] sm:$0xff] %vm4615_vm0, %v5847_v1 }
 0x450   : > { %v4094_v6 = vpop.xlane.xlu1 %4093  ;;  %v5851_v7 = vpop.eup %5850  ;;  %v4461_v8 = vadd.f32 1.0, %v5849_v5 }
 0x451   : > { %5864 = vpow2.f32 %v5353_v4  ;;  %v5853_v23 = vpop.eup %5852  ;;  %v4464_v24 = vadd.f32 1.0, %v5851_v7  ;;  %v4216_v25 = vadd.f32 %v7506_v60, %v4094_v6 }
 0x452   : > { %v5855_v15 = vpop.eup %5854  ;;  %5866 = vrcp.f32 %v4461_v8  ;;  %v4463_v11 = vadd.f32 1.0, %v5853_v23 }
 0x453   : > { %v5857_v26 = vpop.eup %5856  ;;  %5868 = vrcp.f32 %v4464_v24  ;;  %v4466_v31 = vadd.f32 1.0, %v5855_v15  ;;  %v5356_v3 = vmul.f32 -1.442695, %v4216_v25 }
 0x454   : > { %v4089_v12 = vpop.xlane.xlu0 %4088  ;;  %v5859_v2 = vpop.eup %5858  ;;  %5870 = vrcp.f32 %v4463_v11  ;;  %v4465_v13 = vadd.f32 1.0, %v5857_v26 }
 0x455   : > { %v4215_v33 = vadd.f32 %v7506_v60, %v4089_v12  ;;  %v5861_v9 = vpop.eup %5860  ;;  %5872 = vrcp.f32 %v4466_v31  ;;  %v4468_v20 = vadd.f32 1.0, %v5859_v2 }
 0x456   : > { %5874 = vrcp.f32 %v4465_v13  ;;  %v4467_v62 = vadd.f32 1.0, %v5861_v9 }
 0x457   : > { %v5863_v51 = vpop.eup %5862  ;;  %v4104_v22 = vpop.xlane.xlu1 %4103  ;;  %5876 = vrcp.f32 %v4468_v20  ;;  %v5355_v28 = vmul.f32 -1.442695, %v4215_v33 }
 0x458   : > { %v4470_v56 = vadd.f32 1.0, %v5863_v51  ;;  %v4218_v39 = vadd.f32 %v7506_v60, %v4104_v22  ;;  %5878 = vrcp.f32 %v4467_v62 }
 0x45a   : > { %5880 = vrcp.f32 %v4470_v56  ;;  %v5358_v27 = vmul.f32 -1.442695, %v4218_v39 }
 0x45b   : > { %v5865_v61 = vpop.eup %5864  ;;  %5882 = vpow2.f32 %v5356_v3  ;;  %v4099_v29 = vpop.xlane.xlu0 %4098 }
 0x45c   : > { %v4469_v45 = vadd.f32 1.0, %v5865_v61  ;;  %5884 = vpow2.f32 %v5355_v28  ;;  %v4217_v57 = vadd.f32 %v7506_v60, %v4099_v29  ;;  %v5867_v30 = vpop.eup %5866 }
 0x45d   : > { %5886 = vpow2.f32 %v5358_v27  ;;  %v5869_v10 = vpop.eup %5868  ;;  %4654 = vst.msk [vmem:[%s6483_s18 + $0x130] sm:$0xff] %vm4615_vm0, %v5867_v30 }
 0x45e   : > { %5888 = vrcp.f32 %v4469_v45  ;;  %v5357_v14 = vmul.f32 -1.442695, %v4217_v57  ;;  %v5871_v32 = vpop.eup %5870  ;;  %4657 = vst.msk [vmem:[%s6483_s18 + $0x148] sm:$0xff] %vm4615_vm0, %v5869_v10 }
 0x45f   : > { %v4114_v34 = vpop.xlane.xlu1 %4113  ;;  %v5873_v21 = vpop.eup %5872  ;;  %4656 = vst.msk [vmem:[%s6483_s18 + $0x140] sm:$0xff] %vm4615_vm0, %v5871_v32 }
 0x460   : > { %5890 = vpow2.f32 %v5357_v14  ;;  %v4220_v35 = vadd.f32 %v7506_v60, %v4114_v34  ;;  %v5875_v36 = vpop.eup %5874  ;;  %4659 = vst.msk [vmem:[%s6483_s18 + $0x158] sm:$0xff] %vm4615_vm0, %v5873_v21 }
 0x461   : > { %v5877_v54 = vpop.eup %5876  ;;  %4658 = vst.msk [vmem:[%s6483_s18 + $0x150] sm:$0xff] %vm4615_vm0, %v5875_v36 }
 0x462   : > { %v5360_v63 = vmul.f32 -1.442695, %v4220_v35  ;;  %v5879_v37 = vpop.eup %5878  ;;  %4661 = vst.msk [vmem:[%s6483_s18 + $0x168] sm:$0xff] %vm4615_vm0, %v5877_v54 }
 0x463   : > { %v4109_v38 = vpop.xlane.xlu0 %4108  ;;  %4660 = vst.msk [vmem:[%s6483_s18 + $0x160] sm:$0xff] %vm4615_vm0, %v5879_v37 }
 0x464   : > { %v5881_v40 = vpop.eup %5880  ;;  %5892 = vpow2.f32 %v5360_v63  ;;  %v4219_v41 = vadd.f32 %v7506_v60, %v4109_v38 }
 0x465   : > { %v5883_v42 = vpop.eup %5882  ;;  %4663 = vst.msk [vmem:[%s6483_s18 + $0x178] sm:$0xff] %vm4615_vm0, %v5881_v40 }
 0x466   : > { %v5885_v46 = vpop.eup %5884  ;;  %v4472_v43 = vadd.f32 1.0, %v5883_v42  ;;  %v4124_v44 = vpop.xlane.xlu1 %4123  ;;  %v5359_v49 = vmul.f32 -1.442695, %v4219_v41 }
 0x467   : > { %v5887_v47 = vpop.eup %5886  ;;  %v4471_v48 = vadd.f32 1.0, %v5885_v46  ;;  %v4222_v50 = vadd.f32 %v7506_v60, %v4124_v44 }
 0x468   : > { %v5889_v16 = vpop.eup %5888  ;;  %5894 = vrcp.f32 %v4472_v43  ;;  %v4474_v52 = vadd.f32 1.0, %v5887_v47 }
 0x469   : > { %4662 = vst.msk [vmem:[%s6483_s18 + $0x170] sm:$0xff] %vm4615_vm0, %v5889_v16  ;;  %5896 = vrcp.f32 %v4471_v48  ;;  %v5362_v53 = vmul.f32 -1.442695, %v4222_v50 }
 0x46a   : > { %v5891_v55 = vpop.eup %5890  ;;  %5898 = vrcp.f32 %v4474_v52  ;;  %v4119_v58 = vpop.xlane.xlu0 %4118 }
 0x46b   : > { %v4473_v59 = vadd.f32 1.0, %v5891_v55  ;;  %5900 = vpow2.f32 %v5359_v49  ;;  %v4221_v17 = vadd.f32 %v7506_v60, %v4119_v58 }
 0x46c   : > { %5902 = vpow2.f32 %v5362_v53 }
 0x46d   : > { %5904 = vrcp.f32 %v4473_v59  ;;  %v5361_v0 = vmul.f32 -1.442695, %v4221_v17 }
 0x46e   : > { %v5893_v18 = vpop.eup %5892  ;;  %v4134_v19 = vpop.xlane.xlu1 %4133 }
 0x46f   : > { %v4476_v1 = vadd.f32 1.0, %v5893_v18  ;;  %5906 = vpow2.f32 %v5361_v0  ;;  %v4224_v4 = vadd.f32 %v7506_v60, %v4134_v19 }
 0x471   : > { %5908 = vrcp.f32 %v4476_v1  ;;  %v5364_v5 = vmul.f32 -1.442695, %v4224_v4 }
 0x472   : > { %v5895_v6 = vpop.eup %5894  ;;  %v4129_v7 = vpop.xlane.xlu0 %4128 }
 0x473   : > { %v5897_v8 = vpop.eup %5896  ;;  %4665 = vst.msk [vmem:[%s6483_s18 + $0x188] sm:$0xff] %vm4615_vm0, %v5895_v6  ;;  %5910 = vpow2.f32 %v5364_v5  ;;  %v4223_v23 = vadd.f32 %v7506_v60, %v4129_v7 }
 0x474   : > { %v5899_v24 = vpop.eup %5898  ;;  %4664 = vst.msk [vmem:[%s6483_s18 + $0x180] sm:$0xff] %vm4615_vm0, %v5897_v8 }
 0x475   : > { %v5901_v15 = vpop.eup %5900  ;;  %4667 = vst.msk [vmem:[%s6483_s18 + $0x198] sm:$0xff] %vm4615_vm0, %v5899_v24  ;;  %v5363_v11 = vmul.f32 -1.442695, %v4223_v23  ;;  %v4144_v25 = vpop.xlane.xlu1 %4143 }
 0x476   : > { %v5903_v26 = vpop.eup %5902  ;;  %v4475_v31 = vadd.f32 1.0, %v5901_v15  ;;  %v4226_v12 = vadd.f32 %v7506_v60, %v4144_v25 }
 0x477   : > { %v5905_v2 = vpop.eup %5904  ;;  %v4478_v13 = vadd.f32 1.0, %v5903_v26  ;;  %5912 = vpow2.f32 %v5363_v11 }
 0x478   : > { %4666 = vst.msk [vmem:[%s6483_s18 + $0x190] sm:$0xff] %vm4615_vm0, %v5905_v2  ;;  %5914 = vrcp.f32 %v4475_v31  ;;  %v5366_v33 = vmul.f32 -1.442695, %v4226_v12 }
 0x479   : > { %v5907_v9 = vpop.eup %5906  ;;  %5916 = vrcp.f32 %v4478_v13  ;;  %v4139_v20 = vpop.xlane.xlu0 %4138 }
 0x47a   : > { %v4477_v51 = vadd.f32 1.0, %v5907_v9  ;;  %5918 = vpow2.f32 %v5366_v33  ;;  %v4225_v62 = vadd.f32 %v7506_v60, %v4139_v20 }
 0x47b   : > { %v5909_v3 = vpop.eup %5908 }
 0x47c   : > { %4669 = vst.msk [vmem:[%s6483_s18 + $0x1a8] sm:$0xff] %vm4615_vm0, %v5909_v3  ;;  %5920 = vrcp.f32 %v4477_v51  ;;  %v5365_v22 = vmul.f32 -1.442695, %v4225_v62 }
 0x47d   : > { %v5911_v56 = vpop.eup %5910  ;;  %v4154_v28 = vpop.xlane.xlu1 %4153 }
 0x47e   : > { %v4480_v39 = vadd.f32 1.0, %v5911_v56  ;;  %5922 = vpow2.f32 %v5365_v22  ;;  %v4228_v27 = vadd.f32 %v7506_v60, %v4154_v28 }
 0x480   : > { %5924 = vrcp.f32 %v4480_v39  ;;  %v5368_v61 = vmul.f32 -1.442695, %v4228_v27 }
 0x481   : > { %v5913_v29 = vpop.eup %5912  ;;  %v4149_v45 = vpop.xlane.xlu0 %4148 }
 0x482   : > { %v5915_v57 = vpop.eup %5914  ;;  %v4479_v30 = vadd.f32 1.0, %v5913_v29  ;;  %5926 = vpow2.f32 %v5368_v61  ;;  %v4227_v10 = vadd.f32 %v7506_v60, %v4149_v45 }
 0x483   : > { %v5917_v14 = vpop.eup %5916  ;;  %4668 = vst.msk [vmem:[%s6483_s18 + $0x1a0] sm:$0xff] %vm4615_vm0, %v5915_v57 }
 0x484   : > { %v5919_v32 = vpop.eup %5918  ;;  %4671 = vst.msk [vmem:[%s6483_s18 + $0x1b8] sm:$0xff] %vm4615_vm0, %v5917_v14  ;;  %5928 = vrcp.f32 %v4479_v30  ;;  %v5367_v34 = vmul.f32 -1.442695, %v4227_v10  ;;  %v4164_v21 = vpop.xlane.xlu1 %4163 }
 0x485   : > { %v4482_v35 = vadd.f32 1.0, %v5919_v32  ;;  %v4230_v36 = vadd.f32 %v7506_v60, %v4164_v21 }
 0x486   : > { %v5921_v54 = vpop.eup %5920  ;;  %5930 = vpow2.f32 %v5367_v34 }
 0x487   : > { %4670 = vst.msk [vmem:[%s6483_s18 + $0x1b0] sm:$0xff] %vm4615_vm0, %v5921_v54  ;;  %5932 = vrcp.f32 %v4482_v35  ;;  %v5370_v63 = vmul.f32 -1.442695, %v4230_v36 }
 0x488   : > { %v5923_v37 = vpop.eup %5922  ;;  %v4159_v38 = vpop.xlane.xlu0 %4158 }
 0x489   : > { %v4481_v40 = vadd.f32 1.0, %v5923_v37  ;;  %5934 = vpow2.f32 %v5370_v63  ;;  %v4229_v41 = vadd.f32 %v7506_v60, %v4159_v38 }
 0x48a   : > { %v5925_v42 = vpop.eup %5924 }
 0x48b   : > { %4673 = vst.msk [vmem:[%s6483_s18 + $0x1c8] sm:$0xff] %vm4615_vm0, %v5925_v42  ;;  %5936 = vrcp.f32 %v4481_v40  ;;  %v5369_v46 = vmul.f32 -1.442695, %v4229_v41 }
 0x48c   : > { %v5927_v43 = vpop.eup %5926 }
 0x48d   : > { %v4484_v44 = vadd.f32 1.0, %v5927_v43  ;;  %5938 = vpow2.f32 %v5369_v46 }
 0x48e   : > { %v5929_v47 = vpop.eup %5928 }
 0x48f   : > { %4672 = vst.msk [vmem:[%s6483_s18 + $0x1c0] sm:$0xff] %vm4615_vm0, %v5929_v47  ;;  %5940 = vrcp.f32 %v4484_v44 }
 0x490   : > { %v5931_v48 = vpop.eup %5930 }
 0x491   : > { %v5933_v49 = vpop.eup %5932  ;;  %v4483_v50 = vadd.f32 1.0, %v5931_v48 }
 0x492   : > { %4675 = vst.msk [vmem:[%s6483_s18 + $0x1d8] sm:$0xff] %vm4615_vm0, %v5933_v49 }
 0x493   : > { %v5935_v60 = vpop.eup %5934  ;;  %5942 = vrcp.f32 %v4483_v50 }
 0x494   : > { %v4486_v16 = vadd.f32 1.0, %v5935_v60 }
 0x495   : > { %v5937_v52 = vpop.eup %5936 }
 0x496   : > { %4674 = vst.msk [vmem:[%s6483_s18 + $0x1d0] sm:$0xff] %vm4615_vm0, %v5937_v52  ;;  %5944 = vrcp.f32 %v4486_v16 }
 0x497   : > { %v5939_v53 = vpop.eup %5938 }
 0x498   : > { %v4485_v55 = vadd.f32 1.0, %v5939_v53 }
 0x499   : > { %v5941_v58 = vpop.eup %5940 }
 0x49a   : > { %4677 = vst.msk [vmem:[%s6483_s18 + $0x1e8] sm:$0xff] %vm4615_vm0, %v5941_v58  ;;  %5946 = vrcp.f32 %v4485_v55 }
 0x49d   : > { %v5943_v59 = vpop.eup %5942 }
 0x49e   : > { %4676 = vst.msk [vmem:[%s6483_s18 + $0x1e0] sm:$0xff] %vm4615_vm0, %v5943_v59 }
 0x4a0   : > { %v5945_v17 = vpop.eup %5944 }
 0x4a1   : > { %4679 = vst.msk [vmem:[%s6483_s18 + $0x1f8] sm:$0xff] %vm4615_vm0, %v5945_v17 }
 0x4a4   : > { %v5947_v0 = vpop.eup %5946 }
 0x4a5   : > { %4678 = vst.msk [vmem:[%s6483_s18 + $0x1f0] sm:$0xff] %vm4615_vm0, %v5947_v0 }
 0x4a6 PF: > { %4686 = sbr.rel (!%p6250_p9) target bundleno = 1269 (0x4f5), region = 82  ;;  %s5372_s29 = sshll.u32 (%p6250_p9), %s6070_s25, 6 }
 0x4a7   : > { %s5391_s19 = sshll.u32 (%p6250_p9), %s6070_s25, 9  ;;  %s4688_s11 = ssub.s32 (%p6250_p9), 75, %s5372_s29 }
 0x4a8   : > { %s7766_s7 = scalar_lea.vmem (%p6250_p9), %s7987_s5, %s5391_s19   ;;  %p4689_p12 = scmp.lt.s32.totalorder (%p6250_p9), %s4688_s11, 64 }
 0x4ad   : > { %s8031_s11 = smov (!%p4689_p12, %s4688_s11), 64 }
 0x4ae   : > { %s5373_s9 = sshll.u32 %s8031_s11, 7 }
 0x4af   : > { %p5376_p13 = scmp.eq.s32.totalorder %s5373_s9, 0 }
 0x4b0   : > { %s7772_s12 = sshrl.u32 (!%p5376_p13), %s8031_s11, 6 }
 0x4b1   : > { %4697 = sbr.rel (%p5376_p13) target bundleno = 1269 (0x4f5), region = 86  ;;  %p5377_p9 = scmp.le.s32.totalorder (!%p5376_p13), %s7772_s12, 0 }
 0x4b8   : > { %5154 = sbr.rel (%p5377_p9) target bundleno = 1248 (0x4e0), region = 194  ;;  %s8001_s25 = smov (!%p5377_p9), %s7766_s7 }
 0x4b9   : > { %s8002_s4 = smov (!%p5377_p9), %s6483_s18  ;;  %s7781_s8 = smov (!%p5377_p9), 0  }
 0x4ba   : > { %s7783_s10 = smov (!%p5377_p9), 0  }
 0x4bf LB: >> { %v4885_v18 = vld [vmem:[%s6122_s4] sm:$0xff]  ;;  %v4887_v19 = vld [vmem:[%s6122_s4 + $0x8] sm:$0xff]  ;;  %v4889_v1 = vld [vmem:[%s6122_s4 + $0x10] sm:$0xff]  ;;  %s5013_s6 = sadd.s32 1, %s6126_s8  ;;  %s4879_s10 = sadd.s32 1, %s6130_s10   ;;  %s6130_s10 = sphi %s7783_s10, %s4879_s10   ;;  %s6126_s8 = sphi %s7781_s8, %s8005_s8   ;;  %s6122_s4 = sphi %s8002_s4, %s8004_s4   ;;  %s6118_s25 = sphi %s8001_s25, %s8003_s25  }
 0x4c0   : >> { %4886 = vst [vmem:[%s6118_s25] sm:$0xff] %v4885_v18  ;;  %4888 = vst [vmem:[%s6118_s25 + $0x8] sm:$0xff] %v4887_v19  ;;  %v4891_v4 = vld [vmem:[%s6122_s4 + $0x18] sm:$0xff]  ;;  %v4893_v5 = vld [vmem:[%s6122_s4 + $0x20] sm:$0xff]  ;;  %p5014_p0 = scmp.ge.s32.totalorder %s5013_s6, %s7772_s12  ;;  %p4878_p1 = scmp.ge.s32.totalorder %s4879_s10, %s7772_s12 }
 0x4c1   : >> { %4890 = vst [vmem:[%s6118_s25 + $0x10] sm:$0xff] %v4889_v1  ;;  %v4895_v6 = vld [vmem:[%s6122_s4 + $0x28] sm:$0xff]  ;;  %4892 = vst [vmem:[%s6118_s25 + $0x18] sm:$0xff] %v4891_v4  ;;  %v4897_v7 = vld [vmem:[%s6122_s4 + $0x30] sm:$0xff] }
 0x4c2   : >> { %4894 = vst [vmem:[%s6118_s25 + $0x20] sm:$0xff] %v4893_v5  ;;  %4896 = vst [vmem:[%s6118_s25 + $0x28] sm:$0xff] %v4895_v6  ;;  %v4899_v8 = vld [vmem:[%s6122_s4 + $0x38] sm:$0xff]  ;;  %v4901_v23 = vld [vmem:[%s6122_s4 + $0x40] sm:$0xff]  ;;  %s8033_s6 = smov (%p5014_p0, %s5013_s6), 0 }
 0x4c3   : >> { %4898 = vst [vmem:[%s6118_s25 + $0x30] sm:$0xff] %v4897_v7  ;;  %4900 = vst [vmem:[%s6118_s25 + $0x38] sm:$0xff] %v4899_v8  ;;  %v4903_v24 = vld [vmem:[%s6122_s4 + $0x48] sm:$0xff]  ;;  %v4905_v15 = vld [vmem:[%s6122_s4 + $0x50] sm:$0xff]  ;;  %s5378_s16 = sshll.u32 %s8033_s6, 9  ;;  %s8005_s8 = smov %s8033_s6 }
 0x4c4   : >> { %4902 = vst [vmem:[%s6118_s25 + $0x40] sm:$0xff] %v4901_v23  ;;  %v4907_v11 = vld [vmem:[%s6122_s4 + $0x58] sm:$0xff]  ;;  %4904 = vst [vmem:[%s6118_s25 + $0x48] sm:$0xff] %v4903_v24  ;;  %v4909_v25 = vld [vmem:[%s6122_s4 + $0x60] sm:$0xff]  ;;  %s7839_s20 = scalar_lea.vmem %s6483_s18, %s5378_s16 [#allocation5]   ;;  %s7842_s22 = scalar_lea.vmem %s7766_s7, %s5378_s16  }
 0x4c5   : >> { %4906 = vst [vmem:[%s6118_s25 + $0x50] sm:$0xff] %v4905_v15  ;;  %4908 = vst [vmem:[%s6118_s25 + $0x58] sm:$0xff] %v4907_v11  ;;  %v4911_v26 = vld [vmem:[%s6122_s4 + $0x68] sm:$0xff]  ;;  %v4913_v31 = vld [vmem:[%s6122_s4 + $0x70] sm:$0xff] }
 0x4c6   : >> { %4910 = vst [vmem:[%s6118_s25 + $0x60] sm:$0xff] %v4909_v25  ;;  %4912 = vst [vmem:[%s6118_s25 + $0x68] sm:$0xff] %v4911_v26  ;;  %v4915_v12 = vld [vmem:[%s6122_s4 + $0x78] sm:$0xff]  ;;  %v4917_v2 = vld [vmem:[%s6122_s4 + $0x80] sm:$0xff] }
 0x4c7   : >> { %4914 = vst [vmem:[%s6118_s25 + $0x70] sm:$0xff] %v4913_v31  ;;  %v4919_v13 = vld [vmem:[%s6122_s4 + $0x88] sm:$0xff]  ;;  %4916 = vst [vmem:[%s6118_s25 + $0x78] sm:$0xff] %v4915_v12  ;;  %v4921_v33 = vld [vmem:[%s6122_s4 + $0x90] sm:$0xff] }
 0x4c8   : >> { %4918 = vst [vmem:[%s6118_s25 + $0x80] sm:$0xff] %v4917_v2  ;;  %4920 = vst [vmem:[%s6118_s25 + $0x88] sm:$0xff] %v4919_v13  ;;  %v4923_v9 = vld [vmem:[%s6122_s4 + $0x98] sm:$0xff]  ;;  %v4925_v20 = vld [vmem:[%s6122_s4 + $0xa0] sm:$0xff] }
 0x4c9   : >> { %4922 = vst [vmem:[%s6118_s25 + $0x90] sm:$0xff] %v4921_v33  ;;  %4924 = vst [vmem:[%s6118_s25 + $0x98] sm:$0xff] %v4923_v9  ;;  %v4927_v51 = vld [vmem:[%s6122_s4 + $0xa8] sm:$0xff]  ;;  %v4929_v62 = vld [vmem:[%s6122_s4 + $0xb0] sm:$0xff] }
 0x4ca   : >> { %4926 = vst [vmem:[%s6118_s25 + $0xa0] sm:$0xff] %v4925_v20  ;;  %v4931_v3 = vld [vmem:[%s6122_s4 + $0xb8] sm:$0xff]  ;;  %4928 = vst [vmem:[%s6118_s25 + $0xa8] sm:$0xff] %v4927_v51  ;;  %v4933_v22 = vld [vmem:[%s6122_s4 + $0xc0] sm:$0xff] }
 0x4cb   : >> { %4930 = vst [vmem:[%s6118_s25 + $0xb0] sm:$0xff] %v4929_v62  ;;  %4932 = vst [vmem:[%s6118_s25 + $0xb8] sm:$0xff] %v4931_v3  ;;  %v4935_v56 = vld [vmem:[%s6122_s4 + $0xc8] sm:$0xff]  ;;  %v4937_v28 = vld [vmem:[%s6122_s4 + $0xd0] sm:$0xff] }
 0x4cc   : >> { %4934 = vst [vmem:[%s6118_s25 + $0xc0] sm:$0xff] %v4933_v22  ;;  %4936 = vst [vmem:[%s6118_s25 + $0xc8] sm:$0xff] %v4935_v56  ;;  %v4939_v39 = vld [vmem:[%s6122_s4 + $0xd8] sm:$0xff]  ;;  %v4941_v27 = vld [vmem:[%s6122_s4 + $0xe0] sm:$0xff] }
 0x4cd   : >> { %4938 = vst [vmem:[%s6118_s25 + $0xd0] sm:$0xff] %v4937_v28  ;;  %v4943_v61 = vld [vmem:[%s6122_s4 + $0xe8] sm:$0xff]  ;;  %4940 = vst [vmem:[%s6118_s25 + $0xd8] sm:$0xff] %v4939_v39  ;;  %v4945_v29 = vld [vmem:[%s6122_s4 + $0xf0] sm:$0xff] }
 0x4ce   : >> { %4942 = vst [vmem:[%s6118_s25 + $0xe0] sm:$0xff] %v4941_v27  ;;  %4944 = vst [vmem:[%s6118_s25 + $0xe8] sm:$0xff] %v4943_v61  ;;  %v4947_v45 = vld [vmem:[%s6122_s4 + $0xf8] sm:$0xff]  ;;  %v4949_v57 = vld [vmem:[%s6122_s4 + $0x100] sm:$0xff] }
 0x4cf   : >> { %4946 = vst [vmem:[%s6118_s25 + $0xf0] sm:$0xff] %v4945_v29  ;;  %4948 = vst [vmem:[%s6118_s25 + $0xf8] sm:$0xff] %v4947_v45  ;;  %v4951_v30 = vld [vmem:[%s6122_s4 + $0x108] sm:$0xff]  ;;  %v4953_v10 = vld [vmem:[%s6122_s4 + $0x110] sm:$0xff] }
 0x4d0   : >> { %4950 = vst [vmem:[%s6118_s25 + $0x100] sm:$0xff] %v4949_v57  ;;  %v4955_v14 = vld [vmem:[%s6122_s4 + $0x118] sm:$0xff]  ;;  %4952 = vst [vmem:[%s6118_s25 + $0x108] sm:$0xff] %v4951_v30  ;;  %v4957_v32 = vld [vmem:[%s6122_s4 + $0x120] sm:$0xff] }
 0x4d1   : >> { %4954 = vst [vmem:[%s6118_s25 + $0x110] sm:$0xff] %v4953_v10  ;;  %4956 = vst [vmem:[%s6118_s25 + $0x118] sm:$0xff] %v4955_v14  ;;  %v4959_v34 = vld [vmem:[%s6122_s4 + $0x128] sm:$0xff]  ;;  %v4961_v21 = vld [vmem:[%s6122_s4 + $0x130] sm:$0xff] }
 0x4d2   : >> { %4958 = vst [vmem:[%s6118_s25 + $0x120] sm:$0xff] %v4957_v32  ;;  %4960 = vst [vmem:[%s6118_s25 + $0x128] sm:$0xff] %v4959_v34  ;;  %v4963_v35 = vld [vmem:[%s6122_s4 + $0x138] sm:$0xff]  ;;  %v4965_v36 = vld [vmem:[%s6122_s4 + $0x140] sm:$0xff] }
 0x4d3   : >> { %4962 = vst [vmem:[%s6118_s25 + $0x130] sm:$0xff] %v4961_v21  ;;  %v4967_v54 = vld [vmem:[%s6122_s4 + $0x148] sm:$0xff]  ;;  %4964 = vst [vmem:[%s6118_s25 + $0x138] sm:$0xff] %v4963_v35  ;;  %v4969_v63 = vld [vmem:[%s6122_s4 + $0x150] sm:$0xff] }
 0x4d4   : >> { %4966 = vst [vmem:[%s6118_s25 + $0x140] sm:$0xff] %v4965_v36  ;;  %4968 = vst [vmem:[%s6118_s25 + $0x148] sm:$0xff] %v4967_v54  ;;  %v4971_v37 = vld [vmem:[%s6122_s4 + $0x158] sm:$0xff]  ;;  %v4973_v38 = vld [vmem:[%s6122_s4 + $0x160] sm:$0xff] }
 0x4d5   : >> { %4970 = vst [vmem:[%s6118_s25 + $0x150] sm:$0xff] %v4969_v63  ;;  %4972 = vst [vmem:[%s6118_s25 + $0x158] sm:$0xff] %v4971_v37  ;;  %v4975_v40 = vld [vmem:[%s6122_s4 + $0x168] sm:$0xff]  ;;  %v4977_v41 = vld [vmem:[%s6122_s4 + $0x170] sm:$0xff] }
 0x4d6   : >> { %4974 = vst [vmem:[%s6118_s25 + $0x160] sm:$0xff] %v4973_v38  ;;  %v4979_v42 = vld [vmem:[%s6122_s4 + $0x178] sm:$0xff]  ;;  %4976 = vst [vmem:[%s6118_s25 + $0x168] sm:$0xff] %v4975_v40  ;;  %v4981_v46 = vld [vmem:[%s6122_s4 + $0x180] sm:$0xff] }
 0x4d7   : >> { %4978 = vst [vmem:[%s6118_s25 + $0x170] sm:$0xff] %v4977_v41  ;;  %4980 = vst [vmem:[%s6118_s25 + $0x178] sm:$0xff] %v4979_v42  ;;  %v4983_v43 = vld [vmem:[%s6122_s4 + $0x188] sm:$0xff]  ;;  %v4985_v44 = vld [vmem:[%s6122_s4 + $0x190] sm:$0xff] }
 0x4d8   : >> { %4982 = vst [vmem:[%s6118_s25 + $0x180] sm:$0xff] %v4981_v46  ;;  %4984 = vst [vmem:[%s6118_s25 + $0x188] sm:$0xff] %v4983_v43  ;;  %v4987_v47 = vld [vmem:[%s6122_s4 + $0x198] sm:$0xff]  ;;  %v4989_v48 = vld [vmem:[%s6122_s4 + $0x1a0] sm:$0xff] }
 0x4d9   : >> { %4986 = vst [vmem:[%s6118_s25 + $0x190] sm:$0xff] %v4985_v44  ;;  %v4991_v49 = vld [vmem:[%s6122_s4 + $0x1a8] sm:$0xff]  ;;  %4988 = vst [vmem:[%s6118_s25 + $0x198] sm:$0xff] %v4987_v47  ;;  %v4993_v50 = vld [vmem:[%s6122_s4 + $0x1b0] sm:$0xff]  ;;  %4881 = sbr.rel (!%p4878_p1) target bundleno = 1215 (0x4bf), region = 200 }
 0x4da   : >> { %4990 = vst [vmem:[%s6118_s25 + $0x1a0] sm:$0xff] %v4989_v48  ;;  %4992 = vst [vmem:[%s6118_s25 + $0x1a8] sm:$0xff] %v4991_v49  ;;  %v4995_v60 = vld [vmem:[%s6122_s4 + $0x1b8] sm:$0xff]  ;;  %v4997_v16 = vld [vmem:[%s6122_s4 + $0x1c0] sm:$0xff] }
 0x4db   : >> { %4994 = vst [vmem:[%s6118_s25 + $0x1b0] sm:$0xff] %v4993_v50  ;;  %4996 = vst [vmem:[%s6118_s25 + $0x1b8] sm:$0xff] %v4995_v60  ;;  %v4999_v52 = vld [vmem:[%s6122_s4 + $0x1c8] sm:$0xff]  ;;  %v5001_v53 = vld [vmem:[%s6122_s4 + $0x1d0] sm:$0xff] }
 0x4dc   : >> { %4998 = vst [vmem:[%s6118_s25 + $0x1c0] sm:$0xff] %v4997_v16  ;;  %v5003_v55 = vld [vmem:[%s6122_s4 + $0x1d8] sm:$0xff]  ;;  %5000 = vst [vmem:[%s6118_s25 + $0x1c8] sm:$0xff] %v4999_v52  ;;  %v5005_v58 = vld [vmem:[%s6122_s4 + $0x1e0] sm:$0xff] }
 0x4dd   : >> { %5002 = vst [vmem:[%s6118_s25 + $0x1d0] sm:$0xff] %v5001_v53  ;;  %5004 = vst [vmem:[%s6118_s25 + $0x1d8] sm:$0xff] %v5003_v55  ;;  %v5007_v59 = vld [vmem:[%s6122_s4 + $0x1e8] sm:$0xff]  ;;  %v5009_v17 = vld [vmem:[%s6122_s4 + $0x1f0] sm:$0xff] }
 0x4de   : >> { %5006 = vst [vmem:[%s6118_s25 + $0x1e0] sm:$0xff] %v5005_v58  ;;  %5008 = vst [vmem:[%s6118_s25 + $0x1e8] sm:$0xff] %v5007_v59  ;;  %v5011_v0 = vld [vmem:[%s6122_s4 + $0x1f8] sm:$0xff]  ;;  %s8004_s4 = smov %s7839_s20 }
 0x4df   : >> { %5010 = vst [vmem:[%s6118_s25 + $0x1f0] sm:$0xff] %v5009_v17  ;;  %5012 = vst [vmem:[%s6118_s25 + $0x1f8] sm:$0xff] %v5011_v0  ;;  %s8003_s25 = smov %s7842_s22 }
 0x4e0 PF: > { %s7947_s30 = sand.u32 63, %s8031_s11   ;;  %s5392_s0 = sshll.u32 %s7772_s12, 9 }
 0x4e1   : > { %s5024_s24 = scalar_lea.vmem %s6483_s18, %s5392_s0 [#allocation5]   ;;  %s5026_s29 = scalar_lea.vmem %s7766_s7, %s5392_s0  }
 0x4e2   : > { %p5383_p2 = scmp.le.s32.totalorder %s7947_s30, 0 }
 0x4e3   : > { %s6132_s19 = smov (!%p5383_p2), %s5026_s29   ;;  %s6136_s15 = smov (!%p5383_p2), %s5024_s24  }
 0x4e4   : > { %5168 = sbr.rel (%p5383_p2) target bundleno = 1269 (0x4f5), region = 205  ;;  %s6140_s17 = smov (!%p5383_p2), 0  }
 0x4e5   : > { %s6144_s9 = smov (!%p5383_p2), 0  }
 0x4eb LB: >> { %v5036_v18 = vld [vmem:[%s6138_s15] sm:$0xff]  ;;  %s5038_s11 = sadd.s32 1, %s6142_s17  ;;  %s5030_s9 = sadd.s32 1, %s6146_s9   ;;  %s6146_s9 = sphi %s6144_s9, %s5030_s9   ;;  %s6142_s17 = sphi %s6140_s17, %s6141_s17   ;;  %s6138_s15 = sphi %s6136_s15, %s5043_s15   ;;  %s6134_s19 = sphi %s6132_s19, %s5044_s19  }
 0x4ec   : >> { %5037 = vst [vmem:[%s6134_s19] sm:$0xff] %v5036_v18  ;;  %p5039_p3 = scmp.ge.s32.totalorder %s5038_s11, %s7947_s30  ;;  %p5029_p4 = scmp.ge.s32.totalorder %s5030_s9, %s7947_s30 }
 0x4ee   : >> { %s8035_s11 = smov (%p5039_p3, %s5038_s11), 0  ;;  %5032 = sbr.rel (!%p5029_p4) target bundleno = 1259 (0x4eb), region = 211 }
 0x4ef   : >> { %s5384_s18 = sshll.u32 %s8035_s11, 3  ;;  %s6141_s17 = smov %s8035_s11  }
 0x4f0   : >> { %s5043_s15 = scalar_lea.vmem %s5024_s24, %s5384_s18 [#allocation5]   ;;  %s5044_s19 = scalar_lea.vmem %s5026_s29, %s5384_s18  }
 0x4f5 PF: > { %s16_s28 = sadd.s32 1, %s6082_s28   ;;  %s8006_s7 = sld [smem:[#allocation6_spill]] }
 0x4f6   : > { %p13_p5 = scmp.ge.s32.totalorder %s16_s28, 20   ;;  %s8007_s12 = sld [smem:[#allocation7_spill]] }
 0x4f7   : > { %s8008_s20 = smov %s6054_s21  ;;  %s8009_s21 = smov %s6255_s13 }
 0x4f8   : > { %s8010_s22 = smov %s6062_s23  ;;  %s8011_s23 = smov %s6258_s14 }
 0x4f9   : > { %s8012_s24 = smov %s6074_s26  ;;  %s8013_s25 = smov %s6078_s27 }
 0x4fa   :  { %15 = sbr.rel (!%p13_p5) target bundleno = 8 (0x8), region = 222 }
 0x4fb   : > { %s8014_s26 = smov %s8006_s7 }
 0x4fc   : > { %s8015_s27 = smov %s8007_s12 }

</bundles_post_ra>
